<compile_context>
chip_gen: v7x
topology: tpu7x:2x2x1
jax: 0.10.0
libtpu: 0.0.40
codegen_flags: <defaults>
</compile_context>

<pallas_src>
import functools

import numpy as np

import jax
import jax.numpy as jnp
from jax.experimental import pallas as pl
from jax.experimental.pallas import tpu as pltpu

MODEL_CONFIG = {
    "Conv2D_1": {"filters": 16, "kernel_size": (3, 3)},
    "Conv2D_2": {"filters": 32, "kernel_size": (3, 3)},
    "Flatten_1": {},
    "Dense_1": {"units": 64},
}


# ---------------------------------------------------------------------------
# Fused forward kernel: one grid step == one block of images, all in VMEM.
# ---------------------------------------------------------------------------
def _fused_dqn_kernel(x_ref, w1_ref, b1_ref, w2_ref, b2_ref,
                      wd_ref, bd_ref, wo_ref, bo_ref, o_ref,
                      *, img_h, n_imgs):
    f32 = jnp.float32
    bf16 = jnp.bfloat16

    # Row-stacked activations for the whole image block: (B*H, W*Cin).
    x = x_ref[...].astype(bf16)

    # ---- Conv2D_1 + ReLU: sum over KH of rows[di:di+M1] @ Toeplitz_di ------
    # Rows spanning two images produce garbage that is never read downstream.
    kh1 = w1_ref.shape[0]
    m1 = x.shape[0] - kh1 + 1
    acc1 = jnp.dot(x[0:m1, :], w1_ref[0], preferred_element_type=f32)
    for di in range(1, kh1):
        acc1 = acc1 + jnp.dot(x[di:di + m1, :], w1_ref[di],
                              preferred_element_type=f32)
    h1 = jnp.maximum(acc1 + b1_ref[...], 0.0).astype(bf16)   # (M1, Wo1*C1)

    # ---- Conv2D_2 + ReLU ---------------------------------------------------
    kh2 = w2_ref.shape[0]
    m2 = m1 - kh2 + 1
    acc2 = jnp.dot(h1[0:m2, :], w2_ref[0], preferred_element_type=f32)
    for di in range(1, kh2):
        acc2 = acc2 + jnp.dot(h1[di:di + m2, :], w2_ref[di],
                              preferred_element_type=f32)
    h2 = jnp.maximum(acc2 + b2_ref[...], 0.0).astype(bf16)   # (M2, Wo2*C2)

    # ---- Flatten + Dense_1 + ReLU ------------------------------------------
    # Dense over the (ho, wo, c) activation == a KH=ho2 "vertical conv" over
    # the row slab; valid outputs live at rows b*img_h for each image b.
    ho2 = wd_ref.shape[0]
    m3 = m2 - ho2 + 1
    acc3 = jnp.dot(h2[0:m3, :], wd_ref[0], preferred_element_type=f32)
    for ho in range(1, ho2):
        acc3 = acc3 + jnp.dot(h2[ho:ho + m3, :], wd_ref[ho],
                              preferred_element_type=f32)
    rows = [acc3[b * img_h: b * img_h + 1, :] for b in range(n_imgs)]
    h3 = jnp.concatenate(rows, axis=0) if n_imgs > 1 else rows[0]   # (B, units)
    h3 = jnp.maximum(h3 + bd_ref[...], 0.0).astype(bf16)

    # ---- Output linear (n_actions padded to 128 lanes -> dense store) ------
    q = jnp.dot(h3, wo_ref[...], preferred_element_type=f32) + bo_ref[...]
    o_ref[...] = q.astype(o_ref.dtype)                        # (B, 128)


@functools.partial(jax.jit, static_argnames=("n_actions",))
def dqn_forward(kp, x, *, n_actions):
    """x: (N, Cin, H, W) NCHW (PyTorch layout) -> (N, n_actions)."""
    n, c, h, w = x.shape
    n_act_pad = kp["bo"].shape[1]

    # Block of images per grid step (single block at small batch).
    b_blk = n if n <= 8 else 8
    n_blocks = pl.cdiv(n, b_blk)
    n_pad = n_blocks * b_blk

    # One tiny layout op on the raw input only; all per-layer layout work is
    # folded into the weights at init.  Images row-stacked: (N_pad*H, W*Cin).
    x2 = jnp.transpose(x, (0, 2, 3, 1)).reshape(n, h, w * c)
    if n_pad != n:
        x2 = jnp.concatenate(
            [x2, jnp.zeros((n_pad - n, h, w * c), x2.dtype)], axis=0)
    x2 = x2.reshape(n_pad * h, w * c)

    kh1, k1, n1 = kp["w1"].shape
    kh2, k2, n2 = kp["w2"].shape
    ho2, k3, units = kp["wd"].shape
    m1 = b_blk * h - kh1 + 1
    m2 = m1 - kh2 + 1
    m3 = m2 - ho2 + 1
    flops = 2 * n_blocks * (kh1 * m1 * k1 * n1 + kh2 * m2 * k2 * n2
                            + ho2 * m3 * k3 * units
                            + b_blk * units * n_act_pad)
    bytes_accessed = (x2.size * x2.dtype.itemsize
                      + sum(int(v.size) * v.dtype.itemsize for v in kp.values())
                      + n_pad * n_act_pad * 4)

    kernel = functools.partial(_fused_dqn_kernel, img_h=h, n_imgs=b_blk)

    out = pl.pallas_call(
        kernel,
        out_shape=jax.ShapeDtypeStruct((n_pad, n_act_pad), jnp.float32),
        grid=(n_blocks,),
        in_specs=[
            pl.BlockSpec((b_blk * h, w * c), lambda i: (i, 0)),   # image block
            pl.BlockSpec(kp["w1"].shape, lambda i: (0, 0, 0)),    # weights:
            pl.BlockSpec(kp["b1"].shape, lambda i: (0, 0)),       # constant
            pl.BlockSpec(kp["w2"].shape, lambda i: (0, 0, 0)),    # blocks ->
            pl.BlockSpec(kp["b2"].shape, lambda i: (0, 0)),       # fetched
            pl.BlockSpec(kp["wd"].shape, lambda i: (0, 0, 0)),    # once,
            pl.BlockSpec(kp["bd"].shape, lambda i: (0, 0)),       # VMEM-
            pl.BlockSpec(kp["wo"].shape, lambda i: (0, 0)),       # resident
            pl.BlockSpec(kp["bo"].shape, lambda i: (0, 0)),
        ],
        out_specs=pl.BlockSpec((b_blk, n_act_pad), lambda i: (i, 0)),
        compiler_params=pltpu.CompilerParams(
            # Tiny batch: don't duplicate the weight fetch across the two v7x
            # TensorCores.  Switch to ("parallel",) when batch is large.
            dimension_semantics=("arbitrary",)),
        cost_estimate=pl.CostEstimate(flops=flops, transcendentals=0,
                                      bytes_accessed=bytes_accessed),
    )(x2, kp["w1"], kp["b1"], kp["w2"], kp["b2"],
      kp["wd"], kp["bd"], kp["wo"], kp["bo"])
    return out[:n, :n_actions]


# ---------------------------------------------------------------------------
# One-time (init) weight preparation: PyTorch layout -> kernel layout.
# ---------------------------------------------------------------------------
def _conv_toeplitz_w(w_oihw, in_w):
    """(Cout, Cin, KH, KW) torch conv weight -> (KH, in_w*Cin, out_w*Cout).

    For each vertical offset di, M_di maps a full activation row (W*Cin lanes)
    to a full output row (Wo*Cout lanes):
      M_di[w*Cin + c, wo*Cout + co] = W[co, c, di, w - wo]  if 0 <= w-wo < KW.
    """
    w_np = np.asarray(w_oihw, dtype=np.float32)
    cout, cin, kh, kw = w_np.shape
    out_w = in_w - kw + 1
    m = np.zeros((kh, in_w * cin, out_w * cout), np.float32)
    for di in range(kh):
        for dj in range(kw):
            blk = w_np[:, :, di, dj].T                        # (Cin, Cout)
            for wo in range(out_w):
                wi = wo + dj
                m[di, wi * cin:(wi + 1) * cin, wo * cout:(wo + 1) * cout] = blk
    return jnp.asarray(m)


def prepare_kernel_params(params, board_size):
    """Convert torch-layout params (from init_params) to kernel-layout arrays.

    Returns a dict containing ONLY jnp arrays (jit-compatible pytree).
    Matmul weights are stored in bfloat16; biases stay float32.
    """
    convs = [(w, b) for kind, w, b in params if kind == "conv"]
    denses = [(w, b) for kind, w, b in params if kind == "dense"]
    outs = [(w, b) for kind, w, b in params if kind == "output"]
    assert len(convs) == 2 and len(denses) == 1 and len(outs) == 1
    (w1, b1), (w2, b2) = convs
    (wd, bd), = denses
    (wout, bout), = outs

    kp = {}
    # Conv2D_1
    c1, _, kh1, kw1 = w1.shape
    in_w1 = board_size
    wo1 = in_w1 - kw1 + 1
    ho1 = board_size - kh1 + 1
    kp["w1"] = _conv_toeplitz_w(w1, in_w1).astype(jnp.bfloat16)  # (3, W*Cin, Wo1*C1)
    kp["b1"] = jnp.tile(b1, wo1).reshape(1, wo1 * c1).astype(jnp.float32)
    # Conv2D_2
    c2, _, kh2, kw2 = w2.shape
    wo2 = wo1 - kw2 + 1
    ho2 = ho1 - kh2 + 1
    kp["w2"] = _conv_toeplitz_w(w2, wo1).astype(jnp.bfloat16)    # (3, Wo1*C1, Wo2*C2)
    kp["b2"] = jnp.tile(b2, wo2).reshape(1, wo2 * c2).astype(jnp.float32)
    # Dense_1: fold PyTorch NCHW flatten order (c, ho, wo) into the weight so
    # the kernel can contract the NHWC-ordered activation directly.
    units = wd.shape[0]
    wd4 = wd.reshape(units, c2, ho2, wo2)                        # [u, c, ho, wo]
    kp["wd"] = jnp.transpose(wd4, (2, 3, 1, 0)).reshape(
        ho2, wo2 * c2, units).astype(jnp.bfloat16)
    kp["bd"] = bd.reshape(1, units).astype(jnp.float32)
    # Output linear, padded to a lane-dense 128-wide output.
    n_actions = wout.shape[0]
    n_act_pad = ((n_actions + 127) // 128) * 128
    wo_pad = jnp.zeros((units, n_act_pad), jnp.float32).at[:, :n_actions].set(wout.T)
    bo_pad = jnp.zeros((1, n_act_pad), jnp.float32).at[0, :n_actions].set(bout)
    kp["wo"] = wo_pad.astype(jnp.bfloat16)
    kp["bo"] = bo_pad
    return kp


# ---------------------------------------------------------------------------
# Deterministic parameter init (shapes follow DQNModel.__init__) + reference.
# ---------------------------------------------------------------------------
def init_params(key, n_frames, board_size, n_actions):
    params = []
    in_shape = (n_frames, board_size, board_size)
    last_units = None
    for name, p in MODEL_CONFIG.items():
        if "Conv2D" in name:
            kh, kw = p["kernel_size"]
            cout = p["filters"]
            key, k1, k2 = jax.random.split(key, 3)
            w = jax.random.normal(k1, (cout, in_shape[0], kh, kw), jnp.float32) * 0.05
            b = jax.random.normal(k2, (cout,), jnp.float32) * 0.05
            params.append(("conv", w, b))
            in_shape = (cout, in_shape[1] - kh + 1, in_shape[2] - kw + 1)
        elif "Flatten" in name:
            params.append(("flatten", None, None))
            in_shape = in_shape[0] * in_shape[1] * in_shape[2]
        elif "Dense" in name:
            units = p["units"]
            fan_in = in_shape if isinstance(in_shape, int) else (
                in_shape[0] * in_shape[1] * in_shape[2])
            key, k1, k2 = jax.random.split(key, 3)
            w = jax.random.normal(k1, (units, fan_in), jnp.float32) * 0.05
            b = jax.random.normal(k2, (units,), jnp.float32) * 0.05
            params.append(("dense", w, b))
            in_shape = units
            last_units = units
    key, k1, k2 = jax.random.split(key, 3)
    w = jax.random.normal(k1, (n_actions, last_units), jnp.float32) * 0.05
    b = jax.random.normal(k2, (n_actions,), jnp.float32) * 0.05
    params.append(("output", w, b))
    return params


def dqn_forward_ref(params, x):
    """Pure-JAX reference (no Pallas), torch-layout params, NCHW input."""
    for kind, w, b in params:
        if kind == "conv":
            y = jax.lax.conv_general_dilated(
                x, w, window_strides=(1, 1), padding="VALID",
                dimension_numbers=("NCHW", "OIHW", "NCHW"))
            x = jax.nn.relu(y + b[None, :, None, None])
        elif kind == "flatten":
            x = x.reshape(x.shape[0], -1)
        elif kind == "dense":
            x = jax.nn.relu(x @ w.T + b)
        elif kind == "output":
            x = x @ w.T + b
    return x


if __name__ == "__main__":
    batch, n_frames, board_size, n_actions = 2, 4, 16, 4

    key = jax.random.PRNGKey(0)
    key, kx = jax.random.split(key)
    x = jax.random.normal(kx, (batch, n_frames, board_size, board_size), jnp.float32)

    torch_params = init_params(key, n_frames, board_size, n_actions)
    kernel_params = prepare_kernel_params(torch_params, board_size)   # arrays only

    out = jax.block_until_ready(dqn_forward(kernel_params, x, n_actions=n_actions))
    assert out.shape == (batch, n_actions), out.shape

    ref = jax.block_until_ready(dqn_forward_ref(torch_params, x))
    max_err = float(jnp.max(jnp.abs(out - ref)))
    # bf16 matmul operands -> tolerance loosened vs the pure-f32 version.
    assert jnp.allclose(out, ref, rtol=2e-2, atol=5e-3), ("mismatch vs reference", max_err)

    print("KERNEL_OK")
</pallas_src>

<mosaic_0001>
module attributes {stable_mosaic.version = 11 : i64} {
  func.func @_fused_dqn_kernel(%arg0: i32, %arg1: memref<32x64xf32, #tpu.memory_space<vmem>>, %arg2: memref<3x64x224xbf16, #tpu.memory_space<vmem>>, %arg3: memref<1x224xf32, #tpu.memory_space<vmem>>, %arg4: memref<3x224x384xbf16, #tpu.memory_space<vmem>>, %arg5: memref<1x384xf32, #tpu.memory_space<vmem>>, %arg6: memref<12x384x64xbf16, #tpu.memory_space<vmem>>, %arg7: memref<1x64xf32, #tpu.memory_space<vmem>>, %arg8: memref<64x128xbf16, #tpu.memory_space<vmem>>, %arg9: memref<1x128xf32, #tpu.memory_space<vmem>>, %arg10: memref<2x128xf32, #tpu.memory_space<vmem>>) attributes {dimension_semantics = [#tpu.dimension_semantics<arbitrary>], iteration_bounds = array<i64: 1>, scalar_prefetch = 0 : i64, scratch_operands = 0 : i64, tpu.core_type = #tpu.core_type<tc>, window_params = [{transform_indices = @transform_0, window_bounds = array<i64: 32, 64>}, {pipeline_mode = #tpu.pipeline_mode<synchronous>, transform_indices = @transform_1, window_bounds = array<i64: 3, 64, 224>}, {pipeline_mode = #tpu.pipeline_mode<synchronous>, transform_indices = @transform_2, window_bounds = array<i64: 1, 224>}, {pipeline_mode = #tpu.pipeline_mode<synchronous>, transform_indices = @transform_3, window_bounds = array<i64: 3, 224, 384>}, {pipeline_mode = #tpu.pipeline_mode<synchronous>, transform_indices = @transform_4, window_bounds = array<i64: 1, 384>}, {pipeline_mode = #tpu.pipeline_mode<synchronous>, transform_indices = @transform_5, window_bounds = array<i64: 12, 384, 64>}, {pipeline_mode = #tpu.pipeline_mode<synchronous>, transform_indices = @transform_6, window_bounds = array<i64: 1, 64>}, {pipeline_mode = #tpu.pipeline_mode<synchronous>, transform_indices = @transform_7, window_bounds = array<i64: 64, 128>}, {pipeline_mode = #tpu.pipeline_mode<synchronous>, transform_indices = @transform_8, window_bounds = array<i64: 1, 128>}, {transform_indices = @transform_9, window_bounds = array<i64: 2, 128>}]} {
    %c0 = arith.constant 0 : index
    %c0_0 = arith.constant 0 : index
    %0 = vector.load %arg1[%c0, %c0_0] : memref<32x64xf32, #tpu.memory_space<vmem>>, vector<32x64xf32>
    %1 = arith.truncf %0 : vector<32x64xf32> to vector<32x64xbf16>
    %2 = vector.extract_strided_slice %1 {offsets = [0, 0], sizes = [30, 64], strides = [1, 1]} : vector<32x64xbf16> to vector<30x64xbf16>
    %c0_1 = arith.constant 0 : index
    %c0_2 = arith.constant 0 : index
    %c0_3 = arith.constant 0 : index
    %3 = vector.load %arg2[%c0_1, %c0_2, %c0_3] : memref<3x64x224xbf16, #tpu.memory_space<vmem>>, vector<1x64x224xbf16>
    %4 = vector.shape_cast %3 : vector<1x64x224xbf16> to vector<64x224xbf16>
    %cst = arith.constant dense<0.000000e+00> : vector<30x224xf32>
    %5 = tpu.matmul %2, %4, %cst {dimension_numbers = #tpu.dot_dimension_numbers<[1], [0], [0], [1], [0, 0, 1, 1], [], []>} : vector<30x64xbf16>, vector<64x224xbf16>, vector<30x224xf32> -> vector<30x224xf32>
    %6 = vector.extract_strided_slice %1 {offsets = [1, 0], sizes = [30, 64], strides = [1, 1]} : vector<32x64xbf16> to vector<30x64xbf16>
    %c1 = arith.constant 1 : index
    %c0_4 = arith.constant 0 : index
    %c0_5 = arith.constant 0 : index
    %7 = vector.load %arg2[%c1, %c0_4, %c0_5] : memref<3x64x224xbf16, #tpu.memory_space<vmem>>, vector<1x64x224xbf16>
    %8 = vector.shape_cast %7 : vector<1x64x224xbf16> to vector<64x224xbf16>
    %cst_6 = arith.constant dense<0.000000e+00> : vector<30x224xf32>
    %9 = tpu.matmul %6, %8, %cst_6 {dimension_numbers = #tpu.dot_dimension_numbers<[1], [0], [0], [1], [0, 0, 1, 1], [], []>} : vector<30x64xbf16>, vector<64x224xbf16>, vector<30x224xf32> -> vector<30x224xf32>
    %10 = arith.addf %5, %9 : vector<30x224xf32>
    %11 = vector.extract_strided_slice %1 {offsets = [2, 0], sizes = [30, 64], strides = [1, 1]} : vector<32x64xbf16> to vector<30x64xbf16>
    %c2 = arith.constant 2 : index
    %c0_7 = arith.constant 0 : index
    %c0_8 = arith.constant 0 : index
    %12 = vector.load %arg2[%c2, %c0_7, %c0_8] : memref<3x64x224xbf16, #tpu.memory_space<vmem>>, vector<1x64x224xbf16>
    %13 = vector.shape_cast %12 : vector<1x64x224xbf16> to vector<64x224xbf16>
    %cst_9 = arith.constant dense<0.000000e+00> : vector<30x224xf32>
    %14 = tpu.matmul %11, %13, %cst_9 {dimension_numbers = #tpu.dot_dimension_numbers<[1], [0], [0], [1], [0, 0, 1, 1], [], []>} : vector<30x64xbf16>, vector<64x224xbf16>, vector<30x224xf32> -> vector<30x224xf32>
    %15 = arith.addf %10, %14 : vector<30x224xf32>
    %c0_10 = arith.constant 0 : index
    %c0_11 = arith.constant 0 : index
    %16 = vector.load %arg3[%c0_10, %c0_11] : memref<1x224xf32, #tpu.memory_space<vmem>>, vector<1x224xf32>
    %17 = vector.broadcast %16 : vector<1x224xf32> to vector<30x224xf32>
    %18 = arith.addf %15, %17 : vector<30x224xf32>
    %cst_12 = arith.constant 0.000000e+00 : f32
    %19 = vector.broadcast %cst_12 : f32 to vector<30x224xf32>
    %20 = arith.maximumf %18, %19 : vector<30x224xf32>
    %21 = arith.truncf %20 : vector<30x224xf32> to vector<30x224xbf16>
    %22 = vector.extract_strided_slice %21 {offsets = [0, 0], sizes = [28, 224], strides = [1, 1]} : vector<30x224xbf16> to vector<28x224xbf16>
    %c0_13 = arith.constant 0 : index
    %c0_14 = arith.constant 0 : index
    %c0_15 = arith.constant 0 : index
    %23 = vector.load %arg4[%c0_13, %c0_14, %c0_15] : memref<3x224x384xbf16, #tpu.memory_space<vmem>>, vector<1x224x384xbf16>
    %24 = vector.shape_cast %23 : vector<1x224x384xbf16> to vector<224x384xbf16>
    %cst_16 = arith.constant dense<0.000000e+00> : vector<28x384xf32>
    %25 = tpu.matmul %22, %24, %cst_16 {dimension_numbers = #tpu.dot_dimension_numbers<[1], [0], [0], [1], [0, 0, 1, 1], [], []>} : vector<28x224xbf16>, vector<224x384xbf16>, vector<28x384xf32> -> vector<28x384xf32>
    %26 = vector.extract_strided_slice %21 {offsets = [1, 0], sizes = [28, 224], strides = [1, 1]} : vector<30x224xbf16> to vector<28x224xbf16>
    %c1_17 = arith.constant 1 : index
    %c0_18 = arith.constant 0 : index
    %c0_19 = arith.constant 0 : index
    %27 = vector.load %arg4[%c1_17, %c0_18, %c0_19] : memref<3x224x384xbf16, #tpu.memory_space<vmem>>, vector<1x224x384xbf16>
    %28 = vector.shape_cast %27 : vector<1x224x384xbf16> to vector<224x384xbf16>
    %cst_20 = arith.constant dense<0.000000e+00> : vector<28x384xf32>
    %29 = tpu.matmul %26, %28, %cst_20 {dimension_numbers = #tpu.dot_dimension_numbers<[1], [0], [0], [1], [0, 0, 1, 1], [], []>} : vector<28x224xbf16>, vector<224x384xbf16>, vector<28x384xf32> -> vector<28x384xf32>
    %30 = arith.addf %25, %29 : vector<28x384xf32>
    %31 = vector.extract_strided_slice %21 {offsets = [2, 0], sizes = [28, 224], strides = [1, 1]} : vector<30x224xbf16> to vector<28x224xbf16>
    %c2_21 = arith.constant 2 : index
    %c0_22 = arith.constant 0 : index
    %c0_23 = arith.constant 0 : index
    %32 = vector.load %arg4[%c2_21, %c0_22, %c0_23] : memref<3x224x384xbf16, #tpu.memory_space<vmem>>, vector<1x224x384xbf16>
    %33 = vector.shape_cast %32 : vector<1x224x384xbf16> to vector<224x384xbf16>
    %cst_24 = arith.constant dense<0.000000e+00> : vector<28x384xf32>
    %34 = tpu.matmul %31, %33, %cst_24 {dimension_numbers = #tpu.dot_dimension_numbers<[1], [0], [0], [1], [0, 0, 1, 1], [], []>} : vector<28x224xbf16>, vector<224x384xbf16>, vector<28x384xf32> -> vector<28x384xf32>
    %35 = arith.addf %30, %34 : vector<28x384xf32>
    %c0_25 = arith.constant 0 : index
    %c0_26 = arith.constant 0 : index
    %36 = vector.load %arg5[%c0_25, %c0_26] : memref<1x384xf32, #tpu.memory_space<vmem>>, vector<1x384xf32>
    %37 = vector.broadcast %36 : vector<1x384xf32> to vector<28x384xf32>
    %38 = arith.addf %35, %37 : vector<28x384xf32>
    %cst_27 = arith.constant 0.000000e+00 : f32
    %39 = vector.broadcast %cst_27 : f32 to vector<28x384xf32>
    %40 = arith.maximumf %38, %39 : vector<28x384xf32>
    %41 = arith.truncf %40 : vector<28x384xf32> to vector<28x384xbf16>
    %42 = vector.extract_strided_slice %41 {offsets = [0, 0], sizes = [17, 384], strides = [1, 1]} : vector<28x384xbf16> to vector<17x384xbf16>
    %c0_28 = arith.constant 0 : index
    %c0_29 = arith.constant 0 : index
    %c0_30 = arith.constant 0 : index
    %43 = vector.load %arg6[%c0_28, %c0_29, %c0_30] : memref<12x384x64xbf16, #tpu.memory_space<vmem>>, vector<1x384x64xbf16>
    %44 = vector.shape_cast %43 : vector<1x384x64xbf16> to vector<384x64xbf16>
    %cst_31 = arith.constant dense<0.000000e+00> : vector<17x64xf32>
    %45 = tpu.matmul %42, %44, %cst_31 {dimension_numbers = #tpu.dot_dimension_numbers<[1], [0], [0], [1], [0, 0, 1, 1], [], []>} : vector<17x384xbf16>, vector<384x64xbf16>, vector<17x64xf32> -> vector<17x64xf32>
    %46 = vector.extract_strided_slice %41 {offsets = [1, 0], sizes = [17, 384], strides = [1, 1]} : vector<28x384xbf16> to vector<17x384xbf16>
    %c1_32 = arith.constant 1 : index
    %c0_33 = arith.constant 0 : index
    %c0_34 = arith.constant 0 : index
    %47 = vector.load %arg6[%c1_32, %c0_33, %c0_34] : memref<12x384x64xbf16, #tpu.memory_space<vmem>>, vector<1x384x64xbf16>
    %48 = vector.shape_cast %47 : vector<1x384x64xbf16> to vector<384x64xbf16>
    %cst_35 = arith.constant dense<0.000000e+00> : vector<17x64xf32>
    %49 = tpu.matmul %46, %48, %cst_35 {dimension_numbers = #tpu.dot_dimension_numbers<[1], [0], [0], [1], [0, 0, 1, 1], [], []>} : vector<17x384xbf16>, vector<384x64xbf16>, vector<17x64xf32> -> vector<17x64xf32>
    %50 = arith.addf %45, %49 : vector<17x64xf32>
    %51 = vector.extract_strided_slice %41 {offsets = [2, 0], sizes = [17, 384], strides = [1, 1]} : vector<28x384xbf16> to vector<17x384xbf16>
    %c2_36 = arith.constant 2 : index
    %c0_37 = arith.constant 0 : index
    %c0_38 = arith.constant 0 : index
    %52 = vector.load %arg6[%c2_36, %c0_37, %c0_38] : memref<12x384x64xbf16, #tpu.memory_space<vmem>>, vector<1x384x64xbf16>
    %53 = vector.shape_cast %52 : vector<1x384x64xbf16> to vector<384x64xbf16>
    %cst_39 = arith.constant dense<0.000000e+00> : vector<17x64xf32>
    %54 = tpu.matmul %51, %53, %cst_39 {dimension_numbers = #tpu.dot_dimension_numbers<[1], [0], [0], [1], [0, 0, 1, 1], [], []>} : vector<17x384xbf16>, vector<384x64xbf16>, vector<17x64xf32> -> vector<17x64xf32>
    %55 = arith.addf %50, %54 : vector<17x64xf32>
    %56 = vector.extract_strided_slice %41 {offsets = [3, 0], sizes = [17, 384], strides = [1, 1]} : vector<28x384xbf16> to vector<17x384xbf16>
    %c3 = arith.constant 3 : index
    %c0_40 = arith.constant 0 : index
    %c0_41 = arith.constant 0 : index
    %57 = vector.load %arg6[%c3, %c0_40, %c0_41] : memref<12x384x64xbf16, #tpu.memory_space<vmem>>, vector<1x384x64xbf16>
    %58 = vector.shape_cast %57 : vector<1x384x64xbf16> to vector<384x64xbf16>
    %cst_42 = arith.constant dense<0.000000e+00> : vector<17x64xf32>
    %59 = tpu.matmul %56, %58, %cst_42 {dimension_numbers = #tpu.dot_dimension_numbers<[1], [0], [0], [1], [0, 0, 1, 1], [], []>} : vector<17x384xbf16>, vector<384x64xbf16>, vector<17x64xf32> -> vector<17x64xf32>
    %60 = arith.addf %55, %59 : vector<17x64xf32>
    %61 = vector.extract_strided_slice %41 {offsets = [4, 0], sizes = [17, 384], strides = [1, 1]} : vector<28x384xbf16> to vector<17x384xbf16>
    %c4 = arith.constant 4 : index
    %c0_43 = arith.constant 0 : index
    %c0_44 = arith.constant 0 : index
    %62 = vector.load %arg6[%c4, %c0_43, %c0_44] : memref<12x384x64xbf16, #tpu.memory_space<vmem>>, vector<1x384x64xbf16>
    %63 = vector.shape_cast %62 : vector<1x384x64xbf16> to vector<384x64xbf16>
    %cst_45 = arith.constant dense<0.000000e+00> : vector<17x64xf32>
    %64 = tpu.matmul %61, %63, %cst_45 {dimension_numbers = #tpu.dot_dimension_numbers<[1], [0], [0], [1], [0, 0, 1, 1], [], []>} : vector<17x384xbf16>, vector<384x64xbf16>, vector<17x64xf32> -> vector<17x64xf32>
    %65 = arith.addf %60, %64 : vector<17x64xf32>
    %66 = vector.extract_strided_slice %41 {offsets = [5, 0], sizes = [17, 384], strides = [1, 1]} : vector<28x384xbf16> to vector<17x384xbf16>
    %c5 = arith.constant 5 : index
    %c0_46 = arith.constant 0 : index
    %c0_47 = arith.constant 0 : index
    %67 = vector.load %arg6[%c5, %c0_46, %c0_47] : memref<12x384x64xbf16, #tpu.memory_space<vmem>>, vector<1x384x64xbf16>
    %68 = vector.shape_cast %67 : vector<1x384x64xbf16> to vector<384x64xbf16>
    %cst_48 = arith.constant dense<0.000000e+00> : vector<17x64xf32>
    %69 = tpu.matmul %66, %68, %cst_48 {dimension_numbers = #tpu.dot_dimension_numbers<[1], [0], [0], [1], [0, 0, 1, 1], [], []>} : vector<17x384xbf16>, vector<384x64xbf16>, vector<17x64xf32> -> vector<17x64xf32>
    %70 = arith.addf %65, %69 : vector<17x64xf32>
    %71 = vector.extract_strided_slice %41 {offsets = [6, 0], sizes = [17, 384], strides = [1, 1]} : vector<28x384xbf16> to vector<17x384xbf16>
    %c6 = arith.constant 6 : index
    %c0_49 = arith.constant 0 : index
    %c0_50 = arith.constant 0 : index
    %72 = vector.load %arg6[%c6, %c0_49, %c0_50] : memref<12x384x64xbf16, #tpu.memory_space<vmem>>, vector<1x384x64xbf16>
    %73 = vector.shape_cast %72 : vector<1x384x64xbf16> to vector<384x64xbf16>
    %cst_51 = arith.constant dense<0.000000e+00> : vector<17x64xf32>
    %74 = tpu.matmul %71, %73, %cst_51 {dimension_numbers = #tpu.dot_dimension_numbers<[1], [0], [0], [1], [0, 0, 1, 1], [], []>} : vector<17x384xbf16>, vector<384x64xbf16>, vector<17x64xf32> -> vector<17x64xf32>
    %75 = arith.addf %70, %74 : vector<17x64xf32>
    %76 = vector.extract_strided_slice %41 {offsets = [7, 0], sizes = [17, 384], strides = [1, 1]} : vector<28x384xbf16> to vector<17x384xbf16>
    %c7 = arith.constant 7 : index
    %c0_52 = arith.constant 0 : index
    %c0_53 = arith.constant 0 : index
    %77 = vector.load %arg6[%c7, %c0_52, %c0_53] : memref<12x384x64xbf16, #tpu.memory_space<vmem>>, vector<1x384x64xbf16>
    %78 = vector.shape_cast %77 : vector<1x384x64xbf16> to vector<384x64xbf16>
    %cst_54 = arith.constant dense<0.000000e+00> : vector<17x64xf32>
    %79 = tpu.matmul %76, %78, %cst_54 {dimension_numbers = #tpu.dot_dimension_numbers<[1], [0], [0], [1], [0, 0, 1, 1], [], []>} : vector<17x384xbf16>, vector<384x64xbf16>, vector<17x64xf32> -> vector<17x64xf32>
    %80 = arith.addf %75, %79 : vector<17x64xf32>
    %81 = vector.extract_strided_slice %41 {offsets = [8, 0], sizes = [17, 384], strides = [1, 1]} : vector<28x384xbf16> to vector<17x384xbf16>
    %c8 = arith.constant 8 : index
    %c0_55 = arith.constant 0 : index
    %c0_56 = arith.constant 0 : index
    %82 = vector.load %arg6[%c8, %c0_55, %c0_56] : memref<12x384x64xbf16, #tpu.memory_space<vmem>>, vector<1x384x64xbf16>
    %83 = vector.shape_cast %82 : vector<1x384x64xbf16> to vector<384x64xbf16>
    %cst_57 = arith.constant dense<0.000000e+00> : vector<17x64xf32>
    %84 = tpu.matmul %81, %83, %cst_57 {dimension_numbers = #tpu.dot_dimension_numbers<[1], [0], [0], [1], [0, 0, 1, 1], [], []>} : vector<17x384xbf16>, vector<384x64xbf16>, vector<17x64xf32> -> vector<17x64xf32>
    %85 = arith.addf %80, %84 : vector<17x64xf32>
    %86 = vector.extract_strided_slice %41 {offsets = [9, 0], sizes = [17, 384], strides = [1, 1]} : vector<28x384xbf16> to vector<17x384xbf16>
    %c9 = arith.constant 9 : index
    %c0_58 = arith.constant 0 : index
    %c0_59 = arith.constant 0 : index
    %87 = vector.load %arg6[%c9, %c0_58, %c0_59] : memref<12x384x64xbf16, #tpu.memory_space<vmem>>, vector<1x384x64xbf16>
    %88 = vector.shape_cast %87 : vector<1x384x64xbf16> to vector<384x64xbf16>
    %cst_60 = arith.constant dense<0.000000e+00> : vector<17x64xf32>
    %89 = tpu.matmul %86, %88, %cst_60 {dimension_numbers = #tpu.dot_dimension_numbers<[1], [0], [0], [1], [0, 0, 1, 1], [], []>} : vector<17x384xbf16>, vector<384x64xbf16>, vector<17x64xf32> -> vector<17x64xf32>
    %90 = arith.addf %85, %89 : vector<17x64xf32>
    %91 = vector.extract_strided_slice %41 {offsets = [10, 0], sizes = [17, 384], strides = [1, 1]} : vector<28x384xbf16> to vector<17x384xbf16>
    %c10 = arith.constant 10 : index
    %c0_61 = arith.constant 0 : index
    %c0_62 = arith.constant 0 : index
    %92 = vector.load %arg6[%c10, %c0_61, %c0_62] : memref<12x384x64xbf16, #tpu.memory_space<vmem>>, vector<1x384x64xbf16>
    %93 = vector.shape_cast %92 : vector<1x384x64xbf16> to vector<384x64xbf16>
    %cst_63 = arith.constant dense<0.000000e+00> : vector<17x64xf32>
    %94 = tpu.matmul %91, %93, %cst_63 {dimension_numbers = #tpu.dot_dimension_numbers<[1], [0], [0], [1], [0, 0, 1, 1], [], []>} : vector<17x384xbf16>, vector<384x64xbf16>, vector<17x64xf32> -> vector<17x64xf32>
    %95 = arith.addf %90, %94 : vector<17x64xf32>
    %96 = vector.extract_strided_slice %41 {offsets = [11, 0], sizes = [17, 384], strides = [1, 1]} : vector<28x384xbf16> to vector<17x384xbf16>
    %c11 = arith.constant 11 : index
    %c0_64 = arith.constant 0 : index
    %c0_65 = arith.constant 0 : index
    %97 = vector.load %arg6[%c11, %c0_64, %c0_65] : memref<12x384x64xbf16, #tpu.memory_space<vmem>>, vector<1x384x64xbf16>
    %98 = vector.shape_cast %97 : vector<1x384x64xbf16> to vector<384x64xbf16>
    %cst_66 = arith.constant dense<0.000000e+00> : vector<17x64xf32>
    %99 = tpu.matmul %96, %98, %cst_66 {dimension_numbers = #tpu.dot_dimension_numbers<[1], [0], [0], [1], [0, 0, 1, 1], [], []>} : vector<17x384xbf16>, vector<384x64xbf16>, vector<17x64xf32> -> vector<17x64xf32>
    %100 = arith.addf %95, %99 : vector<17x64xf32>
    %101 = vector.extract_strided_slice %100 {offsets = [0, 0], sizes = [1, 64], strides = [1, 1]} : vector<17x64xf32> to vector<1x64xf32>
    %102 = vector.extract_strided_slice %100 {offsets = [16, 0], sizes = [1, 64], strides = [1, 1]} : vector<17x64xf32> to vector<1x64xf32>
    %103 = tpu.concatenate %101, %102 in 0 : vector<1x64xf32>, vector<1x64xf32> -> vector<2x64xf32>
    %c0_67 = arith.constant 0 : index
    %c0_68 = arith.constant 0 : index
    %104 = vector.load %arg7[%c0_67, %c0_68] : memref<1x64xf32, #tpu.memory_space<vmem>>, vector<1x64xf32>
    %105 = vector.broadcast %104 : vector<1x64xf32> to vector<2x64xf32>
    %106 = arith.addf %103, %105 : vector<2x64xf32>
    %cst_69 = arith.constant 0.000000e+00 : f32
    %107 = vector.broadcast %cst_69 : f32 to vector<2x64xf32>
    %108 = arith.maximumf %106, %107 : vector<2x64xf32>
    %109 = arith.truncf %108 : vector<2x64xf32> to vector<2x64xbf16>
    %c0_70 = arith.constant 0 : index
    %c0_71 = arith.constant 0 : index
    %110 = vector.load %arg8[%c0_70, %c0_71] : memref<64x128xbf16, #tpu.memory_space<vmem>>, vector<64x128xbf16>
    %cst_72 = arith.constant dense<0.000000e+00> : vector<2x128xf32>
    %111 = tpu.matmul %109, %110, %cst_72 {dimension_numbers = #tpu.dot_dimension_numbers<[1], [0], [0], [1], [0, 0, 1, 1], [], []>} : vector<2x64xbf16>, vector<64x128xbf16>, vector<2x128xf32> -> vector<2x128xf32>
    %c0_73 = arith.constant 0 : index
    %c0_74 = arith.constant 0 : index
    %112 = vector.load %arg9[%c0_73, %c0_74] : memref<1x128xf32, #tpu.memory_space<vmem>>, vector<1x128xf32>
    %113 = vector.broadcast %112 : vector<1x128xf32> to vector<2x128xf32>
    %114 = arith.addf %111, %113 : vector<2x128xf32>
    %c0_75 = arith.constant 0 : index
    %c0_76 = arith.constant 0 : index
    %115 = vector.load %arg10[%c0_75, %c0_76] : memref<2x128xf32, #tpu.memory_space<vmem>>, vector<2x128xf32>
    tpu.vector_store %arg10[%c0_75, %c0_76], %114 {strides = array<i32>} : memref<2x128xf32, #tpu.memory_space<vmem>>, vector<2x128xf32>,
    return
  }
  func.func @transform_0(%arg0: i32) -> (i32, i32) {
    %c0_i32 = arith.constant 0 : i32
    %c0_i32_0 = arith.constant 0 : i32
    return %arg0, %c0_i32 : i32, i32
  }
  func.func @transform_1(%arg0: i32) -> (i32, i32, i32) {
    %c0_i32 = arith.constant 0 : i32
    %c0_i32_0 = arith.constant 0 : i32
    %c0_i32_1 = arith.constant 0 : i32
    %c0_i32_2 = arith.constant 0 : i32
    return %c0_i32, %c0_i32_0, %c0_i32_1 : i32, i32, i32
  }
  func.func @transform_2(%arg0: i32) -> (i32, i32) {
    %c0_i32 = arith.constant 0 : i32
    %c0_i32_0 = arith.constant 0 : i32
    %c0_i32_1 = arith.constant 0 : i32
    return %c0_i32, %c0_i32_0 : i32, i32
  }
  func.func @transform_3(%arg0: i32) -> (i32, i32, i32) {
    %c0_i32 = arith.constant 0 : i32
    %c0_i32_0 = arith.constant 0 : i32
    %c0_i32_1 = arith.constant 0 : i32
    %c0_i32_2 = arith.constant 0 : i32
    return %c0_i32, %c0_i32_0, %c0_i32_1 : i32, i32, i32
  }
  func.func @transform_4(%arg0: i32) -> (i32, i32) {
    %c0_i32 = arith.constant 0 : i32
    %c0_i32_0 = arith.constant 0 : i32
    %c0_i32_1 = arith.constant 0 : i32
    return %c0_i32, %c0_i32_0 : i32, i32
  }
  func.func @transform_5(%arg0: i32) -> (i32, i32, i32) {
    %c0_i32 = arith.constant 0 : i32
    %c0_i32_0 = arith.constant 0 : i32
    %c0_i32_1 = arith.constant 0 : i32
    %c0_i32_2 = arith.constant 0 : i32
    return %c0_i32, %c0_i32_0, %c0_i32_1 : i32, i32, i32
  }
  func.func @transform_6(%arg0: i32) -> (i32, i32) {
    %c0_i32 = arith.constant 0 : i32
    %c0_i32_0 = arith.constant 0 : i32
    %c0_i32_1 = arith.constant 0 : i32
    return %c0_i32, %c0_i32_0 : i32, i32
  }
  func.func @transform_7(%arg0: i32) -> (i32, i32) {
    %c0_i32 = arith.constant 0 : i32
    %c0_i32_0 = arith.constant 0 : i32
    %c0_i32_1 = arith.constant 0 : i32
    return %c0_i32, %c0_i32_0 : i32, i32
  }
  func.func @transform_8(%arg0: i32) -> (i32, i32) {
    %c0_i32 = arith.constant 0 : i32
    %c0_i32_0 = arith.constant 0 : i32
    %c0_i32_1 = arith.constant 0 : i32
    return %c0_i32, %c0_i32_0 : i32, i32
  }
  func.func @transform_9(%arg0: i32) -> (i32, i32) {
    %c0_i32 = arith.constant 0 : i32
    %c0_i32_0 = arith.constant 0 : i32
    return %arg0, %c0_i32 : i32, i32
  }
}

</mosaic_0001>

<bundles_post_ra>
// kernel: dqn_forward.1
= control target key start
LH: loop header
LB: loop body
LE: loop exit
PB: predicated region body
PF: predicated region fallthrough
CT: control target
= control target key end

     0   :  { %v7996_v2 = vmov 0   ;;  %vm57_vm0 = vsmask.f32 7424  ;;  %vm113_vm1 = vcmask 523264   ;;  %vm281_vm2 = vcmask 1046528   ;;  %s9956_s0 = inlined_call_operand.vmem [shape: f32[32,64], index: 0, kind: input, shape index: {}]   ;;  %s9957_s1 = inlined_call_operand.vmem [shape: bf16[3,64,224], index: 1, kind: input, shape index: {}]   ;;  %s9958_s2 = inlined_call_operand.vmem [shape: f32[1,224], index: 2, kind: input, shape index: {}]   ;;  %s9959_s3 = inlined_call_operand.vmem [shape: bf16[3,224,384], index: 3, kind: input, shape index: {}]   ;;  %s9960_s4 = inlined_call_operand.vmem [shape: f32[1,384], index: 4, kind: input, shape index: {}]   ;;  %s9961_s5 = inlined_call_operand.vmem [shape: bf16[12,384,64], index: 5, kind: input, shape index: {}]   ;;  %s9962_s6 = inlined_call_operand.vmem [shape: f32[1,64], index: 6, kind: input, shape index: {}]   ;;  %s9963_s7 = inlined_call_operand.vmem [shape: bf16[64,128], index: 7, kind: input, shape index: {}]   ;;  %s9964_s8 = inlined_call_operand.vmem [shape: f32[1,128], index: 8, kind: input, shape index: {}]   ;;  %s9965_s9 = inlined_call_operand.hbm [shape: f32[2,128], index: 9, kind: output, shape index: {}]  }
   0x1   :  { %v7476_v0 = vld [vmem:[%s9957_s1 + $0x44] ss:$8 sps:$4 sm:$0xff]   ;;  %v7478_v1 = vld [vmem:[%s9957_s1 + $0x40] ss:$8 sps:$4 sm:$0xff]   ;;  %152 = vmatprep.mubr.bf16.mxu0 %v7996_v2  ;;  %v7479_v3 = vld [vmem:[%s9957_s1 + $0x54] ss:$8 sps:$4 sm:$0xff]  }
   0x2   :  { %120 = vmatprep.subr.bf16.mxu0 %v7476_v0  ;;  %v7481_v4 = vld [vmem:[%s9957_s1 + $0x50] ss:$8 sps:$4 sm:$0xff]   ;;  %v7482_v5 = vld [vmem:[%s9957_s1 + $0x64] ss:$8 sps:$4 sm:$0xff]   ;;  %v7484_v11 = vld [vmem:[%s9957_s1 + $0x60] ss:$8 sps:$4 sm:$0xff]  }
   0x3   :  { %121 = vmatpush1.bf16.msra.mxu0 %v7478_v1  ;;  %v34_v6 = vld [vmem:[%s9956_s0] sm:$0xff]  ;;  %v35_v7 = vld [vmem:[%s9956_s0 + $0x8] sm:$0xff]  ;;  %v36_v8 = vld [vmem:[%s9956_s0 + $0x10] sm:$0xff]  ;;  %vm793_vm3 = vcmask 785408  }
   0x4   :  { %122 = vmatprep.subr.bf16.mxu0 %v7479_v3  ;;  %v37_v9 = vld [vmem:[%s9956_s0 + $0x18] sm:$0xff]  ;;  %v8078_v10 = vpack.c.bf16 %v35_v7, %v34_v6  ;;  %v7490_v21 = vld [vmem:[%s9957_s1 + $0x4] ss:$8 sps:$4 sm:$0xff]   ;;  %v7488_v23 = vld [vmem:[%s9957_s1] ss:$8 sps:$4 sm:$0xff]  }
   0x5   :  { %v8083_v12 = vpack.c.bf16 %v37_v9, %v36_v8  ;;  %v7485_v13 = vld [vmem:[%s9957_s1 + $0x74] ss:$8 sps:$4 sm:$0xff]   ;;  %v7487_v18 = vld [vmem:[%s9957_s1 + $0x70] ss:$8 sps:$4 sm:$0xff]   ;;  %v7496_v29 = vld [vmem:[%s9957_s1 + $0x24] ss:$8 sps:$4 sm:$0xff]  }
   0x6   :  { %v59_v14 = vshrl.u32 %v8078_v10, 16  ;;  %v61_v15 = vshll.u32 %v8078_v10, 16  ;;  %v7493_v24 = vld [vmem:[%s9957_s1 + $0x14] ss:$8 sps:$4 sm:$0xff]   ;;  %v7491_v28 = vld [vmem:[%s9957_s1 + $0x10] ss:$8 sps:$4 sm:$0xff]  }
   0x7   :  { %123 = vmatpush1.bf16.msra.mxu0 %v7481_v4  ;;  %v66_v16 = vshll.u32 %v8083_v12, 16  ;;  %v70_v25 = vshrl.u32 %v8083_v12, 16  ;;  %v7512_v26 = vld [vmem:[%s9959_s3 + $0x154] ss:$12 sps:$4 sm:$0xff]   ;;  %v7514_v27 = vld [vmem:[%s9959_s3 + $0x150] ss:$12 sps:$4 sm:$0xff]  }
   0x8   :  { %124 = vmatprep.subr.bf16.mxu0 %v7482_v5  ;;  %v63_v17 = vrot.slane %v61_v15, 1  ;;  %800 = vmatprep.subr.bf16.mxu1 %v7512_v26  ;;  %v7516_v30 = vld [vmem:[%s9959_s3 + $0x16c] ss:$12 sps:$4 sm:$0xff]   ;;  %v7518_v31 = vld [vmem:[%s9959_s3 + $0x168] ss:$12 sps:$4 sm:$0xff]   ;;  %v282_v55 = vrot.slane %v8078_v10, 1 }
   0x9   :  { %v68_v19 = vrot.slane %v66_v16, 1  ;;  %801 = vmatpush1.bf16.msra.mxu1 %v7514_v27  ;;  %v7520_v33 = vld [vmem:[%s9959_s3 + $0x184] ss:$12 sps:$4 sm:$0xff]   ;;  %v7494_v34 = vld [vmem:[%s9957_s1 + $0x20] ss:$8 sps:$4 sm:$0xff]   ;;  %v283_v56 = vrot.slane %v8083_v12, 1 }
   0xa   :  { %v64_v20 = vor.u32 %v63_v17, %v59_v14  ;;  %802 = vmatprep.subr.bf16.mxu1 %v7516_v30  ;;  %v7499_v35 = vld [vmem:[%s9957_s1 + $0x34] ss:$8 sps:$4 sm:$0xff]   ;;  %v7522_v36 = vld [vmem:[%s9959_s3 + $0x180] ss:$12 sps:$4 sm:$0xff]   ;;  %v7497_v38 = vld [vmem:[%s9957_s1 + $0x30] ss:$8 sps:$4 sm:$0xff]  }
   0xb   :  { %125 = vmatpush1.bf16.msra.mxu0 %v7484_v11  ;;  %v72_v32 = vor.u32 %v70_v25, %v68_v19  ;;  %v7524_v37 = vld [vmem:[%s9959_s3 + $0x19c] ss:$12 sps:$4 sm:$0xff]   ;;  %v7502_v39 = vld [vmem:[%s9957_s1 + $0x84] ss:$8 sps:$4 sm:$0xff]   ;;  %v7528_v41 = vld [vmem:[%s9959_s3 + $0x1b4] ss:$12 sps:$4 sm:$0xff]   ;;  %v284_v60 = vsel %vm281_vm2, %v282_v55, %v283_v56 }
   0xc   :  { %126 = vmatprep.subr.bf16.mxu0 %v7485_v13  ;;  %v69_v22 = vsel %vm57_vm0, %v64_v20, %v68_v19  ;;  %v7526_v40 = vld [vmem:[%s9959_s3 + $0x198] ss:$12 sps:$4 sm:$0xff]   ;;  %v7500_v42 = vld [vmem:[%s9957_s1 + $0x80] ss:$8 sps:$4 sm:$0xff]   ;;  %v7505_v43 = vld [vmem:[%s9957_s1 + $0x94] ss:$8 sps:$4 sm:$0xff]  }
   0xd   :  { %803 = vmatpush1.bf16.msra.mxu1 %v7518_v31  ;;  %v7503_v44 = vld [vmem:[%s9957_s1 + $0x90] ss:$8 sps:$4 sm:$0xff]   ;;  %v7508_v46 = vld [vmem:[%s9957_s1 + $0xa4] ss:$8 sps:$4 sm:$0xff]   ;;  %v7534_v48 = vld [vmem:[%s9959_s3 + $0x1c8] ss:$12 sps:$4 sm:$0xff]  }
   0xe   :  { %804 = vmatprep.subr.bf16.mxu1 %v7520_v33  ;;  %v7530_v45 = vld [vmem:[%s9959_s3 + $0x1b0] ss:$12 sps:$4 sm:$0xff]   ;;  %v7532_v47 = vld [vmem:[%s9959_s3 + $0x1cc] ss:$12 sps:$4 sm:$0xff]   ;;  %v7506_v50 = vld [vmem:[%s9957_s1 + $0xa0] ss:$8 sps:$4 sm:$0xff]  }
   0xf   :  { %127 = vmatpush1.bf16.msra.mxu0 %v7487_v18  ;;  %v7536_v49 = vld [vmem:[%s9959_s3 + $0x1e4] ss:$12 sps:$4 sm:$0xff]   ;;  %v7511_v51 = vld [vmem:[%s9957_s1 + $0xb4] ss:$8 sps:$4 sm:$0xff]   ;;  %v7538_v52 = vld [vmem:[%s9959_s3 + $0x1e0] ss:$12 sps:$4 sm:$0xff]  }
  0x10   :  { %217 = vmatprep.subr.bf16.mxu0 %v7490_v21  ;;  %v7540_v53 = vld [vmem:[%s9959_s3 + $0x1fc] ss:$12 sps:$4 sm:$0xff]   ;;  %v7509_v54 = vld [vmem:[%s9957_s1 + $0xb0] ss:$8 sps:$4 sm:$0xff]   ;;  %v7544_v58 = vld [vmem:[%s9959_s3 + $0x214] ss:$12 sps:$4 sm:$0xff]  }
  0x11   :  { %805 = vmatpush1.bf16.msra.mxu1 %v7522_v36  ;;  %v7542_v57 = vld [vmem:[%s9959_s3 + $0x1f8] ss:$12 sps:$4 sm:$0xff]   ;;  %v7519_v61 = vld [vmem:[%s9959_s3 + $0x170] ss:$12 sps:$4 sm:$0xff]   ;;  %v7523_v62 = vld [vmem:[%s9959_s3 + $0x188] ss:$12 sps:$4 sm:$0xff]  }
  0x12   :  { %5556 = vmatmul.mubr.msk.bf16.vlgmr.msra.gmra.mrb[0].mxu0 %vm113_vm1, %v69_v22  ;;  %806 = vmatprep.subr.bf16.mxu1 %v7524_v37  ;;  %v7515_v59 = vld [vmem:[%s9959_s3 + $0x158] ss:$12 sps:$4 sm:$0xff]   ;;  %v7527_v63 = vld [vmem:[%s9959_s3 + $0x1a0] ss:$12 sps:$4 sm:$0xff]   ;;  %v7535_v1 = vld [vmem:[%s9959_s3 + $0x1d0] ss:$12 sps:$4 sm:$0xff]  }
  0x13   :  { %218 = vmatpush1.bf16.msra.mxu0 %v7488_v23  ;;  %162 = vmatprep.mubr.bf16.mxu0 %v7996_v2  ;;  %v7531_v0 = vld [vmem:[%s9959_s3 + $0x1b8] ss:$12 sps:$4 sm:$0xff]   ;;  %v7539_v3 = vld [vmem:[%s9959_s3 + $0x1e8] ss:$12 sps:$4 sm:$0xff]   ;;  %v7543_v4 = vld [vmem:[%s9959_s3 + $0x200] ss:$12 sps:$4 sm:$0xff]   ;;  %v394_v23 = vlaneseq }
  0x14   :  { %219 = vmatprep.subr.bf16.mxu0 %v7493_v24  ;;  %v7546_v5 = vld [vmem:[%s9959_s3 + $0x210] ss:$12 sps:$4 sm:$0xff]   ;;  %v7547_v6 = vld [vmem:[%s9959_s3 + $0x218] ss:$12 sps:$4 sm:$0xff]   ;;  %v7550_v8 = vld [vmem:[%s9959_s3 + $0x228] ss:$12 sps:$4 sm:$0xff]  }
  0x15   :  { %807 = vmatpush1.bf16.msra.mxu1 %v7526_v40  ;;  %v7548_v7 = vld [vmem:[%s9959_s3 + $0x22c] ss:$12 sps:$4 sm:$0xff]   ;;  %v7551_v9 = vld [vmem:[%s9959_s3 + $0x230] ss:$12 sps:$4 sm:$0xff]   ;;  %v7560_v16 = vld [vmem:[%s9959_s3 + $0x274] ss:$12 sps:$4 sm:$0xff]  }
  0x16   :  { %808 = vmatprep.subr.bf16.mxu1 %v7528_v41  ;;  %v7554_v11 = vld [vmem:[%s9959_s3 + $0x240] ss:$12 sps:$4 sm:$0xff]   ;;  %v7556_v13 = vld [vmem:[%s9959_s3 + $0x25c] ss:$12 sps:$4 sm:$0xff]   ;;  %v7558_v14 = vld [vmem:[%s9959_s3 + $0x258] ss:$12 sps:$4 sm:$0xff]  }
  0x17   :  { %220 = vmatpush1.bf16.msra.mxu0 %v7491_v28  ;;  %v7559_v15 = vld [vmem:[%s9959_s3 + $0x260] ss:$12 sps:$4 sm:$0xff]   ;;  %v7562_v17 = vld [vmem:[%s9959_s3 + $0x270] ss:$12 sps:$4 sm:$0xff]   ;;  %v7563_v18 = vld [vmem:[%s9959_s3 + $0x278] ss:$12 sps:$4 sm:$0xff]  }
  0x18   :  { %221 = vmatprep.subr.bf16.mxu0 %v7496_v29  ;;  %v7564_v19 = vld [vmem:[%s9959_s3 + $0x28c] ss:$12 sps:$4 sm:$0xff]   ;;  %v7566_v20 = vld [vmem:[%s9959_s3 + $0x288] ss:$12 sps:$4 sm:$0xff]   ;;  %v7567_v21 = vld [vmem:[%s9959_s3 + $0x290] ss:$12 sps:$4 sm:$0xff]  }
  0x19   :  { %809 = vmatpush1.bf16.msra.mxu1 %v7530_v45  ;;  %v7570_v22 = vld [vmem:[%s9959_s3 + $0x4] ss:$12 sps:$4 sm:$0xff]   ;;  %v8304_v24 = vshrl.u32 %v394_v23, 7  ;;  %v392_v26 = vld [vmem:[%s9958_s2] sm:$0x3] }
  0x1a   :  { %5557 = vmatmul.mubr.msk.bf16.gmra.mrb[4].mxu0 %vm113_vm1, %v72_v32  ;;  %810 = vmatprep.subr.bf16.mxu1 %v7532_v47  ;;  %v7582_v23 = vld [vmem:[%s9959_s3 + $0x4c] ss:$12 sps:$4 sm:$0xff]  }
  0x1b   :  { %222 = vmatpush1.bf16.msra.mxu0 %v7494_v34  ;;  %249 = vmatprep.mubr.bf16.mxu0 %v7996_v2  ;;  %v396_v25 = vsub.s32 0, %v8304_v24  ;;  %v400_v27 = vsub.s32 1, %v8304_v24 }
  0x1c   :  { %223 = vmatprep.subr.bf16.mxu0 %v7499_v35 }
  0x1d   :  { %811 = vmatpush1.bf16.msra.mxu1 %v7534_v48  ;;  %v397_v28 = vrot.slane %v392_v26, %v396_v25  ;;  %v401_v29 = vrot.slane %v392_v26, %v400_v27 }
  0x1e   :  { %812 = vmatprep.subr.bf16.mxu1 %v7536_v49 }
  0x1f   :  { %224 = vmatpush1.bf16.msra.mxu0 %v7497_v38 }
  0x20   :  { %331 = vmatprep.subr.bf16.mxu0 %v7502_v39 }
  0x21   :  { %813 = vmatpush1.bf16.msra.mxu1 %v7538_v52 }
  0x22   :  { %5566 = vmatmul.mubr.msk.bf16.vlgmr.msra.gmra.mrb[0].mxu0 %vm113_vm1, %v8078_v10  ;;  %814 = vmatprep.subr.bf16.mxu1 %v7540_v53  ;;  %v7552_v10 = vld [vmem:[%s9959_s3 + $0x244] ss:$12 sps:$4 sm:$0xff]  }
  0x23   :  { %332 = vmatpush1.bf16.msra.mxu0 %v7500_v42  ;;  %259 = vmatprep.mubr.bf16.mxu0 %v7996_v2 }
  0x24   :  { %333 = vmatprep.subr.bf16.mxu0 %v7505_v43 }
  0x25   :  { %815 = vmatpush1.bf16.msra.mxu1 %v7542_v57 }
  0x26   :  { %816 = vmatprep.subr.bf16.mxu1 %v7544_v58 }
  0x27   :  { %334 = vmatpush1.bf16.msra.mxu0 %v7503_v44 }
  0x28   :  { %335 = vmatprep.subr.bf16.mxu0 %v7508_v46 }
  0x29   :  { %817 = vmatpush1.bf16.msra.mxu1 %v7546_v5  ;;  %v7568_v5 = vld [vmem:[%s9959_s3] ss:$12 sps:$4 sm:$0xff]  }
  0x2a   :  { %5567 = vmatmul.mubr.msk.bf16.gmra.mrb[4].mxu0 %vm113_vm1, %v8083_v12  ;;  %818 = vmatprep.subr.bf16.mxu1 %v7548_v7  ;;  %v7555_v12 = vld [vmem:[%s9959_s3 + $0x248] ss:$12 sps:$4 sm:$0xff]  }
  0x2b   :  { %336 = vmatpush1.bf16.msra.mxu0 %v7506_v50  ;;  %363 = vmatprep.mubr.bf16.mxu0 %v7996_v2  ;;  %v7571_v7 = vld [vmem:[%s9959_s3 + $0x8] ss:$12 sps:$4 sm:$0xff]  }
  0x2c   :  { %337 = vmatprep.subr.bf16.mxu0 %v7511_v51 }
  0x2d   :  { %819 = vmatpush1.bf16.msra.mxu1 %v7550_v8 }
  0x2e   :  { %820 = vmatprep.subr.bf16.mxu1 %v7552_v10 }
  0x2f   :  { %338 = vmatpush1.bf16.msra.mxu0 %v7509_v54 }
  0x30   :  { %853 = vmatprep.subr.bf16.mxu0 %v7996_v2 }
  0x31   :  { %821 = vmatpush1.bf16.msra.mxu1 %v7554_v11 }
  0x32   :  { %5584 = vmatmul.mubr.msk.bf16.vlgmr.msra.gmra.mrb[0].mxu0 %vm113_vm1, %v284_v60  ;;  %822 = vmatprep.subr.bf16.mxu1 %v7556_v13 }
  0x33   :  { %373 = vmatprep.mubr.bf16.mxu0 %v7996_v2  ;;  %854 = vmatpush1.bf16.msra.mxu0 %v7515_v59 }
  0x34   :  { %855 = vmatprep.subr.bf16.mxu0 %v7996_v2 }
  0x35   :  { %823 = vmatpush1.bf16.msra.mxu1 %v7558_v14  ;;  %v7574_v14 = vld [vmem:[%s9959_s3 + $0x1c] ss:$12 sps:$4 sm:$0xff]  }
  0x36   :  { %824 = vmatprep.subr.bf16.mxu1 %v7560_v16 }
  0x37   :  { %856 = vmatpush1.bf16.msra.mxu0 %v7519_v61 }
  0x38   :  { %857 = vmatprep.subr.bf16.mxu0 %v7996_v2 }
  0x39   :  { %825 = vmatpush1.bf16.msra.mxu1 %v7562_v17 }
  0x3a   :  { %5585 = vmatmul.mubr.msk.bf16.gmra.mrb[4].mxu0 %vm113_vm1, %v283_v56  ;;  %826 = vmatprep.subr.bf16.mxu1 %v7564_v19  ;;  %v7575_v19 = vld [vmem:[%s9959_s3 + $0x20] ss:$12 sps:$4 sm:$0xff]  }
  0x3b   :  { %858 = vmatpush1.bf16.msra.mxu0 %v7523_v62 }
  0x3c   :  { %859 = vmatprep.subr.bf16.mxu0 %v7996_v2 }
  0x3d   :  { %827 = vmatpush1.bf16.msra.mxu1 %v7566_v20  ;;  %v7578_v20 = vld [vmem:[%s9959_s3 + $0x34] ss:$12 sps:$4 sm:$0xff]  }
  0x3e   :  { %1130 = vmatprep.subr.bf16.mxu1 %v7570_v22  ;;  %v7579_v22 = vld [vmem:[%s9959_s3 + $0x38] ss:$12 sps:$4 sm:$0xff]  }
  0x3f   :  { %860 = vmatpush1.bf16.msra.mxu0 %v7527_v63 }
  0x40   :  { %861 = vmatprep.subr.bf16.mxu0 %v7996_v2 }
  0x43   :  { %862 = vmatpush1.bf16.msra.mxu0 %v7531_v0 }
  0x44   :  { %863 = vmatprep.subr.bf16.mxu0 %v7996_v2 }
  0x47   :  { %864 = vmatpush1.bf16.msra.mxu0 %v7535_v1 }
  0x48   :  { %865 = vmatprep.subr.bf16.mxu0 %v7996_v2 }
  0x4b   :  { %866 = vmatpush1.bf16.msra.mxu0 %v7539_v3 }
  0x4c   :  { %867 = vmatprep.subr.bf16.mxu0 %v7996_v2 }
  0x4f   :  { %868 = vmatpush1.bf16.msra.mxu0 %v7543_v4 }
  0x50   :  { %869 = vmatprep.subr.bf16.mxu0 %v7996_v2 }
  0x53   :  { %870 = vmatpush1.bf16.msra.mxu0 %v7547_v6 }
  0x54   :  { %871 = vmatprep.subr.bf16.mxu0 %v7996_v2 }
  0x57   :  { %872 = vmatpush1.bf16.msra.mxu0 %v7551_v9 }
  0x58   :  { %873 = vmatprep.subr.bf16.mxu0 %v7996_v2 }
  0x5b   :  { %874 = vmatpush1.bf16.msra.mxu0 %v7555_v12 }
  0x5c   :  { %875 = vmatprep.subr.bf16.mxu0 %v7996_v2 }
  0x5f   :  { %876 = vmatpush1.bf16.msra.mxu0 %v7559_v15 }
  0x60   :  { %877 = vmatprep.subr.bf16.mxu0 %v7996_v2 }
  0x63   :  { %878 = vmatpush1.bf16.msra.mxu0 %v7563_v18  ;;  %v7572_v18 = vld [vmem:[%s9959_s3 + $0x18] ss:$12 sps:$4 sm:$0xff]  }
  0x64   :  { %879 = vmatprep.subr.bf16.mxu0 %v7996_v2 }
  0x67   :  { %880 = vmatpush1.bf16.msra.mxu0 %v7567_v21  ;;  %v7576_v21 = vld [vmem:[%s9959_s3 + $0x30] ss:$12 sps:$4 sm:$0xff]  }
  0x68   :  { %1183 = vmatprep.subr.bf16.mxu0 %v7996_v2 }
 0x105   :  { %v365_v30 = vpop.f32.mrb[0].mxu0 }
 0x106   :  { %v404_v31 = vadd.f32 %v397_v28, %v365_v30  ;;  %v367_v32 = vpop.f32.mrb[1].mxu0  ;;  %v7586_v30 = vld [vmem:[%s9959_s3 + $0x64] ss:$12 sps:$4 sm:$0xff]  }
 0x107   :  { %v405_v33 = vadd.f32 %v401_v29, %v367_v32  ;;  %v369_v34 = vpop.f32.mrb[2].mxu0  ;;  %v7587_v32 = vld [vmem:[%s9959_s3 + $0x68] ss:$12 sps:$4 sm:$0xff]  }
 0x108   :  { %v406_v35 = vadd.f32 %v397_v28, %v369_v34  ;;  %v371_v36 = vpop.f32.mrb[3].mxu0  ;;  %v412_v38 = vmax.f32 %v404_v31, 0.0  ;;  %v7584_v31 = vld [vmem:[%s9959_s3 + $0x60] ss:$12 sps:$4 sm:$0xff]   ;;  %v7588_v34 = vld [vmem:[%s9959_s3 + $0x78] ss:$12 sps:$4 sm:$0xff]  }
 0x109   :  { %v407_v37 = vadd.f32 %v401_v29, %v371_v36  ;;  %v413_v40 = vmax.f32 %v405_v33, 0.0  ;;  %v7590_v33 = vld [vmem:[%s9959_s3 + $0x7c] ss:$12 sps:$4 sm:$0xff]   ;;  %v7594_v36 = vld [vmem:[%s9959_s3 + $0x94] ss:$12 sps:$4 sm:$0xff]  }
 0x10a   :  { %v414_v39 = vmax.f32 %v406_v35, 0.0  ;;  %v7591_v35 = vld [vmem:[%s9959_s3 + $0x80] ss:$12 sps:$4 sm:$0xff]  }
 0x10b   :  { %v415_v41 = vmax.f32 %v407_v37, 0.0  ;;  %v7592_v37 = vld [vmem:[%s9959_s3 + $0x90] ss:$12 sps:$4 sm:$0xff]  }
 0x10c   :  { %v8315_v42 = vpack.c.bf16 %v414_v39, %v412_v38  ;;  %v7595_v38 = vld [vmem:[%s9959_s3 + $0x98] ss:$12 sps:$4 sm:$0xff]  }
 0x10d   :  { %v8317_v43 = vpack.c.bf16 %v415_v41, %v413_v40  ;;  %v375_v44 = vpop.f32.mrb[4].mxu0  ;;  %v7598_v39 = vld [vmem:[%s9959_s3 + $0xac] ss:$12 sps:$4 sm:$0xff]   ;;  %v7596_v40 = vld [vmem:[%s9959_s3 + $0xa8] ss:$12 sps:$4 sm:$0xff]  }
 0x10e   :  { %v408_v45 = vadd.f32 %v397_v28, %v375_v44  ;;  %v377_v46 = vpop.f32.mrb[5].mxu0  ;;  %v540_v54 = vshll.u32 %v8315_v42, 16  ;;  %v538_v61 = vshrl.u32 %v8315_v42, 16  ;;  %v7599_v41 = vld [vmem:[%s9959_s3 + $0xb0] ss:$12 sps:$4 sm:$0xff]  }
 0x10f   :  { %v409_v47 = vadd.f32 %v401_v29, %v377_v46  ;;  %v379_v48 = vpop.f32.mrb[6].mxu0  ;;  %v552_v49 = vshll.u32 %v8317_v43, 16  ;;  %v550_v0 = vshrl.u32 %v8317_v43, 16  ;;  %v1296_v3 = vrot.slane %v8317_v43, 1  ;;  %v7600_v44 = vld [vmem:[%s9959_s3 + $0xc0] ss:$12 sps:$4 sm:$0xff]  }
 0x110   :  { %v410_v50 = vadd.f32 %v397_v28, %v379_v48  ;;  %v381_v51 = vpop.f32.mrb[7].mxu0  ;;  %v416_v52 = vmax.f32 %v408_v45, 0.0  ;;  %v542_v62 = vrot.slane %v540_v54, 1  ;;  %v7580_v28 = vld [vmem:[%s9959_s3 + $0x48] ss:$12 sps:$4 sm:$0xff]  }
 0x111   :  { %v411_v53 = vadd.f32 %v401_v29, %v381_v51  ;;  %v417_v55 = vmax.f32 %v409_v47, 0.0  ;;  %v554_v58 = vrot.slane %v552_v49, 1  ;;  %v7583_v29 = vld [vmem:[%s9959_s3 + $0x50] ss:$12 sps:$4 sm:$0xff]   ;;  %v7603_v45 = vld [vmem:[%s9959_s3 + $0xc8] ss:$12 sps:$4 sm:$0xff]  }
 0x112   :  { %v418_v56 = vmax.f32 %v410_v50, 0.0  ;;  %v543_v13 = vor.u32 %v542_v62, %v538_v61  ;;  %v7606_v46 = vld [vmem:[%s9959_s3 + $0xdc] ss:$12 sps:$4 sm:$0xff]   ;;  %v7604_v47 = vld [vmem:[%s9959_s3 + $0xd8] ss:$12 sps:$4 sm:$0xff]  }
 0x113   :  { %v419_v57 = vmax.f32 %v411_v53, 0.0  ;;  %v555_v9 = vor.u32 %v554_v58, %v550_v0  ;;  %v7607_v48 = vld [vmem:[%s9959_s3 + $0xe0] ss:$12 sps:$4 sm:$0xff]  }
 0x114   :  { %v8321_v59 = vpack.c.bf16 %v418_v56, %v416_v52  ;;  %v7610_v49 = vld [vmem:[%s9959_s3 + $0xf4] ss:$12 sps:$4 sm:$0xff]  }
 0x115   :  { %v8323_v60 = vpack.c.bf16 %v419_v57, %v417_v55 }
 0x116   :  { %v545_v63 = vshll.u32 %v8321_v59, 16  ;;  %v561_v8 = vshrl.u32 %v8321_v59, 16 }
 0x117   :  { %v557_v1 = vshll.u32 %v8323_v60, 16  ;;  %v8331_v4 = vrot.slane %v8323_v60, 1  ;;  %v564_v11 = vshrl.u32 %v8323_v60, 16 }
 0x118   :  { %v547_v6 = vrot.slane %v545_v63, 1 }
 0x119   :  { %v559_v10 = vrot.slane %v557_v1, 1  ;;  %v8343_v12 = vsel %vm281_vm2, %v1296_v3, %v8331_v4 }
 0x11a   :  { %v548_v17 = vsel %vm57_vm0, %v543_v13, %v547_v6  ;;  %v563_v26 = vor.u32 %v561_v8, %v547_v6 }
 0x11b   :  { %v560_v15 = vsel %vm57_vm0, %v555_v9, %v559_v10  ;;  %v566_v16 = vor.u32 %v564_v11, %v559_v10 }
 0x11c   :  { %5684 = vmatprep.mubr.msk.bf16.mxu1 %vm793_vm3, %v560_v15  ;;  %5686 = vmatprep.mubr.msk.bf16.mxu0 %vm793_vm3, %v560_v15 }
 0x11d   :  { %833 = vmatmul.mubr.bf16.vlgmr.msra.gmra.mrb[0].mxu1 %v548_v17  ;;  %886 = vmatmul.mubr.bf16.vlgmr.msra.gmra.mrb[8].mxu0 %v548_v17 }
 0x11e   :  { %1131 = vmatpush1.bf16.msra.mxu1 %v7568_v5  ;;  %1184 = vmatpush1.bf16.msra.mxu0 %v7571_v7 }
 0x11f   :  { %5685 = vmatprep.mubr.msk.bf16.mxu1 %vm793_vm3, %v566_v16  ;;  %5687 = vmatprep.mubr.msk.bf16.mxu0 %vm793_vm3, %v566_v16 }
 0x120   :  { %1132 = vmatprep.subr.bf16.mxu1 %v7574_v14  ;;  %1185 = vmatprep.subr.bf16.mxu0 %v7996_v2 }
 0x122   :  { %1133 = vmatpush1.bf16.msra.mxu1 %v7572_v18  ;;  %1186 = vmatpush1.bf16.msra.mxu0 %v7575_v19 }
 0x123   :  { %1134 = vmatprep.subr.bf16.mxu1 %v7578_v20  ;;  %1187 = vmatprep.subr.bf16.mxu0 %v7996_v2 }
 0x125   :  { %843 = vmatmul.mubr.bf16.gmra.mrb[4].mxu1 %v563_v26  ;;  %894 = vmatmul.mubr.bf16.gmra.mrb[12].mxu0 %v563_v26 }
 0x126   :  { %1135 = vmatpush1.bf16.msra.mxu1 %v7576_v21  ;;  %1188 = vmatpush1.bf16.msra.mxu0 %v7579_v22 }
 0x127   :  { %5730 = vmatprep.mubr.msk.bf16.mxu1 %vm793_vm3, %v8317_v43  ;;  %5732 = vmatprep.mubr.msk.bf16.mxu0 %vm793_vm3, %v8317_v43  ;;  %v7602_v43 = vld [vmem:[%s9959_s3 + $0xc4] ss:$12 sps:$4 sm:$0xff]  }
 0x128   :  { %1136 = vmatprep.subr.bf16.mxu1 %v7582_v23  ;;  %1189 = vmatprep.subr.bf16.mxu0 %v7996_v2 }
 0x12a   :  { %1137 = vmatpush1.bf16.msra.mxu1 %v7580_v28  ;;  %1190 = vmatpush1.bf16.msra.mxu0 %v7583_v29 }
 0x12b   :  { %1138 = vmatprep.subr.bf16.mxu1 %v7586_v30  ;;  %1191 = vmatprep.subr.bf16.mxu0 %v7996_v2 }
 0x12e   :  { %1139 = vmatpush1.bf16.msra.mxu1 %v7584_v31  ;;  %1192 = vmatpush1.bf16.msra.mxu0 %v7587_v32 }
 0x12f   :  { %1140 = vmatprep.subr.bf16.mxu1 %v7590_v33  ;;  %1193 = vmatprep.subr.bf16.mxu0 %v7996_v2 }
 0x132   :  { %1141 = vmatpush1.bf16.msra.mxu1 %v7588_v34  ;;  %1194 = vmatpush1.bf16.msra.mxu0 %v7591_v35 }
 0x133   :  { %1142 = vmatprep.subr.bf16.mxu1 %v7594_v36  ;;  %1195 = vmatprep.subr.bf16.mxu0 %v7996_v2 }
 0x136   :  { %1143 = vmatpush1.bf16.msra.mxu1 %v7592_v37  ;;  %1196 = vmatpush1.bf16.msra.mxu0 %v7595_v38 }
 0x137   :  { %1144 = vmatprep.subr.bf16.mxu1 %v7598_v39  ;;  %1197 = vmatprep.subr.bf16.mxu0 %v7996_v2 }
 0x13a   :  { %1145 = vmatpush1.bf16.msra.mxu1 %v7596_v40  ;;  %1198 = vmatpush1.bf16.msra.mxu0 %v7599_v41 }
 0x13b   :  { %1146 = vmatprep.subr.bf16.mxu1 %v7602_v43  ;;  %1199 = vmatprep.subr.bf16.mxu0 %v7996_v2 }
 0x13e   :  { %1147 = vmatpush1.bf16.msra.mxu1 %v7600_v44  ;;  %1200 = vmatpush1.bf16.msra.mxu0 %v7603_v45 }
 0x13f   :  { %1148 = vmatprep.subr.bf16.mxu1 %v7606_v46  ;;  %1201 = vmatprep.subr.bf16.mxu0 %v7996_v2 }
 0x140   :  { %14 = vsyncpa [#allocation3], 0  ;;  %v7608_v50 = vld [vmem:[%s9959_s3 + $0xf0] ss:$12 sps:$4 sm:$0xff]   ;;  %v7611_v51 = vld [vmem:[%s9959_s3 + $0xf8] ss:$12 sps:$4 sm:$0xff]  }
 0x141   :  { %v7614_v52 = vld [vmem:[%s9959_s3 + $0x10c] ss:$12 sps:$4 sm:$0xff]   ;;  %v7612_v53 = vld [vmem:[%s9959_s3 + $0x108] ss:$12 sps:$4 sm:$0xff]   ;;  %v7615_v54 = vld [vmem:[%s9959_s3 + $0x110] ss:$12 sps:$4 sm:$0xff]  }
 0x142   :  { %1149 = vmatpush1.bf16.msra.mxu1 %v7604_v47  ;;  %1202 = vmatpush1.bf16.msra.mxu0 %v7607_v48  ;;  %v7618_v55 = vld [vmem:[%s9959_s3 + $0x124] ss:$12 sps:$4 sm:$0xff]   ;;  %v7616_v56 = vld [vmem:[%s9959_s3 + $0x120] ss:$12 sps:$4 sm:$0xff]   ;;  %v7619_v57 = vld [vmem:[%s9959_s3 + $0x128] ss:$12 sps:$4 sm:$0xff]  }
 0x143   :  { %1150 = vmatprep.subr.bf16.mxu1 %v7610_v49  ;;  %1203 = vmatprep.subr.bf16.mxu0 %v7996_v2  ;;  %v7622_v58 = vld [vmem:[%s9959_s3 + $0x13c] ss:$12 sps:$4 sm:$0xff]   ;;  %v7620_v61 = vld [vmem:[%s9959_s3 + $0x138] ss:$12 sps:$4 sm:$0xff]   ;;  %v7623_v62 = vld [vmem:[%s9959_s3 + $0x140] ss:$12 sps:$4 sm:$0xff]  }
 0x144   :  { %v7626_v63 = vld [vmem:[%s9959_s3 + $0x2a4] ss:$12 sps:$4 sm:$0xff]   ;;  %v7624_v0 = vld [vmem:[%s9959_s3 + $0x2a0] ss:$12 sps:$4 sm:$0xff]   ;;  %v7627_v1 = vld [vmem:[%s9959_s3 + $0x2a8] ss:$12 sps:$4 sm:$0xff]  }
 0x145   :  { %v7630_v3 = vld [vmem:[%s9959_s3 + $0x2bc] ss:$12 sps:$4 sm:$0xff]   ;;  %v7628_v5 = vld [vmem:[%s9959_s3 + $0x2b8] ss:$12 sps:$4 sm:$0xff]   ;;  %v7631_v6 = vld [vmem:[%s9959_s3 + $0x2c0] ss:$12 sps:$4 sm:$0xff]  }
 0x146   :  { %1151 = vmatpush1.bf16.msra.mxu1 %v7608_v50  ;;  %1204 = vmatpush1.bf16.msra.mxu0 %v7611_v51  ;;  %v7634_v7 = vld [vmem:[%s9959_s3 + $0x2d4] ss:$12 sps:$4 sm:$0xff]   ;;  %v7635_v8 = vld [vmem:[%s9959_s3 + $0x2d8] ss:$12 sps:$4 sm:$0xff]   ;;  %v7639_v11 = vld [vmem:[%s9959_s3 + $0x2f0] ss:$12 sps:$4 sm:$0xff]  }
 0x147   :  { %1152 = vmatprep.subr.bf16.mxu1 %v7614_v52  ;;  %1205 = vmatprep.subr.bf16.mxu0 %v7996_v2  ;;  %v7638_v9 = vld [vmem:[%s9959_s3 + $0x2ec] ss:$12 sps:$4 sm:$0xff]   ;;  %v7636_v10 = vld [vmem:[%s9959_s3 + $0x2e8] ss:$12 sps:$4 sm:$0xff]   ;;  %v7642_v13 = vld [vmem:[%s9959_s3 + $0x304] ss:$12 sps:$4 sm:$0xff]  }
 0x148   :  { %v7643_v14 = vld [vmem:[%s9959_s3 + $0x308] ss:$12 sps:$4 sm:$0xff]   ;;  %v7644_v16 = vld [vmem:[%s9959_s3 + $0x318] ss:$12 sps:$4 sm:$0xff]   ;;  %v7647_v17 = vld [vmem:[%s9959_s3 + $0x320] ss:$12 sps:$4 sm:$0xff]  }
 0x149   :  { %v7646_v15 = vld [vmem:[%s9959_s3 + $0x31c] ss:$12 sps:$4 sm:$0xff]   ;;  %v7650_v18 = vld [vmem:[%s9959_s3 + $0x334] ss:$12 sps:$4 sm:$0xff]   ;;  %v7651_v20 = vld [vmem:[%s9959_s3 + $0x338] ss:$12 sps:$4 sm:$0xff]  }
 0x14a   :  { %1153 = vmatpush1.bf16.msra.mxu1 %v7612_v53  ;;  %1206 = vmatpush1.bf16.msra.mxu0 %v7615_v54  ;;  %v7648_v19 = vld [vmem:[%s9959_s3 + $0x330] ss:$12 sps:$4 sm:$0xff]   ;;  %v7654_v21 = vld [vmem:[%s9959_s3 + $0x34c] ss:$12 sps:$4 sm:$0xff]   ;;  %v7652_v22 = vld [vmem:[%s9959_s3 + $0x348] ss:$12 sps:$4 sm:$0xff]  }
 0x14b   :  { %1154 = vmatprep.subr.bf16.mxu1 %v7618_v55  ;;  %1207 = vmatprep.subr.bf16.mxu0 %v7996_v2  ;;  %v7655_v23 = vld [vmem:[%s9959_s3 + $0x350] ss:$12 sps:$4 sm:$0xff]   ;;  %v7656_v28 = vld [vmem:[%s9959_s3 + $0x360] ss:$12 sps:$4 sm:$0xff]   ;;  %v7659_v29 = vld [vmem:[%s9959_s3 + $0x368] ss:$12 sps:$4 sm:$0xff]  }
 0x14c   :  { %v7658_v26 = vld [vmem:[%s9959_s3 + $0x364] ss:$12 sps:$4 sm:$0xff]   ;;  %v7662_v30 = vld [vmem:[%s9959_s3 + $0x37c] ss:$12 sps:$4 sm:$0xff]   ;;  %v7663_v32 = vld [vmem:[%s9959_s3 + $0x380] ss:$12 sps:$4 sm:$0xff]  }
 0x14d   :  { %v7660_v31 = vld [vmem:[%s9959_s3 + $0x378] ss:$12 sps:$4 sm:$0xff]   ;;  %v7666_v33 = vld [vmem:[%s9959_s3 + $0x394] ss:$12 sps:$4 sm:$0xff]   ;;  %v7664_v34 = vld [vmem:[%s9959_s3 + $0x390] ss:$12 sps:$4 sm:$0xff]  }
 0x14e   :  { %1155 = vmatpush1.bf16.msra.mxu1 %v7616_v56  ;;  %1208 = vmatpush1.bf16.msra.mxu0 %v7619_v57  ;;  %v7667_v35 = vld [vmem:[%s9959_s3 + $0x398] ss:$12 sps:$4 sm:$0xff]   ;;  %v7668_v37 = vld [vmem:[%s9959_s3 + $0x3a8] ss:$12 sps:$4 sm:$0xff]   ;;  %v7671_v38 = vld [vmem:[%s9959_s3 + $0x3b0] ss:$12 sps:$4 sm:$0xff]  }
 0x14f   :  { %1156 = vmatprep.subr.bf16.mxu1 %v7622_v58  ;;  %1209 = vmatprep.subr.bf16.mxu0 %v7996_v2  ;;  %v7670_v36 = vld [vmem:[%s9959_s3 + $0x3ac] ss:$12 sps:$4 sm:$0xff]   ;;  %v7674_v39 = vld [vmem:[%s9959_s3 + $0x3c4] ss:$12 sps:$4 sm:$0xff]   ;;  %v7675_v41 = vld [vmem:[%s9959_s3 + $0x3c8] ss:$12 sps:$4 sm:$0xff]  }
 0x150   :  { %v7672_v40 = vld [vmem:[%s9959_s3 + $0x3c0] ss:$12 sps:$4 sm:$0xff]   ;;  %v7678_v43 = vld [vmem:[%s9959_s3 + $0x3dc] ss:$12 sps:$4 sm:$0xff]   ;;  %v7676_v44 = vld [vmem:[%s9959_s3 + $0x3d8] ss:$12 sps:$4 sm:$0xff]  }
 0x151   :  { %v7679_v45 = vld [vmem:[%s9959_s3 + $0x3e0] ss:$12 sps:$4 sm:$0xff]   ;;  %v1294_v46 = vrot.slane %v8321_v59, 1  ;;  %v1293_v47 = vrot.slane %v8315_v42, 1  ;;  %v7684_v52 = vld [vmem:[%s9961_s5 + $0x50] sm:$0xff]   ;;  %v7686_v56 = vld [vmem:[%s9961_s5 + $0x58] sm:$0xff]  }
 0x152   :  { %1157 = vmatpush1.bf16.msra.mxu1 %v7620_v61  ;;  %1210 = vmatpush1.bf16.msra.mxu0 %v7623_v62  ;;  %v7687_v49 = vld [vmem:[%s9961_s5 + $0x100] sm:$0xff]   ;;  %v7691_v51 = vld [vmem:[%s9961_s5 + $0x108] sm:$0xff]   ;;  %v7695_v54 = vld [vmem:[%s9961_s5 + $0x110] sm:$0xff]   ;;  %vm2672_vm4 = vsmask.f32 6400  ;;  %vm2989_vm5 = vcmask 1045504  }
 0x153   :  { %1531 = vmatprep.subr.bf16.mxu1 %v7626_v63  ;;  %1584 = vmatprep.subr.bf16.mxu0 %v7996_v2  ;;  %v1295_v48 = vsel %vm281_vm2, %v1293_v47, %v1294_v46  ;;  %v7689_v50 = vld [vmem:[%s9961_s5 + $0xc0] sm:$0xff]   ;;  %v7693_v53 = vld [vmem:[%s9961_s5 + $0xc8] sm:$0xff]   ;;  %v7685_v55 = vld [vmem:[%s9961_s5 + $0x10] sm:$0xff]   ;;  %vm3611_vm6 = vcmask 1044480   ;;  %vm3294_vm7 = vsmask.f32 5376 }
 0x154   :  { %v7688_v57 = vld [vmem:[%s9961_s5 + $0x18] sm:$0xff]   ;;  %v7690_v58 = vld [vmem:[%s9961_s5 + $0x60] sm:$0xff]   ;;  %v7694_v62 = vld [vmem:[%s9961_s5 + $0x68] sm:$0xff]   ;;  %vm3916_vm8 = vsmask.f32 4352  ;;  %vm4233_vm9 = vcmask 1043456  }
 0x155   :  { %1163 = vmatmul.mubr.bf16.vlgmr.msra.gmra.mrb[0].mxu1 %v8315_v42  ;;  %1216 = vmatmul.mubr.bf16.vlgmr.msra.gmra.mrb[16].mxu0 %v8315_v42  ;;  %v7681_v42 = vld [vmem:[%s9961_s5] sm:$0xff]   ;;  %v7696_v63 = vld [vmem:[%s9961_s5 + $0x28] sm:$0xff]   ;;  %vm4538_vm10 = vsmask.f32 3328  ;;  %vm4855_vm11 = vcmask 1042432   ;;  %vm7998_vm13 = vmmov 0  }
 0x156   :  { %5731 = vmatprep.mubr.msk.bf16.mxu1 %vm793_vm3, %v8323_v60  ;;  %5733 = vmatprep.mubr.msk.bf16.mxu0 %vm793_vm3, %v8323_v60  ;;  %v7632_v60 = vld [vmem:[%s9959_s3 + $0x2d0] ss:$12 sps:$4 sm:$0xff]   ;;  %v7692_v61 = vld [vmem:[%s9961_s5 + $0x20] sm:$0xff]   ;;  %vm5160_vm12 = vsmask.f32 2304  ;;  %vm5431_vm14 = vcmask 1040384  }
 0x157   :  { %1532 = vmatpush1.bf16.msra.mxu1 %v7624_v0  ;;  %1585 = vmatpush1.bf16.msra.mxu0 %v7627_v1  ;;  %v7697_v0 = vld [vmem:[%s9961_s5 + $0xd0] sm:$0xff]   ;;  %s7999_s1 = smov [#allocation2]  }
 0x158   :  { %1533 = vmatprep.subr.bf16.mxu1 %v7630_v3  ;;  %1586 = vmatprep.subr.bf16.mxu0 %v7996_v2  ;;  %v7698_v1 = vld [vmem:[%s9961_s5 + $0x70] sm:$0xff]   ;;  %v7699_v3 = vld [vmem:[%s9961_s5 + $0x118] sm:$0xff]   ;;  %s5532_s10 = sshll.u32 %s7999_s1, 4  ;;  %s5533_s10 = int_to_ptr.vmem [resolvable:$true] %s5532_s10 }
 0x159   :  { %p7977_p1 = scmp.lt.s32.totalorder %s5533_s10, %s5533_s10 }
 0x15b   :  { %1534 = vmatpush1.bf16.msra.mxu1 %v7628_v5  ;;  %1587 = vmatpush1.bf16.msra.mxu0 %v7631_v6  ;;  %v7700_v5 = vld [vmem:[%s9961_s5 + $0x30] sm:$0xff]   ;;  %v7701_v6 = vld [vmem:[%s9961_s5 + $0xd8] sm:$0xff]  }
 0x15c   :  { %1535 = vmatprep.subr.bf16.mxu1 %v7634_v7  ;;  %1588 = vmatprep.subr.bf16.mxu0 %v7996_v2  ;;  %v7702_v7 = vld [vmem:[%s9961_s5 + $0x78] sm:$0xff]  }
 0x15d   :  { %1173 = vmatmul.mubr.bf16.gmra.mrb[4].mxu1 %v8321_v59  ;;  %1224 = vmatmul.mubr.bf16.gmra.mrb[20].mxu0 %v8321_v59  ;;  %v7682_v59 = vld [vmem:[%s9961_s5 + $0x48] sm:$0xff]  }
 0x15e   :  { %5832 = vmatprep.mubr.msk.bf16.mxu1 %vm793_vm3, %v8343_v12  ;;  %5834 = vmatprep.mubr.msk.bf16.mxu0 %vm793_vm3, %v8343_v12  ;;  %v7640_v12 = vld [vmem:[%s9959_s3 + $0x300] ss:$12 sps:$4 sm:$0xff]  }
 0x15f   :  { %1536 = vmatpush1.bf16.msra.mxu1 %v7632_v60  ;;  %1589 = vmatpush1.bf16.msra.mxu0 %v7635_v8  ;;  %v7703_v60 = vld [vmem:[%s9961_s5 + $0x120] sm:$0xff]   ;;  %v7704_v8 = vld [vmem:[%s9961_s5 + $0x38] sm:$0xff]  }
 0x160   :  { %1537 = vmatprep.subr.bf16.mxu1 %v7638_v9  ;;  %1590 = vmatprep.subr.bf16.mxu0 %v7996_v2  ;;  %v7705_v9 = vld [vmem:[%s9961_s5 + $0xe0] sm:$0xff]  }
 0x163   :  { %1538 = vmatpush1.bf16.msra.mxu1 %v7636_v10  ;;  %1591 = vmatpush1.bf16.msra.mxu0 %v7639_v11  ;;  %v7706_v10 = vld [vmem:[%s9961_s5 + $0x1c0] sm:$0xff]   ;;  %v7707_v11 = vld [vmem:[%s9961_s5 + $0x128] sm:$0xff]  }
 0x164   :  { %1539 = vmatprep.subr.bf16.mxu1 %v7642_v13  ;;  %1592 = vmatprep.subr.bf16.mxu0 %v7996_v2  ;;  %v7709_v13 = vld [vmem:[%s9961_s5 + $0xe8] sm:$0xff]  }
 0x167   :  { %1540 = vmatpush1.bf16.msra.mxu1 %v7640_v12  ;;  %1593 = vmatpush1.bf16.msra.mxu0 %v7643_v14  ;;  %v7711_v12 = vld [vmem:[%s9961_s5 + $0x130] sm:$0xff]  }
 0x168   :  { %1541 = vmatprep.subr.bf16.mxu1 %v7646_v15  ;;  %1594 = vmatprep.subr.bf16.mxu0 %v7996_v2  ;;  %v7713_v15 = vld [vmem:[%s9961_s5 + $0xf0] sm:$0xff]  }
 0x16b   :  { %1542 = vmatpush1.bf16.msra.mxu1 %v7644_v16  ;;  %1595 = vmatpush1.bf16.msra.mxu0 %v7647_v17 }
 0x16c   :  { %1543 = vmatprep.subr.bf16.mxu1 %v7650_v18  ;;  %1596 = vmatprep.subr.bf16.mxu0 %v7996_v2 }
 0x16f   :  { %1544 = vmatpush1.bf16.msra.mxu1 %v7648_v19  ;;  %1597 = vmatpush1.bf16.msra.mxu0 %v7651_v20  ;;  %v7715_v19 = vld [vmem:[%s9961_s5 + $0x138] sm:$0xff]  }
 0x170   :  { %1545 = vmatprep.subr.bf16.mxu1 %v7654_v21  ;;  %1598 = vmatprep.subr.bf16.mxu0 %v7996_v2  ;;  %v7717_v20 = vld [vmem:[%s9961_s5 + $0xf8] sm:$0xff]   ;;  %v8746_v21 = vld [vmem:[%s9961_s5 + $0x140] sm:$0xff]  }
 0x173   :  { %1546 = vmatpush1.bf16.msra.mxu1 %v7652_v22  ;;  %1599 = vmatpush1.bf16.msra.mxu0 %v7655_v23 }
 0x174   :  { %1547 = vmatprep.subr.bf16.mxu1 %v7658_v26  ;;  %1600 = vmatprep.subr.bf16.mxu0 %v7996_v2 }
 0x177   :  { %1548 = vmatpush1.bf16.msra.mxu1 %v7656_v28  ;;  %1601 = vmatpush1.bf16.msra.mxu0 %v7659_v29 }
 0x178   :  { %1549 = vmatprep.subr.bf16.mxu1 %v7662_v30  ;;  %1602 = vmatprep.subr.bf16.mxu0 %v7996_v2 }
 0x17b   :  { %1550 = vmatpush1.bf16.msra.mxu1 %v7660_v31  ;;  %1603 = vmatpush1.bf16.msra.mxu0 %v7663_v32 }
 0x17c   :  { %1551 = vmatprep.subr.bf16.mxu1 %v7666_v33  ;;  %1604 = vmatprep.subr.bf16.mxu0 %v7996_v2 }
 0x17f   :  { %1552 = vmatpush1.bf16.msra.mxu1 %v7664_v34  ;;  %1605 = vmatpush1.bf16.msra.mxu0 %v7667_v35 }
 0x180   :  { %1553 = vmatprep.subr.bf16.mxu1 %v7670_v36  ;;  %1606 = vmatprep.subr.bf16.mxu0 %v7996_v2 }
 0x183   :  { %1554 = vmatpush1.bf16.msra.mxu1 %v7668_v37  ;;  %1607 = vmatpush1.bf16.msra.mxu0 %v7671_v38 }
 0x184   :  { %1555 = vmatprep.subr.bf16.mxu1 %v7674_v39  ;;  %1608 = vmatprep.subr.bf16.mxu0 %v7996_v2 }
 0x187   :  { %1556 = vmatpush1.bf16.msra.mxu1 %v7672_v40  ;;  %1609 = vmatpush1.bf16.msra.mxu0 %v7675_v41  ;;  %v1645_v41 = vld [vmem:[%s9960_s4] sm:$0x7] }
 0x188   :  { %1557 = vmatprep.subr.bf16.mxu1 %v7678_v43  ;;  %1610 = vmatprep.subr.bf16.mxu0 %v7996_v2  ;;  %v7680_v2 = vld [vmem:[%s9961_s5 + $0x40] sm:$0xff]   ;;  %v1657_v43 = vsub.s32 2, %v8304_v24 }
 0x18b   :  { %1558 = vmatpush1.bf16.msra.mxu1 %v7676_v44  ;;  %1611 = vmatpush1.bf16.msra.mxu0 %v7679_v45  ;;  %v1650_v44 = vrot.slane %v1645_v41, %v396_v25  ;;  %v1654_v45 = vrot.slane %v1645_v41, %v400_v27 }
 0x18c   :  { %6697 = vmatprep.subr.bf16.mxu0 %v7680_v2  ;;  %6659 = vmatprep.subr.bf16.mxu1 %v7687_v49 }
 0x18e   :  { %1564 = vmatmul.mubr.bf16.vlgmr.msra.gmra.mrb[0].mxu1 %v1295_v48  ;;  %1617 = vmatmul.mubr.bf16.vlgmr.msra.gmra.mrb[24].mxu0 %v1295_v48 }
 0x18f   :  { %5833 = vmatprep.mubr.msk.bf16.mxu1 %vm793_vm3, %v8331_v4  ;;  %5835 = vmatprep.mubr.msk.bf16.mxu0 %vm793_vm3, %v8331_v4  ;;  %v7683_v4 = vld [vmem:[%s9961_s5 + $0x8] sm:$0xff]  }
 0x190   :  { %6698 = vmatpush3.bf16.msra.mxu0 %v7681_v42  ;;  %6660 = vmatpush3.bf16.msra.mxu1 %v7689_v50 }
 0x191   :  { %6699 = vmatprep.subr.bf16.mxu0 %v7682_v59  ;;  %6661 = vmatprep.subr.bf16.mxu1 %v7691_v51 }
 0x194   :  { %6700 = vmatpush3.bf16.msra.mxu0 %v7683_v4  ;;  %6662 = vmatpush3.bf16.msra.mxu1 %v7693_v53 }
 0x195   :  { %6701 = vmatprep.subr.bf16.mxu0 %v7684_v52  ;;  %6663 = vmatprep.subr.bf16.mxu1 %v7695_v54 }
 0x196   :  { %1574 = vmatmul.mubr.bf16.gmra.mrb[4].mxu1 %v1294_v46  ;;  %1625 = vmatmul.mubr.bf16.gmra.mrb[28].mxu0 %v1294_v46  ;;  %v1658_v46 = vrot.slane %v1645_v41, %v1657_v43 }
 0x198   :  { %6702 = vmatpush3.bf16.msra.mxu0 %v7685_v55  ;;  %6664 = vmatpush3.bf16.msra.mxu1 %v7697_v0 }
 0x199   :  { %6703 = vmatprep.subr.bf16.mxu0 %v7686_v56  ;;  %6665 = vmatprep.subr.bf16.mxu1 %v7699_v3 }
 0x19c   :  { %6704 = vmatpush3.bf16.msra.mxu0 %v7688_v57  ;;  %6666 = vmatpush3.bf16.msra.mxu1 %v7701_v6  ;;  %v7708_v6 = vld [vmem:[%s9961_s5 + $0x180] sm:$0xff]  }
 0x19d   :  { %6705 = vmatprep.subr.bf16.mxu0 %v7690_v58  ;;  %6667 = vmatprep.subr.bf16.mxu1 %v7703_v60 }
 0x1a0   :  { %6706 = vmatpush3.bf16.msra.mxu0 %v7692_v61  ;;  %6668 = vmatpush3.bf16.msra.mxu1 %v7705_v9 }
 0x1a1   :  { %6707 = vmatprep.subr.bf16.mxu0 %v7694_v62  ;;  %6669 = vmatprep.subr.bf16.mxu1 %v7707_v11  ;;  %v7710_v11 = vld [vmem:[%s9961_s5 + $0x1c8] sm:$0xff]  }
 0x1a4   :  { %6708 = vmatpush3.bf16.msra.mxu0 %v7696_v63  ;;  %6670 = vmatpush3.bf16.msra.mxu1 %v7709_v13 }
 0x1a5   :  { %6709 = vmatprep.subr.bf16.mxu0 %v7698_v1  ;;  %6671 = vmatprep.subr.bf16.mxu1 %v7711_v12 }
 0x1a8   :  { %6710 = vmatpush3.bf16.msra.mxu0 %v7700_v5  ;;  %6672 = vmatpush3.bf16.msra.mxu1 %v7713_v15 }
 0x1a9   :  { %6711 = vmatprep.subr.bf16.mxu0 %v7702_v7  ;;  %6673 = vmatprep.subr.bf16.mxu1 %v7715_v19 }
 0x1ac   :  { %6712 = vmatpush3.bf16.msra.mxu0 %v7704_v8  ;;  %6674 = vmatpush3.bf16.msra.mxu1 %v7717_v20 }
 0x1ad   :  { %6735 = vmatprep.subr.bf16.mxu0 %v7706_v10  ;;  %7120 = vmatprep.subr.bf16.mxu1 %v8746_v21 }
 0x1f0   :  { %v887_v14 = vpop.f32.mrb[8].mxu0 }
 0x1f1   :  { %v889_v16 = vpop.f32.mrb[9].mxu0 }
 0x1f2   :  { %v890_v17 = vpop.f32.mrb[10].mxu0 }
 0x1f3   :  { %v892_v18 = vpop.f32.mrb[11].mxu0 }
 0x1f8   :  { %v895_v22 = vpop.f32.mrb[12].mxu0 }
 0x1f9   :  { %v897_v23 = vpop.f32.mrb[13].mxu0 }
 0x1fa   :  { %v898_v26 = vpop.f32.mrb[14].mxu0 }
 0x1fb   :  { %v900_v28 = vpop.f32.mrb[15].mxu0 }
 0x1fc   :  { %v7712_v28 = vld [vmem:[%s9961_s5 + $0x188] sm:$0xff]  }
 0x228   :  { %v1217_v29 = vpop.f32.mrb[16].mxu0 }
 0x229   :  { %v1218_v30 = vadd.f32 %v1217_v29, %v887_v14  ;;  %v1219_v31 = vpop.f32.mrb[17].mxu0 }
 0x22a   :  { %v1220_v32 = vpop.f32.mrb[18].mxu0 }
 0x22b   :  { %v1221_v33 = vadd.f32 %v1220_v32, %v890_v17  ;;  %v1222_v34 = vpop.f32.mrb[19].mxu0 }
 0x230   :  { %v1225_v35 = vpop.f32.mrb[20].mxu0 }
 0x231   :  { %v1226_v36 = vadd.f32 %v1225_v35, %v895_v22  ;;  %v1227_v37 = vpop.f32.mrb[21].mxu0 }
 0x232   :  { %v1228_v38 = vpop.f32.mrb[22].mxu0 }
 0x233   :  { %v1229_v39 = vadd.f32 %v1228_v38, %v898_v26  ;;  %v1230_v40 = vpop.f32.mrb[23].mxu0 }
 0x261   :  { %v1565_v47 = vpop.f32.mrb[0].mxu1  ;;  %v1618_v48 = vpop.f32.mrb[24].mxu0 }
 0x262   :  { %v1662_v2 = vadd.f32 %v1650_v44, %v1565_v47  ;;  %v1635_v42 = vadd.f32 %v1618_v48, %v1218_v30  ;;  %v1567_v59 = vpop.f32.mrb[1].mxu1  ;;  %v1620_v49 = vpop.f32.mrb[25].mxu0  ;;  %v7716_v47 = vld [vmem:[%s9961_s5 + $0x190] sm:$0xff]  }
 0x263   :  { %v1663_v4 = vadd.f32 %v1654_v45, %v1567_v59  ;;  %v1569_v50 = vpop.f32.mrb[2].mxu1  ;;  %v1621_v51 = vpop.f32.mrb[26].mxu0  ;;  %v7718_v49 = vld [vmem:[%s9961_s5 + $0x1d8] sm:$0xff]  }
 0x264   :  { %v1664_v52 = vadd.f32 %v1658_v46, %v1635_v42  ;;  %v1665_v53 = vadd.f32 %v1650_v44, %v1569_v50  ;;  %v1638_v54 = vadd.f32 %v1621_v51, %v1221_v33  ;;  %v1571_v55 = vpop.f32.mrb[3].mxu1  ;;  %v1623_v56 = vpop.f32.mrb[27].mxu0  ;;  %v1674_v25 = vmax.f32 %v1662_v2, 0.0 }
 0x265   :  { %v1666_v57 = vadd.f32 %v1654_v45, %v1571_v55  ;;  %v1675_v27 = vmax.f32 %v1663_v4, 0.0 }
 0x266   :  { %v1677_v58 = vmax.f32 %v1665_v53, 0.0  ;;  %v1667_v24 = vadd.f32 %v1658_v46, %v1638_v54  ;;  %v1676_v62 = vmax.f32 %v1664_v52, 0.0 }
 0x267   :  { %v1678_v61 = vmax.f32 %v1666_v57, 0.0 }
 0x268   :  { %v8757_v63 = vpack.c.bf16 %v1677_v58, %v1674_v25  ;;  %v1679_v0 = vmax.f32 %v1667_v24, 0.0 }
 0x269   :  { %v8759_v1 = vpack.c.bf16 %v1678_v61, %v1675_v27  ;;  %v1575_v3 = vpop.f32.mrb[4].mxu1  ;;  %v1626_v5 = vpop.f32.mrb[28].mxu0  ;;  %v7720_v61 = vld [vmem:[%s9961_s5 + $0x198] sm:$0xff]  }
 0x26a   :  { %v8764_v7 = vpack.c.bf16 %v1679_v0, %v1676_v62  ;;  %v1668_v60 = vadd.f32 %v1650_v44, %v1575_v3  ;;  %v1641_v8 = vadd.f32 %v1626_v5, %v1226_v36  ;;  %v1577_v9 = vpop.f32.mrb[5].mxu1  ;;  %v1628_v10 = vpop.f32.mrb[29].mxu0  ;;  %v8774_v16 = vshrl.u32 %v8757_v63, 16  ;;  %v7714_v36 = vld [vmem:[%s9961_s5 + $0x1d0] sm:$0xff]  }
 0x26b   :  { %v1669_v13 = vadd.f32 %v1654_v45, %v1577_v9  ;;  %v1579_v12 = vpop.f32.mrb[6].mxu1  ;;  %v1629_v14 = vpop.f32.mrb[30].mxu0  ;;  %2251 = vmatprep.mubr.bf16.mxu0 %v8759_v1  ;;  %v8771_v15 = vshll.u32 %v8759_v1, 16  ;;  %v2371_v23 = vrot.slane %v8759_v1, 1  ;;  %v8782_v29 = vshrl.u32 %v8759_v1, 16  ;;  %v7721_v9 = vld [vmem:[%s9961_s5 + $0x1e0] sm:$0xff]  }
 0x26c   :  { %v1670_v17 = vadd.f32 %v1658_v46, %v1641_v8  ;;  %v1671_v18 = vadd.f32 %v1650_v44, %v1579_v12  ;;  %v1644_v19 = vadd.f32 %v1629_v14, %v1229_v39  ;;  %v1581_v20 = vpop.f32.mrb[7].mxu1  ;;  %v1631_v22 = vpop.f32.mrb[31].mxu0  ;;  %2252 = vmatmul.mubr.bf16.vlgmr.msra.gmra.mrb[32].mxu0 %v8757_v63  ;;  %v8786_v31 = vshll.u32 %v8757_v63, 16  ;;  %v7722_v10 = vld [vmem:[%s9961_s5 + $0x148] sm:$0xff]  }
 0x26d   :  { %v1672_v26 = vadd.f32 %v1654_v45, %v1581_v20  ;;  %6736 = vmatpush3.bf16.msra.mxu0 %v7708_v6  ;;  %v1806_v30 = vrot.slane %v8771_v15, 1  ;;  %v1680_v32 = vmax.f32 %v1668_v60, 0.0  ;;  %v1681_v33 = vmax.f32 %v1669_v13, 0.0 }
 0x26e   :  { %v1683_v34 = vmax.f32 %v1671_v18, 0.0  ;;  %v1673_v35 = vadd.f32 %v1658_v46, %v1644_v19  ;;  %6737 = vmatprep.subr.bf16.mxu0 %v7710_v11  ;;  %v1682_v37 = vmax.f32 %v1670_v17, 0.0  ;;  %v1794_v39 = vrot.slane %v8786_v31, 1  ;;  %v7723_v19 = vld [vmem:[%s9961_s5 + $0x1a0] sm:$0xff]  }
 0x26f   :  { %v1684_v38 = vmax.f32 %v1672_v26, 0.0  ;;  %v8793_v40 = vshrl.u32 %v8764_v7, 16  ;;  %v1807_v44 = vor.u32 %v1806_v30, %v8782_v29  ;;  %v8799_v45 = vshll.u32 %v8764_v7, 16 }
 0x270   :  { %v8795_v41 = vpack.c.bf16 %v1683_v34, %v1680_v32  ;;  %v1685_v43 = vmax.f32 %v1673_v35, 0.0  ;;  %v1795_v48 = vor.u32 %v1794_v39, %v8774_v16  ;;  %v2368_v2 = vrot.slane %v8757_v63, 1 }
 0x271   :  { %v8801_v46 = vpack.c.bf16 %v1684_v38, %v1681_v33  ;;  %6738 = vmatpush3.bf16.msra.mxu0 %v7712_v28  ;;  %v2680_v42 = vrot.slane %v8782_v29, 1  ;;  %v2681_v51 = vrot.slane %v8771_v15, 2  ;;  %v1818_v57 = vrot.slane %v8799_v45, 1  ;;  %v7724_v28 = vld [vmem:[%s9961_s5 + $0x1e8] sm:$0xff]  }
 0x272   :  { %v8809_v59 = vpack.c.bf16 %v1685_v43, %v1682_v37  ;;  %6739 = vmatprep.subr.bf16.mxu0 %v7714_v36  ;;  %v8815_v4 = vshll.u32 %v8795_v41, 16  ;;  %v2369_v50 = vrot.slane %v8795_v41, 1  ;;  %v8828_v55 = vshrl.u32 %v8795_v41, 16 }
 0x273   :  { %2258 = vmatprep.mubr.bf16.mxu0 %v8801_v46  ;;  %v2372_v52 = vrot.slane %v8801_v46, 1  ;;  %v8822_v53 = vshll.u32 %v8801_v46, 16  ;;  %v8825_v54 = vshrl.u32 %v8801_v46, 16  ;;  %v2682_v6 = vor.u32 %v2681_v51, %v2680_v42 }
 0x274   :  { %2259 = vmatmul.mubr.bf16.gmra.mrb[36].mxu0 %v8795_v41  ;;  %v1799_v56 = vrot.slane %v8815_v4, 1  ;;  %v8834_v25 = vshll.u32 %v8809_v59, 16  ;;  %v8839_v58 = vsel %vm281_vm2, %v2368_v2, %v2369_v50  ;;  %v2673_v60 = vrot.slane %v8774_v16, 1 }
 0x275   :  { %6740 = vmatpush3.bf16.msra.mxu0 %v7716_v47  ;;  %v2373_v24 = vsel %vm281_vm2, %v2371_v23, %v2372_v52  ;;  %v1811_v27 = vrot.slane %v8822_v53, 1  ;;  %v2683_v62 = vrot.slane %v8825_v54, 1  ;;  %v2684_v0 = vrot.slane %v8822_v53, 2 }
 0x276   :  { %2559 = vmatprep.mubr.bf16.mxu0 %v2373_v24  ;;  %6741 = vmatprep.subr.bf16.mxu0 %v7718_v49  ;;  %v1800_v3 = vsel %vm57_vm0, %v1795_v48, %v1799_v56  ;;  %v1823_v5 = vrot.slane %v8834_v25, 1  ;;  %v2674_v13 = vrot.slane %v8786_v31, 2  ;;  %v2676_v12 = vrot.slane %v8828_v55, 1  ;;  %v7726_v48 = vld [vmem:[%s9961_s5 + $0x1a8] sm:$0xff]  }
 0x277   :  { %v1812_v8 = vsel %vm57_vm0, %v1807_v44, %v1811_v27  ;;  %v2685_v11 = vor.u32 %v2684_v0, %v2683_v62  ;;  %v2677_v14 = vrot.slane %v8815_v4, 2  ;;  %v2993_v17 = vrot.slane %v8759_v1, 2  ;;  %v7728_v0 = vld [vmem:[%s9961_s5 + $0x158] sm:$0xff]  }
 0x278   :  { %2013 = vmatprep.mubr.bf16.mxu1 %v1812_v8  ;;  %v2994_v18 = vrot.slane %v8801_v46, 2  ;;  %v1819_v20 = vor.u32 %v1818_v57, %v8793_v40  ;;  %v8875_v23 = vshrl.u32 %v8809_v59, 16  ;;  %v2675_v26 = vor.u32 %v2674_v13, %v2673_v60  ;;  %v7729_v13 = vld [vmem:[%s9961_s5 + $0x1b0] sm:$0xff]  }
 0x279   :  { %6742 = vmatpush3.bf16.msra.mxu0 %v7720_v61  ;;  %2014 = vmatmul.mubr.bf16.vlgmr.msra.gmra.mrb[8].mxu1 %v1800_v3  ;;  %v8872_v22 = vsel %vm2672_vm4, %v2682_v6, %v2685_v11  ;;  %v2678_v30 = vor.u32 %v2677_v14, %v2676_v12  ;;  %v2990_v33 = vrot.slane %v8757_v63, 2  ;;  %v2991_v34 = vrot.slane %v8795_v41, 2  ;;  %v7727_v61 = vld [vmem:[%s9961_s5 + $0x1f0] sm:$0xff]  }
 0x27a   :  { %7121 = vmatpush3.bf16.msra.mxu1 %v8746_v21  ;;  %2020 = vmatprep.mubr.bf16.mxu1 %v8825_v54  ;;  %v8887_v32 = vsel %vm2989_vm5, %v2993_v17, %v2994_v18  ;;  %v7725_v21 = vld [vmem:[%s9961_s5 + $0x150] sm:$0xff]   ;;  %v1824_v35 = vsel %vm57_vm0, %v1819_v20, %v1823_v5  ;;  %v3302_v36 = vrot.slane %v8782_v29, 2  ;;  %v3303_v37 = vrot.slane %v8771_v15, 3 }
 0x27b   :  { %6743 = vmatprep.subr.bf16.mxu0 %v7721_v9  ;;  %7122 = vmatprep.subr.bf16.mxu1 %v7722_v10  ;;  %v3305_v38 = vrot.slane %v8825_v54, 2  ;;  %v8899_v39 = vsel %vm2672_vm4, %v2675_v26, %v2678_v30  ;;  %v8904_v43 = vsel %vm2989_vm5, %v2990_v33, %v2991_v34  ;;  %v3306_v44 = vrot.slane %v8822_v53, 3  ;;  %v7730_v26 = vld [vmem:[%s9961_s5 + $0x1f8] sm:$0xff]  }
 0x27c   :  { %v2687_v47 = vrot.slane %v8793_v40, 1  ;;  %v3304_v2 = vor.u32 %v3303_v37, %v3302_v36  ;;  %v2688_v42 = vrot.slane %v8799_v45, 2  ;;  %v2690_v49 = vrot.slane %v8875_v23, 1 }
 0x27d   :  { %6744 = vmatpush3.bf16.msra.mxu0 %v7723_v19  ;;  %v2691_v51 = vrot.slane %v8834_v25, 2  ;;  %v3307_v56 = vor.u32 %v3306_v44, %v3305_v38  ;;  %v3295_v57 = vrot.slane %v8774_v16, 2  ;;  %v3296_v24 = vrot.slane %v8786_v31, 3 }
 0x27e   :  { %7123 = vmatpush3.bf16.msra.mxu1 %v7722_v10  ;;  %6745 = vmatprep.subr.bf16.mxu0 %v7724_v28  ;;  %v3298_v27 = vrot.slane %v8828_v55, 2  ;;  %v2689_v3 = vor.u32 %v2688_v42, %v2687_v47  ;;  %v3299_v6 = vrot.slane %v8815_v4, 3  ;;  %v3615_v60 = vrot.slane %v8759_v1, 3 }
 0x27f   :  { %7124 = vmatprep.subr.bf16.mxu1 %v7725_v21  ;;  %v2692_v5 = vor.u32 %v2691_v51, %v2690_v49  ;;  %v8930_v8 = vsel %vm3294_vm7, %v3304_v2, %v3307_v56  ;;  %v3297_v9 = vor.u32 %v3296_v24, %v3295_v57  ;;  %v3616_v10 = vrot.slane %v8801_v46, 3  ;;  %v7732_v56 = vld [vmem:[%s9961_s5 + $0x1b8] sm:$0xff]  }
 0x280   :  { %v2996_v11 = vrot.slane %v8764_v7, 2  ;;  %v3300_v17 = vor.u32 %v3299_v6, %v3298_v27  ;;  %v9973_v19 = vrot.slane %v8809_v59, 2  ;;  %v3612_v20 = vrot.slane %v8757_v63, 3 }
 0x281   :  { %6746 = vmatpush3.bf16.msra.mxu0 %v7726_v48  ;;  %2021 = vmatmul.mubr.bf16.gmra.mrb[12].mxu1 %v8828_v55  ;;  %v8939_v14 = vsel %vm2672_vm4, %v2689_v3, %v2692_v5  ;;  %v8951_v28 = vsel %vm3611_vm6, %v3615_v60, %v3616_v10  ;;  %v3613_v30 = vrot.slane %v8795_v41, 3  ;;  %v3924_v33 = vrot.slane %v8782_v29, 3  ;;  %v7733_v5 = vld [vmem:[%s9961_s5 + $0x280] sm:$0xff]  }
 0x282   :  { %7125 = vmatpush3.bf16.msra.mxu1 %v7725_v21  ;;  %7136 = vmatprep.mubr.bf16.mxu1 %v1824_v35  ;;  %v3925_v36 = vrot.slane %v8771_v15, 4  ;;  %v7731_v21 = vld [vmem:[%s9961_s5 + $0x160] sm:$0xff]   ;;  %v8960_v35 = vsel %vm3294_vm7, %v3297_v9, %v3300_v17  ;;  %v8965_v37 = vsel %vm2989_vm5, %v2996_v11, %v9973_v19  ;;  %v9971_v44 = vrot.slane %v8825_v54, 3 }
 0x283   :  { %6747 = vmatprep.subr.bf16.mxu0 %v7727_v61  ;;  %7126 = vmatprep.subr.bf16.mxu1 %v7728_v0  ;;  %v3928_v47 = vrot.slane %v8822_v53, 4  ;;  %v8972_v48 = vsel %vm3611_vm6, %v3612_v20, %v3613_v30  ;;  %v3309_v42 = vrot.slane %v8793_v40, 2  ;;  %v3310_v51 = vrot.slane %v8799_v45, 3 }
 0x284   :  { %v3926_v2 = vor.u32 %v3925_v36, %v3924_v33  ;;  %v9968_v24 = vrot.slane %v8875_v23, 2  ;;  %v3313_v61 = vrot.slane %v8834_v25, 3  ;;  %v3917_v3 = vrot.slane %v8774_v16, 3 }
 0x285   :  { %6748 = vmatpush3.bf16.msra.mxu0 %v7729_v13  ;;  %v3929_v57 = vor.u32 %v3928_v47, %v9971_v44  ;;  %v3311_v6 = vor.u32 %v3310_v51, %v3309_v42  ;;  %v3918_v60 = vrot.slane %v8786_v31, 4  ;;  %v9970_v9 = vrot.slane %v8828_v55, 3  ;;  %v7734_v13 = vld [vmem:[%s9961_s5 + $0x168] sm:$0xff]  }
 0x286   :  { %7127 = vmatpush3.bf16.msra.mxu1 %v7728_v0  ;;  %6749 = vmatprep.subr.bf16.mxu0 %v7730_v26  ;;  %v3921_v11 = vrot.slane %v8815_v4, 4  ;;  %v3314_v17 = vor.u32 %v3313_v61, %v9968_v24  ;;  %v4237_v20 = vrot.slane %v8759_v1, 4  ;;  %v9967_v26 = vrot.slane %v8801_v46, 4 }
 0x287   :  { %7128 = vmatprep.subr.bf16.mxu1 %v7731_v21  ;;  %v8994_v0 = vsel %vm3916_vm8, %v3926_v2, %v3929_v57  ;;  %v3919_v33 = vor.u32 %v3918_v60, %v3917_v3  ;;  %v3618_v47 = vrot.slane %v8764_v7, 3  ;;  %v9966_v42 = vrot.slane %v8809_v59, 3  ;;  %v7735_v2 = vld [vmem:[%s9961_s5 + $0x240] sm:$0xff]  }
 0x288   :  { %v3922_v36 = vor.u32 %v3921_v11, %v9970_v9  ;;  %v9008_v51 = vsel %vm3294_vm7, %v3311_v6, %v3314_v17  ;;  %v9013_v57 = vsel %vm4233_vm9, %v4237_v20, %v9967_v26  ;;  %v4234_v61 = vrot.slane %v8757_v63, 4 }
 0x289   :  { %6750 = vmatpush3.bf16.msra.mxu0 %v7732_v56  ;;  %v9969_v3 = vrot.slane %v8795_v41, 4  ;;  %v7736_v56 = vld [vmem:[%s9961_s5 + $0x288] sm:$0xff]   ;;  %v9026_v6 = vsel %vm3611_vm6, %v3618_v47, %v9966_v42  ;;  %v4546_v11 = vrot.slane %v8782_v29, 4  ;;  %v4547_v17 = vrot.slane %v8771_v15, 5 }
 0x28a   :  { %7129 = vmatpush3.bf16.msra.mxu1 %v7731_v21  ;;  %6773 = vmatprep.subr.bf16.mxu0 %v7733_v5  ;;  %v9021_v60 = vsel %vm3916_vm8, %v3919_v33, %v3922_v36  ;;  %v7737_v21 = vld [vmem:[%s9961_s5 + $0x170] sm:$0xff]   ;;  %v9972_v20 = vrot.slane %v8825_v54, 4  ;;  %v4550_v33 = vrot.slane %v8822_v53, 5  ;;  %v3931_v36 = vrot.slane %v8793_v40, 3 }
 0x28b   :  { %7130 = vmatprep.subr.bf16.mxu1 %v7734_v13  ;;  %v9036_v5 = vsel %vm4233_vm9, %v4234_v61, %v9969_v3  ;;  %v4548_v47 = vor.u32 %v4547_v17, %v4546_v11  ;;  %v3932_v42 = vrot.slane %v8799_v45, 4  ;;  %v9974_v26 = vrot.slane %v8875_v23, 3  ;;  %v7738_v61 = vld [vmem:[%s9961_s5 + $0x248] sm:$0xff]  }
 0x28c   :  { %2560 = vmatmul.mubr.bf16.vlgmr.msra.gmra.mrb[40].mxu0 %v8839_v58  ;;  %v3935_v24 = vrot.slane %v8834_v25, 4  ;;  %v4551_v3 = vor.u32 %v4550_v33, %v9972_v20  ;;  %v4539_v58 = vrot.slane %v8774_v16, 4  ;;  %v4540_v11 = vrot.slane %v8786_v31, 5  ;;  %v7740_v20 = vld [vmem:[%s9961_s5 + $0x178] sm:$0xff]  }
 0x28d   :  { %2566 = vmatprep.mubr.bf16.mxu0 %v2372_v52  ;;  %6774 = vmatpush3.bf16.msra.mxu0 %v7735_v2  ;;  %v4542_v17 = vrot.slane %v8828_v55, 4  ;;  %v7739_v52 = vld [vmem:[%s9961_s5 + $0x290] sm:$0xff]   ;;  %v3933_v2 = vor.u32 %v3932_v42, %v3931_v36  ;;  %v4543_v44 = vrot.slane %v8815_v4, 5  ;;  %v4859_v33 = vrot.slane %v8759_v1, 5 }
 0x28e   :  { %7131 = vmatpush3.bf16.msra.mxu1 %v7734_v13  ;;  %6775 = vmatprep.subr.bf16.mxu0 %v7736_v56  ;;  %v3936_v9 = vor.u32 %v3935_v24, %v9974_v26  ;;  %v9066_v13 = vsel %vm4538_vm10, %v4548_v47, %v4551_v3  ;;  %v4541_v56 = vor.u32 %v4540_v11, %v4539_v58  ;;  %v4860_v19 = vrot.slane %v8801_v46, 5  ;;  %v7741_v3 = vld [vmem:[%s9961_s5 + $0x250] sm:$0xff]  }
 0x28f   :  { %7132 = vmatprep.subr.bf16.mxu1 %v7737_v21  ;;  %v4240_v42 = vrot.slane %v8764_v7, 4  ;;  %v4544_v24 = vor.u32 %v4543_v44, %v4542_v17  ;;  %v9975_v1 = vrot.slane %v8809_v59, 4  ;;  %v4856_v26 = vrot.slane %v8757_v63, 5  ;;  %v7742_v63 = vld [vmem:[%s9961_s5 + $0x298] sm:$0xff]  }
 0x290   :  { %v9071_v36 = vsel %vm3916_vm8, %v3933_v2, %v3936_v9  ;;  %v9083_v47 = vsel %vm4855_vm11, %v4859_v33, %v4860_v19  ;;  %v4857_v9 = vrot.slane %v8795_v41, 5  ;;  %v5168_v58 = vrot.slane %v8782_v29, 5 }
 0x291   :  { %6776 = vmatpush3.bf16.msra.mxu0 %v7738_v61  ;;  %v5169_v44 = vrot.slane %v8771_v15, 6  ;;  %v9092_v61 = vsel %vm4538_vm10, %v4541_v56, %v4544_v24  ;;  %v9097_v11 = vsel %vm4233_vm9, %v4240_v42, %v9975_v1  ;;  %v9976_v2 = vrot.slane %v8825_v54, 5  ;;  %v7743_v15 = vld [vmem:[%s9961_s5 + $0x80] sm:$0xff]  }
 0x292   :  { %7133 = vmatpush3.bf16.msra.mxu1 %v7737_v21  ;;  %6777 = vmatprep.subr.bf16.mxu0 %v7739_v52  ;;  %v5172_v29 = vrot.slane %v8822_v53, 6  ;;  %v9107_v21 = vsel %vm4855_vm11, %v4856_v26, %v4857_v9  ;;  %v4553_v33 = vrot.slane %v8793_v40, 4  ;;  %v4554_v56 = vrot.slane %v8799_v45, 5  ;;  %v7744_v26 = vld [vmem:[%s9961_s5 + $0x258] sm:$0xff]  }
 0x293   :  { %7134 = vmatprep.subr.bf16.mxu1 %v7740_v20  ;;  %v5170_v52 = vor.u32 %v5169_v44, %v5168_v58  ;;  %v9977_v42 = vrot.slane %v8875_v23, 4  ;;  %v4557_v24 = vrot.slane %v8834_v25, 5  ;;  %v5161_v1 = vrot.slane %v8774_v16, 5 }
 0x294   :  { %2567 = vmatmul.mubr.bf16.gmra.mrb[44].mxu0 %v2369_v50  ;;  %v5173_v53 = vor.u32 %v5172_v29, %v9976_v2  ;;  %v4555_v58 = vor.u32 %v4554_v56, %v4553_v33  ;;  %v5162_v44 = vrot.slane %v8786_v31, 6  ;;  %v5164_v50 = vrot.slane %v8828_v55, 5  ;;  %v7745_v31 = vld [vmem:[%s9961_s5 + $0x2a0] sm:$0xff]  }
 0x295   :  { %6778 = vmatpush3.bf16.msra.mxu0 %v7741_v3  ;;  %2876 = vmatprep.mubr.bf16.mxu0 %v8872_v22  ;;  %v5165_v29 = vrot.slane %v8815_v4, 6  ;;  %v4558_v16 = vor.u32 %v4557_v24, %v9977_v42  ;;  %v4862_v22 = vrot.slane %v8764_v7, 5  ;;  %v4863_v3 = vrot.slane %v8809_v59, 5  ;;  %v7746_v4 = vld [vmem:[%s9961_s5 + $0x88] sm:$0xff]  }
 0x296   :  { %7135 = vmatpush3.bf16.msra.mxu1 %v7740_v20  ;;  %6779 = vmatprep.subr.bf16.mxu0 %v7742_v63  ;;  %v9126_v2 = vsel %vm5160_vm12, %v5170_v52, %v5173_v53  ;;  %v5163_v20 = vor.u32 %v5162_v44, %v5161_v1  ;;  %v5175_v52 = vrot.slane %v8793_v40, 5  ;;  %v5176_v33 = vrot.slane %v8799_v45, 6  ;;  %v7747_v40 = vld [vmem:[%s9961_s5 + $0x260] sm:$0xff]  }
 0x297   :  { %7140 = vmatprep.subr.bf16.mxu1 %v7743_v15  ;;  %v5166_v63 = vor.u32 %v5165_v29, %v5164_v50  ;;  %v9143_v56 = vsel %vm4538_vm10, %v4555_v58, %v4558_v16  ;;  %v9148_v53 = vsel %vm4855_vm11, %v4862_v22, %v4863_v3  ;;  %v5178_v24 = vrot.slane %v8875_v23, 5  ;;  %v7748_v58 = vld [vmem:[%s9961_s5 + $0x2a8] sm:$0xff]   ;;  %v7752_v29 = vld [vmem:[%s9961_s5 + $0x98] sm:$0xff]   ;;  %v7753_v16 = vld [vmem:[%s9961_s5 + $0x270] sm:$0xff]  }
 0x298   :  { %v5179_v42 = vrot.slane %v8834_v25, 6  ;;  %v5177_v1 = vor.u32 %v5176_v33, %v5175_v52  ;;  %v7754_v22 = vld [vmem:[%s9961_s5 + $0x2b8] sm:$0xff]   ;;  %v7759_v52 = vld [vmem:[%s9961_s5 + $0x300] sm:$0xff]   ;;  %v7760_v33 = vld [vmem:[%s9961_s5 + $0x348] sm:$0xff]  }
 0x299   :  { %7137 = vmatmul.mubr.bf16.vlgmr.msra.gmra.mrb[16].mxu1 %v8875_v23  ;;  %6780 = vmatpush3.bf16.msra.mxu0 %v7744_v26  ;;  %v9157_v45 = vsel %vm5160_vm12, %v5163_v20, %v5166_v63  ;;  %v7749_v26 = vld [vmem:[%s9961_s5 + $0x90] sm:$0xff]   ;;  %v7757_v20 = vld [vmem:[%s9961_s5 + $0x340] sm:$0xff]   ;;  %v7758_v63 = vld [vmem:[%s9961_s5 + $0xa8] sm:$0xff]  }
 0x29a   :  { %7141 = vmatpush3.bf16.msra.mxu1 %v7743_v15  ;;  %7156 = vmatprep.mubr.bf16.mxu1 %v8764_v7  ;;  %v5180_v25 = vor.u32 %v5179_v42, %v5178_v24  ;;  %v7750_v15 = vld [vmem:[%s9961_s5 + $0x268] sm:$0xff]   ;;  %v7751_v42 = vld [vmem:[%s9961_s5 + $0x2b0] sm:$0xff]  }
 0x29b   :  { %6781 = vmatprep.subr.bf16.mxu0 %v7745_v31  ;;  %7142 = vmatprep.subr.bf16.mxu1 %v7746_v4  ;;  %v7755_v31 = vld [vmem:[%s9961_s5 + $0xa0] sm:$0xff]  }
 0x29c   :  { %v9169_v44 = vsel %vm5160_vm12, %v5177_v1, %v5180_v25  ;;  %v7762_v1 = vld [vmem:[%s9961_s5 + $0x308] sm:$0xff]   ;;  %v7764_v25 = vld [vmem:[%s9961_s5 + $0xb8] sm:$0xff]  }
 0x29d   :  { %6782 = vmatpush3.bf16.msra.mxu0 %v7747_v40  ;;  %v7761_v40 = vld [vmem:[%s9961_s5 + $0xb0] sm:$0xff]  }
 0x29e   :  { %7143 = vmatpush3.bf16.msra.mxu1 %v7746_v4  ;;  %6783 = vmatprep.subr.bf16.mxu0 %v7748_v58  ;;  %v7756_v4 = vld [vmem:[%s9961_s5 + $0x278] sm:$0xff]   ;;  %v7763_v58 = vld [vmem:[%s9961_s5 + $0x350] sm:$0xff]  }
 0x29f   :  { %7144 = vmatprep.subr.bf16.mxu1 %v7749_v26 }
 0x2a1   :  { %6784 = vmatpush3.bf16.msra.mxu0 %v7750_v15  ;;  %v7768_v15 = vld [vmem:[%s9961_s5 + $0x318] sm:$0xff]  }
 0x2a2   :  { %7145 = vmatpush3.bf16.msra.mxu1 %v7749_v26  ;;  %6785 = vmatprep.subr.bf16.mxu0 %v7751_v42  ;;  %v7767_v26 = vld [vmem:[%s9961_s5 + $0x200] sm:$0xff]   ;;  %v2375_v42 = vrot.slane %v8809_v59, 1 }
 0x2a3   :  { %7146 = vmatprep.subr.bf16.mxu1 %v7752_v29 }
 0x2a5   :  { %6786 = vmatpush3.bf16.msra.mxu0 %v7753_v16  ;;  %v7769_v16 = vld [vmem:[%s9961_s5 + $0x360] sm:$0xff]  }
 0x2a6   :  { %7147 = vmatpush3.bf16.msra.mxu1 %v7752_v29  ;;  %6787 = vmatprep.subr.bf16.mxu0 %v7754_v22  ;;  %v2374_v29 = vrot.slane %v8764_v7, 1  ;;  %v7771_v22 = vld [vmem:[%s9961_s5 + $0x320] sm:$0xff]   ;;  %v7772_v7 = vld [vmem:[%s9961_s5 + $0x368] sm:$0xff]  }
 0x2a7   :  { %7148 = vmatprep.subr.bf16.mxu1 %v7755_v31 }
 0x2a9   :  { %6788 = vmatpush3.bf16.msra.mxu0 %v7756_v4  ;;  %v7774_v4 = vld [vmem:[%s9961_s5 + $0x328] sm:$0xff]  }
 0x2aa   :  { %7149 = vmatpush3.bf16.msra.mxu1 %v7755_v31  ;;  %6811 = vmatprep.subr.bf16.mxu0 %v7757_v20  ;;  %v7773_v31 = vld [vmem:[%s9961_s5 + $0x210] sm:$0xff]  }
 0x2ab   :  { %7150 = vmatprep.subr.bf16.mxu1 %v7758_v63  ;;  %v7775_v20 = vld [vmem:[%s9961_s5 + $0x370] sm:$0xff]  }
 0x2ac   :  { %2877 = vmatmul.mubr.bf16.vlgmr.msra.gmra.mrb[48].mxu0 %v8899_v39  ;;  %v7766_v39 = vld [vmem:[%s9961_s5 + $0x358] sm:$0xff]  }
 0x2ad   :  { %2883 = vmatprep.mubr.bf16.mxu0 %v2683_v62  ;;  %6812 = vmatpush3.bf16.msra.mxu0 %v7759_v52  ;;  %v7765_v62 = vld [vmem:[%s9961_s5 + $0x310] sm:$0xff]  }
 0x2ae   :  { %7151 = vmatpush3.bf16.msra.mxu1 %v7758_v63  ;;  %6813 = vmatprep.subr.bf16.mxu0 %v7760_v33  ;;  %v7776_v63 = vld [vmem:[%s9961_s5 + $0x218] sm:$0xff]   ;;  %v7777_v52 = vld [vmem:[%s9961_s5 + $0x330] sm:$0xff]  }
 0x2af   :  { %7152 = vmatprep.subr.bf16.mxu1 %v7761_v40  ;;  %v7778_v33 = vld [vmem:[%s9961_s5 + $0x378] sm:$0xff]  }
 0x2b1   :  { %6814 = vmatpush3.bf16.msra.mxu0 %v7762_v1  ;;  %v7780_v1 = vld [vmem:[%s9961_s5 + $0x338] sm:$0xff]  }
 0x2b2   :  { %7153 = vmatpush3.bf16.msra.mxu1 %v7761_v40  ;;  %6815 = vmatprep.subr.bf16.mxu0 %v7763_v58  ;;  %v7779_v40 = vld [vmem:[%s9961_s5 + $0x220] sm:$0xff]  }
 0x2b3   :  { %7154 = vmatprep.subr.bf16.mxu1 %v7764_v25  ;;  %v7781_v58 = vld [vmem:[%s9961_s5 + $0x400] sm:$0xff]  }
 0x2b4   :  { %2884 = vmatmul.mubr.bf16.gmra.mrb[52].mxu0 %v2676_v12  ;;  %v7770_v12 = vld [vmem:[%s9961_s5 + $0x208] sm:$0xff]  }
 0x2b5   :  { %6816 = vmatpush3.bf16.msra.mxu0 %v7765_v62  ;;  %3181 = vmatprep.mubr.bf16.mxu0 %v8887_v32  ;;  %v2376_v32 = vsel %vm281_vm2, %v2374_v29, %v2375_v42  ;;  %v7783_v62 = vld [vmem:[%s9961_s5 + $0x3c0] sm:$0xff]   ;;  %v7787_v29 = vld [vmem:[%s9961_s5 + $0x410] sm:$0xff]  }
 0x2b6   :  { %7155 = vmatpush3.bf16.msra.mxu1 %v7764_v25  ;;  %6817 = vmatprep.subr.bf16.mxu0 %v7766_v39  ;;  %v7782_v25 = vld [vmem:[%s9961_s5 + $0x228] sm:$0xff]  }
 0x2b7   :  { %7160 = vmatprep.subr.bf16.mxu1 %v7767_v26  ;;  %v7784_v39 = vld [vmem:[%s9961_s5 + $0x408] sm:$0xff]  }
 0x2b9   :  { %7157 = vmatmul.mubr.bf16.vlgmr.msra.gmra.mrb[16].mxu1 %v8809_v59  ;;  %6818 = vmatpush3.bf16.msra.mxu0 %v7768_v15  ;;  %v7786_v15 = vld [vmem:[%s9961_s5 + $0x3c8] sm:$0xff]  }
 0x2ba   :  { %7161 = vmatpush3.bf16.msra.mxu1 %v7767_v26  ;;  %7176 = vmatprep.mubr.bf16.mxu1 %v2376_v32  ;;  %v7785_v26 = vld [vmem:[%s9961_s5 + $0x230] sm:$0xff]   ;;  %v7792_v32 = vld [vmem:[%s9961_s5 + $0x3d8] sm:$0xff]  }
 0x2bb   :  { %6819 = vmatprep.subr.bf16.mxu0 %v7769_v16  ;;  %7162 = vmatprep.subr.bf16.mxu1 %v7770_v12  ;;  %v7788_v16 = vld [vmem:[%s9961_s5 + $0x238] sm:$0xff]  }
 0x2bd   :  { %6820 = vmatpush3.bf16.msra.mxu0 %v7771_v22  ;;  %v7793_v22 = vld [vmem:[%s9961_s5 + $0x420] sm:$0xff]  }
 0x2be   :  { %7163 = vmatpush3.bf16.msra.mxu1 %v7770_v12  ;;  %6821 = vmatprep.subr.bf16.mxu0 %v7772_v7  ;;  %v7791_v12 = vld [vmem:[%s9961_s5 + $0x2c0] sm:$0xff]   ;;  %v7794_v7 = vld [vmem:[%s9961_s5 + $0x2c8] sm:$0xff]  }
 0x2bf   :  { %7164 = vmatprep.subr.bf16.mxu1 %v7773_v31 }
 0x2c1   :  { %6822 = vmatpush3.bf16.msra.mxu0 %v7774_v4  ;;  %v7800_v4 = vld [vmem:[%s9961_s5 + $0x2d8] sm:$0xff]  }
 0x2c2   :  { %7165 = vmatpush3.bf16.msra.mxu1 %v7773_v31  ;;  %6823 = vmatprep.subr.bf16.mxu0 %v7775_v20  ;;  %v7797_v31 = vld [vmem:[%s9961_s5 + $0x2d0] sm:$0xff]  }
 0x2c3   :  { %7166 = vmatprep.subr.bf16.mxu1 %v7776_v63  ;;  %v7801_v20 = vld [vmem:[%s9961_s5 + $0x3f0] sm:$0xff]  }
 0x2c5   :  { %6824 = vmatpush3.bf16.msra.mxu0 %v7777_v52  ;;  %v7803_v52 = vld [vmem:[%s9961_s5 + $0x2e0] sm:$0xff]  }
 0x2c6   :  { %7167 = vmatpush3.bf16.msra.mxu1 %v7776_v63  ;;  %6825 = vmatprep.subr.bf16.mxu0 %v7778_v33  ;;  %v7802_v63 = vld [vmem:[%s9961_s5 + $0x438] sm:$0xff]  }
 0x2c7   :  { %7168 = vmatprep.subr.bf16.mxu1 %v7779_v40  ;;  %v7804_v33 = vld [vmem:[%s9961_s5 + $0x3f8] sm:$0xff]  }
 0x2c9   :  { %6826 = vmatpush3.bf16.msra.mxu0 %v7780_v1  ;;  %v7806_v1 = vld [vmem:[%s9961_s5 + $0x2e8] sm:$0xff]  }
 0x2ca   :  { %7169 = vmatpush3.bf16.msra.mxu1 %v7779_v40  ;;  %6849 = vmatprep.subr.bf16.mxu0 %v7781_v58  ;;  %v7805_v40 = vld [vmem:[%s9961_s5 + $0x4c0] sm:$0xff]  }
 0x2cb   :  { %7170 = vmatprep.subr.bf16.mxu1 %v7782_v25  ;;  %v7807_v58 = vld [vmem:[%s9961_s5 + $0x480] sm:$0xff]  }
 0x2cc   :  { %3182 = vmatmul.mubr.bf16.vlgmr.msra.gmra.mrb[56].mxu0 %v8904_v43  ;;  %v7790_v43 = vld [vmem:[%s9961_s5 + $0x418] sm:$0xff]  }
 0x2cd   :  { %3188 = vmatprep.mubr.bf16.mxu0 %v2994_v18  ;;  %6850 = vmatpush3.bf16.msra.mxu0 %v7783_v62  ;;  %v7789_v18 = vld [vmem:[%s9961_s5 + $0x3d0] sm:$0xff]  }
 0x2ce   :  { %7171 = vmatpush3.bf16.msra.mxu1 %v7782_v25  ;;  %6851 = vmatprep.subr.bf16.mxu0 %v7784_v39  ;;  %v7808_v25 = vld [vmem:[%s9961_s5 + $0x4c8] sm:$0xff]   ;;  %v7809_v62 = vld [vmem:[%s9961_s5 + $0x2f0] sm:$0xff]  }
 0x2cf   :  { %7172 = vmatprep.subr.bf16.mxu1 %v7785_v26  ;;  %v7810_v39 = vld [vmem:[%s9961_s5 + $0x488] sm:$0xff]  }
 0x2d1   :  { %6852 = vmatpush3.bf16.msra.mxu0 %v7786_v15  ;;  %v7812_v15 = vld [vmem:[%s9961_s5 + $0x2f8] sm:$0xff]  }
 0x2d2   :  { %7173 = vmatpush3.bf16.msra.mxu1 %v7785_v26  ;;  %6853 = vmatprep.subr.bf16.mxu0 %v7787_v29  ;;  %v7811_v26 = vld [vmem:[%s9961_s5 + $0x4d0] sm:$0xff]   ;;  %v7815_v29 = vld [vmem:[%s9961_s5 + $0x380] sm:$0xff]  }
 0x2d3   :  { %7174 = vmatprep.subr.bf16.mxu1 %v7788_v16 }
 0x2d4   :  { %3189 = vmatmul.mubr.bf16.gmra.mrb[60].mxu0 %v2991_v34  ;;  %v7795_v34 = vld [vmem:[%s9961_s5 + $0x3e0] sm:$0xff]  }
 0x2d5   :  { %6854 = vmatpush3.bf16.msra.mxu0 %v7789_v18  ;;  %3498 = vmatprep.mubr.bf16.mxu0 %v8930_v8  ;;  %v7796_v8 = vld [vmem:[%s9961_s5 + $0x428] sm:$0xff]   ;;  %v7817_v18 = vld [vmem:[%s9961_s5 + $0x4e0] sm:$0xff]  }
 0x2d6   :  { %7175 = vmatpush3.bf16.msra.mxu1 %v7788_v16  ;;  %6855 = vmatprep.subr.bf16.mxu0 %v7790_v43  ;;  %v7816_v16 = vld [vmem:[%s9961_s5 + $0x498] sm:$0xff]   ;;  %v7818_v43 = vld [vmem:[%s9961_s5 + $0x388] sm:$0xff]  }
 0x2d7   :  { %7180 = vmatprep.subr.bf16.mxu1 %v7791_v12 }
 0x2d9   :  { %7177 = vmatmul.mubr.bf16.vlgmr.msra.gmra.mrb[16].mxu1 %v2375_v42  ;;  %6856 = vmatpush3.bf16.msra.mxu0 %v7792_v32  ;;  %v7798_v42 = vld [vmem:[%s9961_s5 + $0x3e8] sm:$0xff]   ;;  %v7824_v32 = vld [vmem:[%s9961_s5 + $0x398] sm:$0xff]  }
 0x2da   :  { %7181 = vmatpush3.bf16.msra.mxu1 %v7791_v12  ;;  %7196 = vmatprep.mubr.bf16.mxu1 %v8939_v14  ;;  %v7799_v14 = vld [vmem:[%s9961_s5 + $0x430] sm:$0xff]  }
 0x2db   :  { %6857 = vmatprep.subr.bf16.mxu0 %v7793_v22  ;;  %7182 = vmatprep.subr.bf16.mxu1 %v7794_v7  ;;  %v7821_v12 = vld [vmem:[%s9961_s5 + $0x390] sm:$0xff]  }
 0x2dc   :  { %v7825_v22 = vld [vmem:[%s9961_s5 + $0x4b0] sm:$0xff]  }
 0x2dd   :  { %6858 = vmatpush3.bf16.msra.mxu0 %v7795_v34  ;;  %v7827_v34 = vld [vmem:[%s9961_s5 + $0x3a0] sm:$0xff]  }
 0x2de   :  { %7183 = vmatpush3.bf16.msra.mxu1 %v7794_v7  ;;  %6859 = vmatprep.subr.bf16.mxu0 %v7796_v8  ;;  %v7826_v7 = vld [vmem:[%s9961_s5 + $0x4f8] sm:$0xff]  }
 0x2df   :  { %7184 = vmatprep.subr.bf16.mxu1 %v7797_v31  ;;  %v7828_v8 = vld [vmem:[%s9961_s5 + $0x4b8] sm:$0xff]  }
 0x2e1   :  { %6860 = vmatpush3.bf16.msra.mxu0 %v7798_v42  ;;  %v7830_v42 = vld [vmem:[%s9961_s5 + $0x3a8] sm:$0xff]  }
 0x2e2   :  { %7185 = vmatpush3.bf16.msra.mxu1 %v7797_v31  ;;  %6861 = vmatprep.subr.bf16.mxu0 %v7799_v14  ;;  %v7829_v31 = vld [vmem:[%s9961_s5 + $0x580] sm:$0xff]  }
 0x2e3   :  { %7186 = vmatprep.subr.bf16.mxu1 %v7800_v4  ;;  %v7831_v14 = vld [vmem:[%s9961_s5 + $0x540] sm:$0xff]  }
 0x2e5   :  { %6862 = vmatpush3.bf16.msra.mxu0 %v7801_v20  ;;  %v7833_v20 = vld [vmem:[%s9961_s5 + $0x3b0] sm:$0xff]  }
 0x2e6   :  { %7187 = vmatpush3.bf16.msra.mxu1 %v7800_v4  ;;  %6863 = vmatprep.subr.bf16.mxu0 %v7802_v63  ;;  %v7832_v4 = vld [vmem:[%s9961_s5 + $0x588] sm:$0xff]  }
 0x2e7   :  { %7188 = vmatprep.subr.bf16.mxu1 %v7803_v52  ;;  %v7834_v63 = vld [vmem:[%s9961_s5 + $0x548] sm:$0xff]  }
 0x2e9   :  { %6864 = vmatpush3.bf16.msra.mxu0 %v7804_v33  ;;  %v7836_v33 = vld [vmem:[%s9961_s5 + $0x3b8] sm:$0xff]  }
 0x2ea   :  { %7189 = vmatpush3.bf16.msra.mxu1 %v7803_v52  ;;  %6887 = vmatprep.subr.bf16.mxu0 %v7805_v40  ;;  %v7835_v52 = vld [vmem:[%s9961_s5 + $0x590] sm:$0xff]   ;;  %v7839_v40 = vld [vmem:[%s9961_s5 + $0x440] sm:$0xff]  }
 0x2eb   :  { %7190 = vmatprep.subr.bf16.mxu1 %v7806_v1 }
 0x2ec   :  { %3499 = vmatmul.mubr.bf16.vlgmr.msra.gmra.mrb[64].mxu0 %v8960_v35  ;;  %v7814_v35 = vld [vmem:[%s9961_s5 + $0x4d8] sm:$0xff]  }
 0x2ed   :  { %3505 = vmatprep.mubr.bf16.mxu0 %v3305_v38  ;;  %6888 = vmatpush3.bf16.msra.mxu0 %v7807_v58  ;;  %v7813_v38 = vld [vmem:[%s9961_s5 + $0x490] sm:$0xff]   ;;  %v7841_v58 = vld [vmem:[%s9961_s5 + $0x5a0] sm:$0xff]  }
 0x2ee   :  { %7191 = vmatpush3.bf16.msra.mxu1 %v7806_v1  ;;  %6889 = vmatprep.subr.bf16.mxu0 %v7808_v25  ;;  %v7840_v1 = vld [vmem:[%s9961_s5 + $0x558] sm:$0xff]   ;;  %v7842_v25 = vld [vmem:[%s9961_s5 + $0x448] sm:$0xff]  }
 0x2ef   :  { %7192 = vmatprep.subr.bf16.mxu1 %v7809_v62 }
 0x2f1   :  { %6890 = vmatpush3.bf16.msra.mxu0 %v7810_v39  ;;  %v7845_v39 = vld [vmem:[%s9961_s5 + $0x450] sm:$0xff]  }
 0x2f2   :  { %7193 = vmatpush3.bf16.msra.mxu1 %v7809_v62  ;;  %6891 = vmatprep.subr.bf16.mxu0 %v7811_v26  ;;  %v7844_v62 = vld [vmem:[%s9961_s5 + $0x5a8] sm:$0xff]  }
 0x2f3   :  { %7194 = vmatprep.subr.bf16.mxu1 %v7812_v15  ;;  %v7846_v26 = vld [vmem:[%s9961_s5 + $0x568] sm:$0xff]  }
 0x2f4   :  { %3506 = vmatmul.mubr.bf16.gmra.mrb[68].mxu0 %v3298_v27  ;;  %v7819_v27 = vld [vmem:[%s9961_s5 + $0x4a0] sm:$0xff]  }
 0x2f5   :  { %6892 = vmatpush3.bf16.msra.mxu0 %v7813_v38  ;;  %3803 = vmatprep.mubr.bf16.mxu0 %v8951_v28  ;;  %v7820_v28 = vld [vmem:[%s9961_s5 + $0x4e8] sm:$0xff]   ;;  %v7849_v38 = vld [vmem:[%s9961_s5 + $0x570] sm:$0xff]  }
 0x2f6   :  { %7195 = vmatpush3.bf16.msra.mxu1 %v7812_v15  ;;  %6893 = vmatprep.subr.bf16.mxu0 %v7814_v35  ;;  %v7848_v15 = vld [vmem:[%s9961_s5 + $0x458] sm:$0xff]  }
 0x2f7   :  { %7200 = vmatprep.subr.bf16.mxu1 %v7815_v29  ;;  %v7850_v35 = vld [vmem:[%s9961_s5 + $0x5b8] sm:$0xff]  }
 0x2f9   :  { %7197 = vmatmul.mubr.bf16.vlgmr.msra.gmra.mrb[16].mxu1 %v2690_v49  ;;  %6894 = vmatpush3.bf16.msra.mxu0 %v7816_v16  ;;  %v7822_v49 = vld [vmem:[%s9961_s5 + $0x4a8] sm:$0xff]   ;;  %v7852_v16 = vld [vmem:[%s9961_s5 + $0x578] sm:$0xff]  }
 0x2fa   :  { %7201 = vmatpush3.bf16.msra.mxu1 %v7815_v29  ;;  %7216 = vmatprep.mubr.bf16.mxu1 %v8965_v37  ;;  %v7823_v37 = vld [vmem:[%s9961_s5 + $0x4f0] sm:$0xff]   ;;  %v7851_v29 = vld [vmem:[%s9961_s5 + $0x460] sm:$0xff]  }
 0x2fb   :  { %6895 = vmatprep.subr.bf16.mxu0 %v7817_v18  ;;  %7202 = vmatprep.subr.bf16.mxu1 %v7818_v43  ;;  %v7853_v18 = vld [vmem:[%s9961_s5 + $0x640] sm:$0xff]  }
 0x2fd   :  { %6896 = vmatpush3.bf16.msra.mxu0 %v7819_v27  ;;  %v7855_v27 = vld [vmem:[%s9961_s5 + $0x600] sm:$0xff]  }
 0x2fe   :  { %7203 = vmatpush3.bf16.msra.mxu1 %v7818_v43  ;;  %6897 = vmatprep.subr.bf16.mxu0 %v7820_v28  ;;  %v7854_v43 = vld [vmem:[%s9961_s5 + $0x468] sm:$0xff]  }
 0x2ff   :  { %7204 = vmatprep.subr.bf16.mxu1 %v7821_v12  ;;  %v7856_v28 = vld [vmem:[%s9961_s5 + $0x648] sm:$0xff]  }
 0x301   :  { %6898 = vmatpush3.bf16.msra.mxu0 %v7822_v49  ;;  %v9979_v49 = vrot.slane %v8825_v54, 3 }
 0x302   :  { %7205 = vmatpush3.bf16.msra.mxu1 %v7821_v12  ;;  %6899 = vmatprep.subr.bf16.mxu0 %v7823_v37  ;;  %v7857_v12 = vld [vmem:[%s9961_s5 + $0x470] sm:$0xff]   ;;  %v7858_v37 = vld [vmem:[%s9961_s5 + $0x608] sm:$0xff]  }
 0x303   :  { %7206 = vmatprep.subr.bf16.mxu1 %v7824_v32 }
 0x305   :  { %6900 = vmatpush3.bf16.msra.mxu0 %v7825_v22  ;;  %v7860_v22 = vld [vmem:[%s9961_s5 + $0x478] sm:$0xff]  }
 0x306   :  { %7207 = vmatpush3.bf16.msra.mxu1 %v7824_v32  ;;  %6901 = vmatprep.subr.bf16.mxu0 %v7826_v7  ;;  %v7859_v32 = vld [vmem:[%s9961_s5 + $0x650] sm:$0xff]   ;;  %v7862_v7 = vld [vmem:[%s9961_s5 + $0x658] sm:$0xff]  }
 0x307   :  { %7208 = vmatprep.subr.bf16.mxu1 %v7827_v34 }
 0x309   :  { %6902 = vmatpush3.bf16.msra.mxu0 %v7828_v8  ;;  %v9980_v8 = vrot.slane %v8828_v55, 3 }
 0x30a   :  { %7209 = vmatpush3.bf16.msra.mxu1 %v7827_v34  ;;  %6925 = vmatprep.subr.bf16.mxu0 %v7829_v31  ;;  %v7863_v34 = vld [vmem:[%s9961_s5 + $0x500] sm:$0xff]   ;;  %v7864_v31 = vld [vmem:[%s9961_s5 + $0x618] sm:$0xff]  }
 0x30b   :  { %7210 = vmatprep.subr.bf16.mxu1 %v7830_v42 }
 0x30c   :  { %3804 = vmatmul.mubr.bf16.vlgmr.msra.gmra.mrb[72].mxu0 %v8972_v48  ;;  %v7838_v48 = vld [vmem:[%s9961_s5 + $0x598] sm:$0xff]  }
 0x30d   :  { %3810 = vmatprep.mubr.bf16.mxu0 %v3616_v10  ;;  %6926 = vmatpush3.bf16.msra.mxu0 %v7831_v14  ;;  %v7837_v10 = vld [vmem:[%s9961_s5 + $0x550] sm:$0xff]   ;;  %v7866_v14 = vld [vmem:[%s9961_s5 + $0x508] sm:$0xff]  }
 0x30e   :  { %7211 = vmatpush3.bf16.msra.mxu1 %v7830_v42  ;;  %6927 = vmatprep.subr.bf16.mxu0 %v7832_v4  ;;  %v7865_v42 = vld [vmem:[%s9961_s5 + $0x660] sm:$0xff]   ;;  %v9981_v4 = vrot.slane %v8875_v23, 2 }
 0x30f   :  { %7212 = vmatprep.subr.bf16.mxu1 %v7833_v20 }
 0x311   :  { %6928 = vmatpush3.bf16.msra.mxu0 %v7834_v63  ;;  %v7869_v63 = vld [vmem:[%s9961_s5 + $0x510] sm:$0xff]  }
 0x312   :  { %7213 = vmatpush3.bf16.msra.mxu1 %v7833_v20  ;;  %6929 = vmatprep.subr.bf16.mxu0 %v7835_v52  ;;  %v7868_v20 = vld [vmem:[%s9961_s5 + $0x668] sm:$0xff]  }
 0x313   :  { %7214 = vmatprep.subr.bf16.mxu1 %v7836_v33  ;;  %v7870_v52 = vld [vmem:[%s9961_s5 + $0x628] sm:$0xff]  }
 0x314   :  { %3811 = vmatmul.mubr.bf16.gmra.mrb[76].mxu0 %v3613_v30  ;;  %v9978_v30 = vrot.slane %v8809_v59, 2 }
 0x315   :  { %6930 = vmatpush3.bf16.msra.mxu0 %v7837_v10  ;;  %4120 = vmatprep.mubr.bf16.mxu0 %v8994_v0  ;;  %v7843_v0 = vld [vmem:[%s9961_s5 + $0x560] sm:$0xff]   ;;  %v7872_v10 = vld [vmem:[%s9961_s5 + $0x518] sm:$0xff]  }
 0x316   :  { %7215 = vmatpush3.bf16.msra.mxu1 %v7836_v33  ;;  %6931 = vmatprep.subr.bf16.mxu0 %v7838_v48 }
 0x317   :  { %7220 = vmatprep.subr.bf16.mxu1 %v7839_v40 }
 0x319   :  { %7217 = vmatmul.mubr.bf16.vlgmr.msra.gmra.mrb[16].mxu1 %v9978_v30  ;;  %6932 = vmatpush3.bf16.msra.mxu0 %v7840_v1  ;;  %v7874_v30 = vld [vmem:[%s9961_s5 + $0x678] sm:$0xff]  }
 0x31a   :  { %7221 = vmatpush3.bf16.msra.mxu1 %v7839_v40  ;;  %7236 = vmatprep.mubr.bf16.mxu1 %v9008_v51  ;;  %v7847_v51 = vld [vmem:[%s9961_s5 + $0x5b0] sm:$0xff]  }
 0x31b   :  { %6933 = vmatprep.subr.bf16.mxu0 %v7841_v58  ;;  %7222 = vmatprep.subr.bf16.mxu1 %v7842_v25  ;;  %v7873_v58 = vld [vmem:[%s9961_s5 + $0x630] sm:$0xff]  }
 0x31d   :  { %6934 = vmatpush3.bf16.msra.mxu0 %v7843_v0  ;;  %v7875_v0 = vld [vmem:[%s9961_s5 + $0x520] sm:$0xff]  }
 0x31e   :  { %7223 = vmatpush3.bf16.msra.mxu1 %v7842_v25  ;;  %6935 = vmatprep.subr.bf16.mxu0 %v7844_v62  ;;  %v7876_v62 = vld [vmem:[%s9961_s5 + $0x638] sm:$0xff]  }
 0x31f   :  { %7224 = vmatprep.subr.bf16.mxu1 %v7845_v39 }
 0x321   :  { %6936 = vmatpush3.bf16.msra.mxu0 %v7846_v26 }
 0x322   :  { %7225 = vmatpush3.bf16.msra.mxu1 %v7845_v39  ;;  %6937 = vmatprep.subr.bf16.mxu0 %v7847_v51  ;;  %v7877_v39 = vld [vmem:[%s9961_s5 + $0x700] sm:$0xff]   ;;  %v7878_v51 = vld [vmem:[%s9961_s5 + $0x528] sm:$0xff]  }
 0x323   :  { %7226 = vmatprep.subr.bf16.mxu1 %v7848_v15 }
 0x325   :  { %6938 = vmatpush3.bf16.msra.mxu0 %v7849_v38 }
 0x326   :  { %7227 = vmatpush3.bf16.msra.mxu1 %v7848_v15  ;;  %6939 = vmatprep.subr.bf16.mxu0 %v7850_v35 }
 0x327   :  { %7228 = vmatprep.subr.bf16.mxu1 %v7851_v29 }
 0x329   :  { %6940 = vmatpush3.bf16.msra.mxu0 %v7852_v16 }
 0x32a   :  { %7229 = vmatpush3.bf16.msra.mxu1 %v7851_v29  ;;  %6963 = vmatprep.subr.bf16.mxu0 %v7853_v18  ;;  %v7879_v29 = vld [vmem:[%s9961_s5 + $0x6c0] sm:$0xff]   ;;  %v7880_v18 = vld [vmem:[%s9961_s5 + $0x708] sm:$0xff]  }
 0x32b   :  { %7230 = vmatprep.subr.bf16.mxu1 %v7854_v43 }
 0x32c   :  { %4121 = vmatmul.mubr.bf16.vlgmr.msra.gmra.mrb[80].mxu0 %v9021_v60  ;;  %v7861_v60 = vld [vmem:[%s9961_s5 + $0x610] sm:$0xff]  }
 0x32d   :  { %4127 = vmatprep.mubr.bf16.mxu0 %v9979_v49  ;;  %6964 = vmatpush3.bf16.msra.mxu0 %v7855_v27  ;;  %v7882_v49 = vld [vmem:[%s9961_s5 + $0x6c8] sm:$0xff]  }
 0x32e   :  { %7231 = vmatpush3.bf16.msra.mxu1 %v7854_v43  ;;  %6965 = vmatprep.subr.bf16.mxu0 %v7856_v28  ;;  %v7881_v43 = vld [vmem:[%s9961_s5 + $0x530] sm:$0xff]   ;;  %v9982_v28 = vrot.slane %v8801_v46, 4 }
 0x32f   :  { %7232 = vmatprep.subr.bf16.mxu1 %v7857_v12  ;;  %v7933_v46 = vld [vmem:[%s9961_s5 + $0x850] sm:$0xff]  }
 0x331   :  { %6966 = vmatpush3.bf16.msra.mxu0 %v7858_v37 }
 0x332   :  { %7233 = vmatpush3.bf16.msra.mxu1 %v7857_v12  ;;  %6967 = vmatprep.subr.bf16.mxu0 %v7859_v32 }
 0x333   :  { %7234 = vmatprep.subr.bf16.mxu1 %v7860_v22 }
 0x334   :  { %4128 = vmatmul.mubr.bf16.gmra.mrb[84].mxu0 %v9980_v8  ;;  %v7886_v8 = vld [vmem:[%s9961_s5 + $0x718] sm:$0xff]  }
 0x335   :  { %6968 = vmatpush3.bf16.msra.mxu0 %v7861_v60  ;;  %4425 = vmatprep.mubr.bf16.mxu0 %v9013_v57  ;;  %v7867_v57 = vld [vmem:[%s9961_s5 + $0x620] sm:$0xff]  }
 0x336   :  { %7235 = vmatpush3.bf16.msra.mxu1 %v7860_v22  ;;  %6969 = vmatprep.subr.bf16.mxu0 %v7862_v7  ;;  %v7883_v22 = vld [vmem:[%s9961_s5 + $0x710] sm:$0xff]  }
 0x337   :  { %7240 = vmatprep.subr.bf16.mxu1 %v7863_v34 }
 0x339   :  { %7237 = vmatmul.mubr.bf16.vlgmr.msra.gmra.mrb[16].mxu1 %v9981_v4  ;;  %6970 = vmatpush3.bf16.msra.mxu0 %v7864_v31  ;;  %v7887_v31 = vld [vmem:[%s9961_s5 + $0x5c0] sm:$0xff]  }
 0x33a   :  { %7241 = vmatpush3.bf16.msra.mxu1 %v7863_v34  ;;  %7256 = vmatprep.mubr.bf16.mxu1 %v9026_v6  ;;  %v7871_v6 = vld [vmem:[%s9961_s5 + $0x670] sm:$0xff]  }
 0x33b   :  { %6971 = vmatprep.subr.bf16.mxu0 %v7865_v42  ;;  %7242 = vmatprep.subr.bf16.mxu1 %v7866_v14  ;;  %v7885_v34 = vld [vmem:[%s9961_s5 + $0x6d0] sm:$0xff]   ;;  %v9983_v42 = vrot.slane %v8795_v41, 4  ;;  %v9987_v41 = vrot.slane %v8809_v59, 4 }
 0x33d   :  { %6972 = vmatpush3.bf16.msra.mxu0 %v7867_v57  ;;  %v7888_v57 = vld [vmem:[%s9961_s5 + $0x6d8] sm:$0xff]  }
 0x33e   :  { %7243 = vmatpush3.bf16.msra.mxu1 %v7866_v14  ;;  %6973 = vmatprep.subr.bf16.mxu0 %v7868_v20 }
 0x33f   :  { %v6713_v33 = vpop.f32.mrb[32].mxu0  ;;  %7244 = vmatprep.subr.bf16.mxu1 %v7869_v63 }
 0x340   :  { %v6714_v48 = vpop.f32.mrb[33].mxu0 }
 0x341   :  { %v6715_v40 = vadd.f32 %v6714_v48, %v6713_v33  ;;  %6974 = vmatpush3.bf16.msra.mxu0 %v7870_v52  ;;  %v6716_v1 = vpop.f32.mrb[34].mxu0  ;;  %v7890_v33 = vld [vmem:[%s9961_s5 + $0x5c8] sm:$0xff]   ;;  %v7891_v48 = vld [vmem:[%s9961_s5 + $0x6e0] sm:$0xff]  }
 0x342   :  { %7245 = vmatpush3.bf16.msra.mxu1 %v7869_v63  ;;  %v6717_v25 = vpop.f32.mrb[35].mxu0  ;;  %6975 = vmatprep.subr.bf16.mxu0 %v7871_v6  ;;  %v7889_v6 = vld [vmem:[%s9961_s5 + $0x720] sm:$0xff]   ;;  %v7893_v1 = vld [vmem:[%s9961_s5 + $0x5d0] sm:$0xff]  }
 0x343   :  { %7246 = vmatprep.subr.bf16.mxu1 %v7872_v10 }
 0x345   :  { %6976 = vmatpush3.bf16.msra.mxu0 %v7873_v58  ;;  %v7894_v58 = vld [vmem:[%s9961_s5 + $0x6e8] sm:$0xff]  }
 0x346   :  { %7247 = vmatpush3.bf16.msra.mxu1 %v7872_v10  ;;  %6977 = vmatprep.subr.bf16.mxu0 %v7874_v30  ;;  %v9984_v10 = vrot.slane %v8809_v59, 3  ;;  %v7896_v30 = vld [vmem:[%s9961_s5 + $0x5d8] sm:$0xff]  }
 0x347   :  { %v6719_v26 = vpop.f32.mrb[36].mxu0  ;;  %7248 = vmatprep.subr.bf16.mxu1 %v7875_v0 }
 0x348   :  { %v6720_v15 = vpop.f32.mrb[37].mxu0 }
 0x349   :  { %v6721_v38 = vadd.f32 %v6720_v15, %v6719_v26  ;;  %6978 = vmatpush3.bf16.msra.mxu0 %v7876_v62  ;;  %v6722_v35 = vpop.f32.mrb[38].mxu0  ;;  %v7897_v26 = vld [vmem:[%s9961_s5 + $0x6f0] sm:$0xff]   ;;  %v7898_v15 = vld [vmem:[%s9961_s5 + $0x738] sm:$0xff]  }
 0x34a   :  { %7249 = vmatpush3.bf16.msra.mxu1 %v7875_v0  ;;  %v6723_v16 = vpop.f32.mrb[39].mxu0  ;;  %7001 = vmatprep.subr.bf16.mxu0 %v7877_v39  ;;  %v7899_v35 = vld [vmem:[%s9961_s5 + $0x5e0] sm:$0xff]  }
 0x34b   :  { %7250 = vmatprep.subr.bf16.mxu1 %v7878_v51  ;;  %v7901_v16 = vld [vmem:[%s9961_s5 + $0x7c0] sm:$0xff]  }
 0x34c   :  { %4426 = vmatmul.mubr.bf16.vlgmr.msra.gmra.mrb[88].mxu0 %v9036_v5  ;;  %v6675_v27 = vpop.f32.mrb[8].mxu1  ;;  %v7884_v5 = vld [vmem:[%s9961_s5 + $0x538] sm:$0xff]  }
 0x34d   :  { %4432 = vmatprep.mubr.bf16.mxu0 %v9982_v28  ;;  %7002 = vmatpush3.bf16.msra.mxu0 %v7879_v29  ;;  %v6676_v12 = vpop.f32.mrb[9].mxu1  ;;  %v7900_v29 = vld [vmem:[%s9961_s5 + $0x6f8] sm:$0xff]  }
 0x34e   :  { %v6677_v37 = vadd.f32 %v6676_v12, %v6675_v27  ;;  %7251 = vmatpush3.bf16.msra.mxu1 %v7878_v51  ;;  %v6678_v32 = vpop.f32.mrb[10].mxu1  ;;  %7003 = vmatprep.subr.bf16.mxu0 %v7880_v18 }
 0x34f   :  { %v6679_v60 = vpop.f32.mrb[11].mxu1  ;;  %7252 = vmatprep.subr.bf16.mxu1 %v7881_v43  ;;  %v7904_v32 = vld [vmem:[%s9961_s5 + $0x7c8] sm:$0xff]  }
 0x350   :  { %v7384_v7 = vadd.f32 %v6715_v40, %v6677_v37  ;;  %v7892_v40 = vld [vmem:[%s9961_s5 + $0x728] sm:$0xff]   ;;  %v7905_v60 = vld [vmem:[%s9961_s5 + $0x5f0] sm:$0xff]  }
 0x351   :  { %7004 = vmatpush3.bf16.msra.mxu0 %v7882_v49  ;;  %v7903_v49 = vld [vmem:[%s9961_s5 + $0x780] sm:$0xff]  }
 0x352   :  { %7253 = vmatpush3.bf16.msra.mxu1 %v7881_v43  ;;  %7005 = vmatprep.subr.bf16.mxu0 %v7883_v22  ;;  %v7902_v43 = vld [vmem:[%s9961_s5 + $0x5e8] sm:$0xff]  }
 0x353   :  { %7254 = vmatprep.subr.bf16.mxu1 %v7884_v5 }
 0x354   :  { %4433 = vmatmul.mubr.bf16.gmra.mrb[92].mxu0 %v9983_v42  ;;  %v6681_v14 = vpop.f32.mrb[12].mxu1  ;;  %v7911_v42 = vld [vmem:[%s9961_s5 + $0x680] sm:$0xff]  }
 0x355   :  { %7006 = vmatpush3.bf16.msra.mxu0 %v7885_v34  ;;  %4742 = vmatprep.mubr.bf16.mxu0 %v9066_v13  ;;  %v6682_v4 = vpop.f32.mrb[13].mxu1  ;;  %v7907_v34 = vld [vmem:[%s9961_s5 + $0x7d0] sm:$0xff]  }
 0x356   :  { %v6683_v20 = vadd.f32 %v6682_v4, %v6681_v14  ;;  %7255 = vmatpush3.bf16.msra.mxu1 %v7884_v5  ;;  %v6684_v63 = vpop.f32.mrb[14].mxu1  ;;  %7007 = vmatprep.subr.bf16.mxu0 %v7886_v8  ;;  %v9985_v5 = vrot.slane %v8825_v54, 4  ;;  %v7908_v8 = vld [vmem:[%s9961_s5 + $0x5f8] sm:$0xff]   ;;  %v7913_v4 = vld [vmem:[%s9961_s5 + $0x7e0] sm:$0xff]  }
 0x357   :  { %v6685_v52 = vpop.f32.mrb[15].mxu1  ;;  %7260 = vmatprep.subr.bf16.mxu1 %v7887_v31  ;;  %v7912_v14 = vld [vmem:[%s9961_s5 + $0x798] sm:$0xff]   ;;  %v7917_v63 = vld [vmem:[%s9961_s5 + $0x690] sm:$0xff]  }
 0x358   :  { %v7372_v13 = vadd.f32 %v6721_v38, %v6683_v20  ;;  %v7916_v20 = vld [vmem:[%s9961_s5 + $0x7e8] sm:$0xff]  }
 0x359   :  { %7257 = vmatmul.mubr.bf16.vlgmr.msra.gmra.mrb[16].mxu1 %v9984_v10  ;;  %7008 = vmatpush3.bf16.msra.mxu0 %v7888_v57  ;;  %v7914_v57 = vld [vmem:[%s9961_s5 + $0x688] sm:$0xff]  }
 0x35a   :  { %7261 = vmatpush3.bf16.msra.mxu1 %v7887_v31  ;;  %7276 = vmatprep.mubr.bf16.mxu1 %v9071_v36  ;;  %v7895_v36 = vld [vmem:[%s9961_s5 + $0x730] sm:$0xff]   ;;  %v7910_v31 = vld [vmem:[%s9961_s5 + $0x7d8] sm:$0xff]   ;;  %v7918_v52 = vld [vmem:[%s9961_s5 + $0x7a8] sm:$0xff]  }
 0x35b   :  { %7009 = vmatprep.subr.bf16.mxu0 %v7889_v6  ;;  %7262 = vmatprep.subr.bf16.mxu1 %v7890_v33 }
 0x35d   :  { %7010 = vmatpush3.bf16.msra.mxu0 %v7891_v48 }
 0x35e   :  { %7263 = vmatpush3.bf16.msra.mxu1 %v7890_v33  ;;  %7011 = vmatprep.subr.bf16.mxu0 %v7892_v40  ;;  %v7920_v33 = vld [vmem:[%s9961_s5 + $0x698] sm:$0xff]   ;;  %v7921_v40 = vld [vmem:[%s9961_s5 + $0x7b0] sm:$0xff]  }
 0x35f   :  { %v6751_v25 = vpop.f32.mrb[40].mxu0  ;;  %7264 = vmatprep.subr.bf16.mxu1 %v7893_v1 }
 0x360   :  { %v6752_v0 = vpop.f32.mrb[41].mxu0 }
 0x361   :  { %v6753_v62 = vadd.f32 %v6752_v0, %v6751_v25  ;;  %v6754_v39 = vpop.f32.mrb[42].mxu0  ;;  %7012 = vmatpush3.bf16.msra.mxu0 %v7894_v58  ;;  %v7922_v58 = vld [vmem:[%s9961_s5 + $0x7f8] sm:$0xff]   ;;  %v7923_v25 = vld [vmem:[%s9961_s5 + $0x6a0] sm:$0xff]  }
 0x362   :  { %v6755_v51 = vpop.f32.mrb[43].mxu0  ;;  %7265 = vmatpush3.bf16.msra.mxu1 %v7893_v1  ;;  %7013 = vmatprep.subr.bf16.mxu0 %v7895_v36  ;;  %v7925_v0 = vld [vmem:[%s9961_s5 + $0x880] sm:$0xff]   ;;  %v7926_v39 = vld [vmem:[%s9961_s5 + $0x6a8] sm:$0xff]  }
 0x363   :  { %v9675_v38 = vadd.f32 %v7384_v7, %v6753_v62  ;;  %7266 = vmatprep.subr.bf16.mxu1 %v7896_v30  ;;  %v7906_v7 = vld [vmem:[%s9961_s5 + $0x788] sm:$0xff]  }
 0x365   :  { %7014 = vmatpush3.bf16.msra.mxu0 %v7897_v26 }
 0x366   :  { %7267 = vmatpush3.bf16.msra.mxu1 %v7896_v30  ;;  %7015 = vmatprep.subr.bf16.mxu0 %v7898_v15  ;;  %v7924_v30 = vld [vmem:[%s9961_s5 + $0x7b8] sm:$0xff]  }
 0x367   :  { %v6757_v18 = vpop.f32.mrb[44].mxu0  ;;  %7268 = vmatprep.subr.bf16.mxu1 %v7899_v35 }
 0x368   :  { %v6758_v27 = vpop.f32.mrb[45].mxu0 }
 0x369   :  { %v6759_v28 = vadd.f32 %v6758_v27, %v6757_v18  ;;  %v6760_v12 = vpop.f32.mrb[46].mxu0  ;;  %7016 = vmatpush3.bf16.msra.mxu0 %v7900_v29  ;;  %v7928_v29 = vld [vmem:[%s9961_s5 + $0x888] sm:$0xff]   ;;  %v7929_v18 = vld [vmem:[%s9961_s5 + $0x6b0] sm:$0xff]  }
 0x36a   :  { %v6761_v37 = vpop.f32.mrb[47].mxu0  ;;  %7269 = vmatpush3.bf16.msra.mxu1 %v7899_v35  ;;  %7039 = vmatprep.subr.bf16.mxu0 %v7901_v16  ;;  %v7931_v27 = vld [vmem:[%s9961_s5 + $0x890] sm:$0xff]   ;;  %v7936_v12 = vld [vmem:[%s9961_s5 + $0x858] sm:$0xff]  }
 0x36b   :  { %v9695_v22 = vadd.f32 %v7372_v13, %v6759_v28  ;;  %7270 = vmatprep.subr.bf16.mxu1 %v7902_v43  ;;  %v7932_v28 = vld [vmem:[%s9961_s5 + $0x6b8] sm:$0xff]   ;;  %v7938_v37 = vld [vmem:[%s9961_s5 + $0x748] sm:$0xff]  }
 0x36c   :  { %4743 = vmatmul.mubr.bf16.vlgmr.msra.gmra.mrb[96].mxu0 %v9092_v61  ;;  %v7909_v61 = vld [vmem:[%s9961_s5 + $0x790] sm:$0xff]  }
 0x36d   :  { %4749 = vmatprep.mubr.bf16.mxu0 %v9985_v5  ;;  %7040 = vmatpush3.bf16.msra.mxu0 %v7903_v49  ;;  %v7937_v49 = vld [vmem:[%s9961_s5 + $0x8a0] sm:$0xff]   ;;  %v7944_v5 = vld [vmem:[%s9961_s5 + $0x758] sm:$0xff]  }
 0x36e   :  { %7271 = vmatpush3.bf16.msra.mxu1 %v7902_v43  ;;  %7041 = vmatprep.subr.bf16.mxu0 %v7904_v32  ;;  %v7930_v43 = vld [vmem:[%s9961_s5 + $0x848] sm:$0xff]   ;;  %v7941_v32 = vld [vmem:[%s9961_s5 + $0x750] sm:$0xff]  }
 0x36f   :  { %7272 = vmatprep.subr.bf16.mxu1 %v7905_v60 }
 0x371   :  { %7042 = vmatpush3.bf16.msra.mxu0 %v7906_v7 }
 0x372   :  { %7273 = vmatpush3.bf16.msra.mxu1 %v7905_v60  ;;  %7043 = vmatprep.subr.bf16.mxu0 %v7907_v34 }
 0x373   :  { %7274 = vmatprep.subr.bf16.mxu1 %v7908_v8 }
 0x374   :  { %4750 = vmatmul.mubr.bf16.gmra.mrb[100].mxu0 %v4542_v17  ;;  %v9986_v17 = vrot.slane %v8875_v23, 3 }
 0x375   :  { %7044 = vmatpush3.bf16.msra.mxu0 %v7909_v61  ;;  %5047 = vmatprep.mubr.bf16.mxu0 %v9083_v47  ;;  %v7915_v47 = vld [vmem:[%s9961_s5 + $0x7a0] sm:$0xff]   ;;  %v7945_v61 = vld [vmem:[%s9961_s5 + $0x870] sm:$0xff]  }
 0x376   :  { %7275 = vmatpush3.bf16.msra.mxu1 %v7908_v8  ;;  %7045 = vmatprep.subr.bf16.mxu0 %v7910_v31 }
 0x377   :  { %7280 = vmatprep.subr.bf16.mxu1 %v7911_v42 }
 0x379   :  { %7277 = vmatmul.mubr.bf16.vlgmr.msra.gmra.mrb[16].mxu1 %v9986_v17  ;;  %7046 = vmatpush3.bf16.msra.mxu0 %v7912_v14 }
 0x37a   :  { %7281 = vmatpush3.bf16.msra.mxu1 %v7911_v42  ;;  %7296 = vmatprep.mubr.bf16.mxu1 %v9097_v11  ;;  %v7919_v11 = vld [vmem:[%s9961_s5 + $0x7f0] sm:$0xff]   ;;  %v7946_v42 = vld [vmem:[%s9961_s5 + $0x8b8] sm:$0xff]  }
 0x37b   :  { %7047 = vmatprep.subr.bf16.mxu0 %v7913_v4  ;;  %7282 = vmatprep.subr.bf16.mxu1 %v7914_v57  ;;  %v7947_v4 = vld [vmem:[%s9961_s5 + $0x760] sm:$0xff]  }
 0x37d   :  { %7048 = vmatpush3.bf16.msra.mxu0 %v7915_v47  ;;  %v7949_v47 = vld [vmem:[%s9961_s5 + $0x768] sm:$0xff]  }
 0x37e   :  { %7283 = vmatpush3.bf16.msra.mxu1 %v7914_v57  ;;  %7049 = vmatprep.subr.bf16.mxu0 %v7916_v20  ;;  %v7948_v57 = vld [vmem:[%s9961_s5 + $0x878] sm:$0xff]  }
 0x37f   :  { %v6789_v6 = vpop.f32.mrb[48].mxu0  ;;  %7284 = vmatprep.subr.bf16.mxu1 %v7917_v63 }
 0x380   :  { %v6790_v13 = vpop.f32.mrb[49].mxu0 }
 0x381   :  { %v6791_v10 = vadd.f32 %v6790_v13, %v6789_v6  ;;  %v6792_v48 = vpop.f32.mrb[50].mxu0  ;;  %7050 = vmatpush3.bf16.msra.mxu0 %v7918_v52  ;;  %v9988_v13 = vrot.slane %v8825_v54, 5  ;;  %v7953_v54 = vld [vmem:[%s9961_s5 + $0x808] sm:$0xff]  }
 0x382   :  { %v6793_v1 = vpop.f32.mrb[51].mxu0  ;;  %7285 = vmatpush3.bf16.msra.mxu1 %v7917_v63  ;;  %7051 = vmatprep.subr.bf16.mxu0 %v7919_v11  ;;  %v7952_v48 = vld [vmem:[%s9961_s5 + $0x800] sm:$0xff]  }
 0x383   :  { %v9761_v36 = vadd.f32 %v9675_v38, %v6791_v10  ;;  %7286 = vmatprep.subr.bf16.mxu1 %v7920_v33  ;;  %v7927_v38 = vld [vmem:[%s9961_s5 + $0x840] sm:$0xff]   ;;  %v7951_v10 = vld [vmem:[%s9961_s5 + $0x778] sm:$0xff]  }
 0x385   :  { %7052 = vmatpush3.bf16.msra.mxu0 %v7921_v40  ;;  %v7954_v40 = vld [vmem:[%s9961_s5 + $0x810] sm:$0xff]  }
 0x386   :  { %7287 = vmatpush3.bf16.msra.mxu1 %v7920_v33  ;;  %7053 = vmatprep.subr.bf16.mxu0 %v7922_v58  ;;  %v7950_v33 = vld [vmem:[%s9961_s5 + $0x770] sm:$0xff]  }
 0x387   :  { %v6795_v62 = vpop.f32.mrb[52].mxu0  ;;  %7288 = vmatprep.subr.bf16.mxu1 %v7923_v25 }
 0x388   :  { %v6796_v26 = vpop.f32.mrb[53].mxu0 }
 0x389   :  { %v6797_v51 = vadd.f32 %v6796_v26, %v6795_v62  ;;  %v6798_v15 = vpop.f32.mrb[54].mxu0  ;;  %7054 = vmatpush3.bf16.msra.mxu0 %v7924_v30  ;;  %v7957_v62 = vld [vmem:[%s9961_s5 + $0x828] sm:$0xff]  }
 0x38a   :  { %v6799_v35 = vpop.f32.mrb[55].mxu0  ;;  %7289 = vmatpush3.bf16.msra.mxu1 %v7923_v25  ;;  %7077 = vmatprep.subr.bf16.mxu0 %v7925_v0 }
 0x38b   :  { %v9782_v16 = vadd.f32 %v9695_v22, %v6797_v51  ;;  %7290 = vmatprep.subr.bf16.mxu1 %v7926_v39  ;;  %v7942_v22 = vld [vmem:[%s9961_s5 + $0x868] sm:$0xff]   ;;  %v7958_v35 = vld [vmem:[%s9961_s5 + $0x830] sm:$0xff]  }
 0x38c   :  { %5048 = vmatmul.mubr.bf16.vlgmr.msra.gmra.mrb[104].mxu0 %v9107_v21  ;;  %v7935_v21 = vld [vmem:[%s9961_s5 + $0x740] sm:$0xff]  }
 0x38d   :  { %5054 = vmatprep.mubr.bf16.mxu0 %v4860_v19  ;;  %7078 = vmatpush3.bf16.msra.mxu0 %v7927_v38  ;;  %v7934_v19 = vld [vmem:[%s9961_s5 + $0x898] sm:$0xff]  }
 0x38e   :  { %7291 = vmatpush3.bf16.msra.mxu1 %v7926_v39  ;;  %7079 = vmatprep.subr.bf16.mxu0 %v7928_v29  ;;  %v7959_v29 = vld [vmem:[%s9961_s5 + $0x838] sm:$0xff]  }
 0x38f   :  { %7292 = vmatprep.subr.bf16.mxu1 %v7929_v18 }
 0x391   :  { %7080 = vmatpush3.bf16.msra.mxu0 %v7930_v43  ;;  %v7962_v43 = vld [vmem:[%s9961_s5 + $0x8d0] sm:$0xff]  }
 0x392   :  { %7293 = vmatpush3.bf16.msra.mxu1 %v7929_v18  ;;  %7081 = vmatprep.subr.bf16.mxu0 %v7931_v27  ;;  %v7961_v18 = vld [vmem:[%s9961_s5 + $0x8c8] sm:$0xff]  }
 0x393   :  { %7294 = vmatprep.subr.bf16.mxu1 %v7932_v28 }
 0x394   :  { %5055 = vmatmul.mubr.bf16.gmra.mrb[108].mxu0 %v4857_v9  ;;  %v7939_v9 = vld [vmem:[%s9961_s5 + $0x860] sm:$0xff]  }
 0x395   :  { %7082 = vmatpush3.bf16.msra.mxu0 %v7933_v46  ;;  %5364 = vmatprep.mubr.bf16.mxu0 %v9126_v2  ;;  %v7940_v2 = vld [vmem:[%s9961_s5 + $0x8a8] sm:$0xff]  }
 0x396   :  { %7295 = vmatpush3.bf16.msra.mxu1 %v7932_v28  ;;  %7083 = vmatprep.subr.bf16.mxu0 %v7934_v19  ;;  %v7963_v28 = vld [vmem:[%s9961_s5 + $0x8d8] sm:$0xff]  }
 0x397   :  { %7300 = vmatprep.subr.bf16.mxu1 %v7935_v21 }
 0x399   :  { %7297 = vmatmul.mubr.bf16.vlgmr.msra.gmra.mrb[16].mxu1 %v9987_v41  ;;  %7084 = vmatpush3.bf16.msra.mxu0 %v7936_v12 }
 0x39a   :  { %7301 = vmatpush3.bf16.msra.mxu1 %v7935_v21  ;;  %7316 = vmatprep.mubr.bf16.mxu1 %v9143_v56  ;;  %v7943_v56 = vld [vmem:[%s9961_s5 + $0x8b0] sm:$0xff]  }
 0x39b   :  { %7085 = vmatprep.subr.bf16.mxu0 %v7937_v49  ;;  %7302 = vmatprep.subr.bf16.mxu1 %v7938_v37  ;;  %v7965_v49 = vld [vmem:[%s9961_s5 + $0x8e8] sm:$0xff]  }
 0x39d   :  { %7086 = vmatpush3.bf16.msra.mxu0 %v7939_v9 }
 0x39e   :  { %7303 = vmatpush3.bf16.msra.mxu1 %v7938_v37  ;;  %7087 = vmatprep.subr.bf16.mxu0 %v7940_v2 }
 0x39f   :  { %v6827_v60 = vpop.f32.mrb[56].mxu0  ;;  %7304 = vmatprep.subr.bf16.mxu1 %v7941_v32 }
 0x3a0   :  { %v6828_v7 = vpop.f32.mrb[57].mxu0 }
 0x3a1   :  { %v6829_v34 = vadd.f32 %v6828_v7, %v6827_v60  ;;  %v6830_v8 = vpop.f32.mrb[58].mxu0  ;;  %7088 = vmatpush3.bf16.msra.mxu0 %v7942_v22  ;;  %v7966_v22 = vld [vmem:[%s9961_s5 + $0x8f0] sm:$0xff]  }
 0x3a2   :  { %v6831_v31 = vpop.f32.mrb[59].mxu0  ;;  %7305 = vmatpush3.bf16.msra.mxu1 %v7941_v32  ;;  %7089 = vmatprep.subr.bf16.mxu0 %v7943_v56  ;;  %v7967_v56 = vld [vmem:[%s9961_s5 + $0x8f8] sm:$0xff]  }
 0x3a3   :  { %v7387_v14 = vadd.f32 %v9761_v36, %v6829_v34  ;;  %7306 = vmatprep.subr.bf16.mxu1 %v7944_v5 }
 0x3a5   :  { %7090 = vmatpush3.bf16.msra.mxu0 %v7945_v61 }
 0x3a6   :  { %7307 = vmatpush3.bf16.msra.mxu1 %v7944_v5  ;;  %7091 = vmatprep.subr.bf16.mxu0 %v7946_v42 }
 0x3a7   :  { %v6833_v17 = vpop.f32.mrb[60].mxu0  ;;  %7308 = vmatprep.subr.bf16.mxu1 %v7947_v4 }
 0x3a8   :  { %v6834_v20 = vpop.f32.mrb[61].mxu0 }
 0x3a9   :  { %v6835_v63 = vadd.f32 %v6834_v20, %v6833_v17  ;;  %v6836_v52 = vpop.f32.mrb[62].mxu0  ;;  %7092 = vmatpush3.bf16.msra.mxu0 %v7948_v57  ;;  %v7968_v17 = vld [vmem:[%s9963_s7] sm:$0xff]   ;;  %v7997_v20 = vmov 0.0  }
 0x3aa   :  { %v6837_v11 = vpop.f32.mrb[63].mxu0  ;;  %7309 = vmatpush3.bf16.msra.mxu1 %v7947_v4  ;;  %7360 = vmatprep.subr.bf16.mxu0 %v7997_v20 }
 0x3ab   :  { %v7375_v6 = vadd.f32 %v9782_v16, %v6835_v63  ;;  %7310 = vmatprep.subr.bf16.mxu1 %v7949_v47  ;;  %v7960_v16 = vld [vmem:[%s9961_s5 + $0x8c0] sm:$0xff]  }
 0x3ac   :  { %5365 = vmatmul.mubr.bf16.vlgmr.msra.gmra.mrb[112].mxu0 %v9157_v45  ;;  %v9989_v45 = vrot.slane %v8875_v23, 4 }
 0x3ad   :  { %5371 = vmatprep.mubr.bf16.mxu0 %v9988_v13  ;;  %7361 = vmatpush3.bf16.msra.mxu0 %v7968_v17 }
 0x3ae   :  { %7311 = vmatpush3.bf16.msra.mxu1 %v7949_v47  ;;  %7362 = vmatprep.subr.bf16.mxu0 %v7997_v20 }
 0x3af   :  { %7312 = vmatprep.subr.bf16.mxu1 %v7950_v33 }
 0x3b2   :  { %7313 = vmatpush3.bf16.msra.mxu1 %v7950_v33 }
 0x3b3   :  { %7314 = vmatprep.subr.bf16.mxu1 %v7951_v10 }
 0x3b4   :  { %5372 = vmatmul.mubr.bf16.gmra.mrb[116].mxu0 %v5164_v50  ;;  %v7955_v50 = vld [vmem:[%s9961_s5 + $0x818] sm:$0xff]  }
 0x3b5   :  { %7368 = vmatprep.mubr.msk.bf16.mxu0 %vm7998_vm13, %v7997_v20 }
 0x3b6   :  { %7315 = vmatpush3.bf16.msra.mxu1 %v7951_v10 }
 0x3b7   :  { %7320 = vmatprep.subr.bf16.mxu1 %v7952_v48 }
 0x3b9   :  { %7317 = vmatmul.mubr.bf16.vlgmr.msra.gmra.mrb[16].mxu1 %v9989_v45 }
 0x3ba   :  { %7321 = vmatpush3.bf16.msra.mxu1 %v7952_v48  ;;  %7336 = vmatprep.mubr.bf16.mxu1 %v9148_v53  ;;  %v7956_v53 = vld [vmem:[%s9961_s5 + $0x820] sm:$0xff]  }
 0x3bb   :  { %7322 = vmatprep.subr.bf16.mxu1 %v7953_v54 }
 0x3be   :  { %7323 = vmatpush3.bf16.msra.mxu1 %v7953_v54 }
 0x3bf   :  { %v6865_v55 = vpop.f32.mrb[64].mxu0  ;;  %7324 = vmatprep.subr.bf16.mxu1 %v7954_v40 }
 0x3c0   :  { %v6866_v1 = vpop.f32.mrb[65].mxu0 }
 0x3c1   :  { %v6867_v58 = vadd.f32 %v6866_v1, %v6865_v55  ;;  %v6868_v36 = vpop.f32.mrb[66].mxu0 }
 0x3c2   :  { %v6869_v25 = vpop.f32.mrb[67].mxu0  ;;  %7325 = vmatpush3.bf16.msra.mxu1 %v7954_v40 }
 0x3c3   :  { %v7388_v30 = vadd.f32 %v7387_v14, %v6867_v58  ;;  %7326 = vmatprep.subr.bf16.mxu1 %v7955_v50 }
 0x3c6   :  { %7327 = vmatpush3.bf16.msra.mxu1 %v7955_v50 }
 0x3c7   :  { %v6871_v0 = vpop.f32.mrb[68].mxu0  ;;  %7328 = vmatprep.subr.bf16.mxu1 %v7956_v53 }
 0x3c8   :  { %v6872_v39 = vpop.f32.mrb[69].mxu0 }
 0x3c9   :  { %v6873_v26 = vadd.f32 %v6872_v39, %v6871_v0  ;;  %v6874_v51 = vpop.f32.mrb[70].mxu0 }
 0x3ca   :  { %v6875_v15 = vpop.f32.mrb[71].mxu0  ;;  %7329 = vmatpush3.bf16.msra.mxu1 %v7956_v53  ;;  %v7970_v51 = vld [vmem:[%s9963_s7 + $0x10] sm:$0xff]  }
 0x3cb   :  { %v7376_v38 = vadd.f32 %v7375_v6, %v6873_v26  ;;  %7330 = vmatprep.subr.bf16.mxu1 %v7957_v62  ;;  %v7969_v26 = vld [vmem:[%s9963_s7 + $0x8] sm:$0xff]   ;;  %v7971_v15 = vld [vmem:[%s9963_s7 + $0x18] sm:$0xff]  }
 0x3cc   :  { %7363 = vmatpush3.bf16.msra.mxu0 %v7969_v26 }
 0x3cd   :  { %7364 = vmatprep.subr.bf16.mxu0 %v7997_v20 }
 0x3ce   :  { %7331 = vmatpush3.bf16.msra.mxu1 %v7957_v62 }
 0x3cf   :  { %7332 = vmatprep.subr.bf16.mxu1 %v7958_v35 }
 0x3d0   :  { %7365 = vmatpush3.bf16.msra.mxu0 %v7970_v51 }
 0x3d1   :  { %7366 = vmatprep.subr.bf16.mxu0 %v7997_v20  ;;  %v6653_v20 = vld [vmem:[%s9964_s8] ss:$0 sm:$0xff] }
 0x3d2   :  { %7333 = vmatpush3.bf16.msra.mxu1 %v7958_v35 }
 0x3d3   :  { %7334 = vmatprep.subr.bf16.mxu1 %v7959_v29 }
 0x3d4   :  { %7367 = vmatpush3.bf16.msra.mxu0 %v7971_v15 }
 0x3d6   :  { %7335 = vmatpush3.bf16.msra.mxu1 %v7959_v29 }
 0x3d7   :  { %7340 = vmatprep.subr.bf16.mxu1 %v7960_v16 }
 0x3d9   :  { %7337 = vmatmul.mubr.bf16.vlgmr.msra.gmra.mrb[16].mxu1 %v4863_v3 }
 0x3da   :  { %7341 = vmatpush3.bf16.msra.mxu1 %v7960_v16  ;;  %7356 = vmatprep.mubr.bf16.mxu1 %v9169_v44  ;;  %v7964_v44 = vld [vmem:[%s9961_s5 + $0x8e0] sm:$0xff]  }
 0x3db   :  { %7342 = vmatprep.subr.bf16.mxu1 %v7961_v18 }
 0x3de   :  { %7343 = vmatpush3.bf16.msra.mxu1 %v7961_v18 }
 0x3df   :  { %v6903_v27 = vpop.f32.mrb[72].mxu0  ;;  %7344 = vmatprep.subr.bf16.mxu1 %v7962_v43 }
 0x3e0   :  { %v6904_v46 = vpop.f32.mrb[73].mxu0 }
 0x3e1   :  { %v6905_v19 = vadd.f32 %v6904_v46, %v6903_v27  ;;  %v6906_v21 = vpop.f32.mrb[74].mxu0 }
 0x3e2   :  { %v6907_v59 = vpop.f32.mrb[75].mxu0  ;;  %7345 = vmatpush3.bf16.msra.mxu1 %v7962_v43 }
 0x3e3   :  { %v7389_v3 = vadd.f32 %v7388_v30, %v6905_v19  ;;  %7346 = vmatprep.subr.bf16.mxu1 %v7963_v28 }
 0x3e6   :  { %7347 = vmatpush3.bf16.msra.mxu1 %v7963_v28 }
 0x3e7   :  { %v6909_v12 = vpop.f32.mrb[76].mxu0  ;;  %7348 = vmatprep.subr.bf16.mxu1 %v7964_v44 }
 0x3e8   :  { %v6910_v37 = vpop.f32.mrb[77].mxu0 }
 0x3e9   :  { %v6911_v41 = vadd.f32 %v6910_v37, %v6909_v12  ;;  %v6912_v9 = vpop.f32.mrb[78].mxu0 }
 0x3ea   :  { %v6913_v2 = vpop.f32.mrb[79].mxu0  ;;  %7349 = vmatpush3.bf16.msra.mxu1 %v7964_v44 }
 0x3eb   :  { %v7377_v32 = vadd.f32 %v7376_v38, %v6911_v41  ;;  %7350 = vmatprep.subr.bf16.mxu1 %v7965_v49 }
 0x3ee   :  { %7351 = vmatpush3.bf16.msra.mxu1 %v7965_v49 }
 0x3ef   :  { %7352 = vmatprep.subr.bf16.mxu1 %v7966_v22 }
 0x3f2   :  { %7353 = vmatpush3.bf16.msra.mxu1 %v7966_v22 }
 0x3f3   :  { %7354 = vmatprep.subr.bf16.mxu1 %v7967_v56 }
 0x3f6   :  { %7355 = vmatpush3.bf16.msra.mxu1 %v7967_v56 }
 0x3f9   :  { %7357 = vmatmul.mubr.bf16.vlgmr.msra.gmra.mrb[16].mxu1 %v5178_v24 }
 0x3ff   :  { %v6941_v60 = vpop.f32.mrb[80].mxu0 }
 0x400   :  { %v6942_v5 = vpop.f32.mrb[81].mxu0 }
 0x401   :  { %v6943_v7 = vadd.f32 %v6942_v5, %v6941_v60  ;;  %v6944_v34 = vpop.f32.mrb[82].mxu0 }
 0x402   :  { %v6945_v8 = vpop.f32.mrb[83].mxu0 }
 0x403   :  { %v7390_v61 = vadd.f32 %v7389_v3, %v6943_v7 }
 0x407   :  { %v6947_v31 = vpop.f32.mrb[84].mxu0 }
 0x408   :  { %v6948_v42 = vpop.f32.mrb[85].mxu0 }
 0x409   :  { %v6949_v14 = vadd.f32 %v6948_v42, %v6947_v31  ;;  %v6950_v4 = vpop.f32.mrb[86].mxu0  ;;  %v6652_v42 = vld [vmem:[%s9962_s6] ss:$0 sm:$0xff]  ;;  %s7972_s6 = scalar_lea.vmem %s5533_s10, 32 }
 0x40a   :  { %v6951_v57 = vpop.f32.mrb[87].mxu0  ;;  %p7973_p0 = scmp.ne.s32.totalorder %s5533_s10, %s7972_s6  ;;  %p7978_p2 = scmp.lt.s32.totalorder %s7972_s6, %s7972_s6 }
 0x40b   :  { %v7378_v47 = vadd.f32 %v7377_v32, %v6949_v14 }
 0x40c   :  { %p7979_p3 = por %p7978_p2, %p7977_p1 }
 0x40e   :  { %p7980_p4 = pnand %p7979_p3, %p7973_p0 }
 0x41f   :  { %v6979_v23 = vpop.f32.mrb[88].mxu0 }
 0x420   :  { %v6980_v24 = vpop.f32.mrb[89].mxu0 }
 0x421   :  { %v6981_v63 = vadd.f32 %v6980_v24, %v6979_v23  ;;  %v6982_v52 = vpop.f32.mrb[90].mxu0 }
 0x422   :  { %v6983_v11 = vpop.f32.mrb[91].mxu0 }
 0x423   :  { %v7391_v6 = vadd.f32 %v7390_v61, %v6981_v63 }
 0x427   :  { %v6985_v33 = vpop.f32.mrb[92].mxu0 }
 0x428   :  { %v6986_v13 = vpop.f32.mrb[93].mxu0 }
 0x429   :  { %v6987_v10 = vadd.f32 %v6986_v13, %v6985_v33  ;;  %v6988_v48 = vpop.f32.mrb[94].mxu0 }
 0x42a   :  { %v6989_v54 = vpop.f32.mrb[95].mxu0 }
 0x42b   :  { %v7379_v45 = vadd.f32 %v7378_v47, %v6987_v10 }
 0x43f   :  { %v7017_v40 = vpop.f32.mrb[96].mxu0 }
 0x440   :  { %v7018_v55 = vpop.f32.mrb[97].mxu0 }
 0x441   :  { %v7019_v50 = vadd.f32 %v7018_v55, %v7017_v40  ;;  %v7020_v1 = vpop.f32.mrb[98].mxu0 }
 0x442   :  { %v7021_v58 = vpop.f32.mrb[99].mxu0 }
 0x443   :  { %v7392_v36 = vadd.f32 %v7391_v6, %v7019_v50 }
 0x447   :  { %v7023_v25 = vpop.f32.mrb[100].mxu0 }
 0x448   :  { %v7024_v30 = vpop.f32.mrb[101].mxu0 }
 0x449   :  { %v7025_v53 = vadd.f32 %v7024_v30, %v7023_v25  ;;  %v7026_v0 = vpop.f32.mrb[102].mxu0 }
 0x44a   :  { %v7027_v62 = vpop.f32.mrb[103].mxu0 }
 0x44b   :  { %v7380_v39 = vadd.f32 %v7379_v45, %v7025_v53 }
 0x45f   :  { %v7055_v38 = vpop.f32.mrb[104].mxu0 }
 0x460   :  { %v7056_v35 = vpop.f32.mrb[105].mxu0 }
 0x461   :  { %v7057_v29 = vadd.f32 %v7056_v35, %v7055_v38  ;;  %v7058_v16 = vpop.f32.mrb[106].mxu0 }
 0x462   :  { %v7059_v18 = vpop.f32.mrb[107].mxu0 }
 0x463   :  { %v7393_v43 = vadd.f32 %v7392_v36, %v7057_v29 }
 0x467   :  { %v7061_v27 = vpop.f32.mrb[108].mxu0 }
 0x468   :  { %v7062_v28 = vpop.f32.mrb[109].mxu0 }
 0x469   :  { %v7063_v46 = vadd.f32 %v7062_v28, %v7061_v27  ;;  %v7064_v19 = vpop.f32.mrb[110].mxu0 }
 0x46a   :  { %v7065_v21 = vpop.f32.mrb[111].mxu0 }
 0x46b   :  { %v7381_v59 = vadd.f32 %v7380_v39, %v7063_v46 }
 0x47f   :  { %v7093_v3 = vpop.f32.mrb[112].mxu0 }
 0x480   :  { %v7094_v44 = vpop.f32.mrb[113].mxu0 }
 0x481   :  { %v7095_v12 = vadd.f32 %v7094_v44, %v7093_v3  ;;  %v7096_v49 = vpop.f32.mrb[114].mxu0 }
 0x482   :  { %v7097_v37 = vpop.f32.mrb[115].mxu0 }
 0x483   :  { %v7394_v41 = vadd.f32 %v7393_v43, %v7095_v12 }
 0x487   :  { %v7099_v9 = vpop.f32.mrb[116].mxu0 }
 0x488   :  { %v7100_v2 = vpop.f32.mrb[117].mxu0 }
 0x489   :  { %v7101_v32 = vadd.f32 %v7100_v2, %v7099_v9  ;;  %v7102_v22 = vpop.f32.mrb[118].mxu0 }
 0x48a   :  { %v7103_v56 = vpop.f32.mrb[119].mxu0 }
 0x48b   :  { %v7382_v60 = vadd.f32 %v7381_v59, %v7101_v32 }
 0x4cc   :  { %v7358_v5 = vpop.f32.mrb[16].mxu1 }
 0x4cd   :  { %v7383_v7 = vadd.f32 %v7382_v60, %v7358_v5  ;;  %v5413_v34 = vpop.f32.mrb[17].mxu1 }
 0x4ce   :  { %v7395_v8 = vadd.f32 %v7394_v41, %v5413_v34  ;;  %v7359_v61 = vpop.f32.mrb[18].mxu1 }
 0x4cf   :  { %v5429_v31 = vrot.slane %v7383_v7, 7  ;;  %v5416_v14 = vpop.f32.mrb[19].mxu1 }
 0x4d1   :  { %v5432_v4 = vsel %vm5431_vm14, %v7395_v8, %v5429_v31 }
 0x4d2   :  { %v5440_v57 = vadd.f32 %v6652_v42, %v5432_v4 }
 0x4d4   :  { %v5441_v17 = vmax.f32 %v5440_v57, 0.0 }
 0x4d6   :  { %v5442_v47 = vpack.c.bf16 %v5441_v17, %v5441_v17 }
 0x4d8   :  { %7369 = vmatmul.mubr.msk.bf16.vlgmr.msra.gmra.mrb[120].mxu0 %vm113_vm1, %v5442_v47 }
 0x5ab   :  { %v5519_v23 = vpop.f32.mrb[120].mxu0 }
 0x5ac   :  { %v5520_v24 = vadd.f32 %v6653_v20, %v5519_v23  ;;  %v7370_v63 = vpop.f32.mrb[121].mxu0 }
 0x5ad   :  { %v5522_v52 = vpop.f32.mrb[122].mxu0 }
 0x5ae   :  { %5525 = vst [vmem:[#allocation2] sm:$0x3] %v5520_v24  ;;  %v7371_v11 = vpop.f32.mrb[123].mxu0 }
 0x5af   :  { %7983 = shalt.err (!%p7980_p4)
}
 0x5b0   :  { %s7984_s8 = scalar_lea.hbm %s9965_s9, 32 }
 0x5b1   :  { %p7985_p5 = scmp.ne.s32.totalorder %s9965_s9, %s7984_s8  ;;  %p7988_p6 = scmp.lt.u32.totalorder %s7984_s8, %s9965_s9 }
 0x5b3   :  { %p7990_p7 = pnand %p7988_p6, %p7985_p5 }
 0x5b5   :  { %7993 = shalt.err (!%p7990_p7)
}
 0x5b6   :  { %5535 = dma.vmem_to_hbm [thread:$0]  %s5533_s10, 32, %s9965_s9, [#allocation3]  }
 0x5b7   :  { %7994 = dma.done.wait [#allocation3], 32  }
 0x5b8   :  { %7995 = vsyncadd [#allocation3], 4294967264 }
 0x5b9   :  { %5539 = vsyncpa [#allocation3], 1 }

</bundles_post_ra>
